<compile_context>
chip_gen: v6e
topology: v6e:2x2x1
jax: 0.10.0
libtpu: 0.0.40
codegen_flags: <defaults>
</compile_context>

<pallas_src>
import functools

import numpy as np

import jax
import jax.numpy as jnp
from jax import lax
from jax.experimental import pallas as pl
from jax.experimental.pallas import tpu as pltpu


CP = 8        # channel padding (sublane multiple)
MARGIN = 128  # lane margin so tap-shift windows are plain static slices


def _round_up(x, m):
    return (x + m - 1) // m * m


# ---------------------------------------------------------------------------
# Fused Pallas kernel: the whole Upblock forward for one batch element.
# ---------------------------------------------------------------------------
def _upblock_kernel(x1_ref, x2_ref, d_ref, w_up_ref, w_ca0_ref, w_ca1_ref,
                    w_c1_ref, w_c2_ref, shift_ref, mask_ref, o_ref, *,
                    grid_w, flat_len, slope):
    L = flat_len
    mask = mask_ref[...] > 0.0                       # (CP, L) interior mask

    def conv(x, w_ref, offsets, shift, activate):
        """Stride-1 conv on the padded/flattened grid, fused affine (+LReLU).

        x:      (Cin_pad, L) activation, zero at grid borders / tail
        w_ref:  (K*K, Cout_pad, Cin_pad) tap-major weights (BN scale folded in)
        shift:  (Cout_pad, 1) per-channel shift (BN shift or conv bias)
        """
        cin = x.shape[0]
        cout = w_ref.shape[1]
        zeros = jnp.zeros((cin, MARGIN), jnp.float32)
        xw = jnp.concatenate([zeros, x, zeros], axis=-1)   # (cin, L + 2*MARGIN)
        acc = jnp.zeros((cout, L), jnp.float32)
        for t, off in enumerate(offsets):
            start = MARGIN + off
            win = xw[:, start:start + L]                   # static lane window
            acc = acc + jnp.dot(w_ref[t], win,
                                preferred_element_type=jnp.float32)
        y = acc + shift
        if activate:                                       # compile-time branch
            y = jnp.where(y >= 0.0, y, slope * y)          # LeakyReLU(0.2)
        return jnp.where(mask, y, 0.0)                     # re-zero halo/tail

    offs3 = [(kh - 1) * grid_w + (kw - 1) for kh in range(3) for kw in range(3)]
    offs4 = [kh * grid_w + kw for kh in range(4) for kw in range(4)]

    # --- Upsample.net: ConvTranspose2d(k=4, s=2, p=1) + bias -----------------
    # zero-dilation + pad is one 0/1 placement matmul straight onto the padded
    # output grid (stays in VMEM), then a plain 4x4 conv with flipped weights.
    x1d = jnp.dot(x1_ref[0], d_ref[...], preferred_element_type=jnp.float32)
    y = conv(x1d, w_up_ref, offs4, shift_ref[0], activate=False)
    # --- Upsample.conv_after: ConvBlock x2 -----------------------------------
    y = conv(y, w_ca0_ref, offs3, shift_ref[1], activate=True)
    y = conv(y, w_ca1_ref, offs3, shift_ref[2], activate=True)
    # --- torch.cat([x1_up, x2], dim=1): stack along the channel sublanes -----
    ct = jnp.concatenate([y, x2_ref[0]], axis=0)           # (2*CP, L)
    # --- conv1, conv2 ---------------------------------------------------------
    ct = conv(ct, w_c1_ref, offs3, shift_ref[3], activate=True)
    out = conv(ct, w_c2_ref, offs3, shift_ref[4], activate=True)
    o_ref[...] = out[None].astype(o_ref.dtype)


# ---------------------------------------------------------------------------
# Host-side weight preparation (BN folding, tap-major layout, channel padding)
# ---------------------------------------------------------------------------
def _fold_bn(gamma, beta, mean, var, eps=1e-5):
    scale = gamma / jnp.sqrt(var + eps)
    return scale, beta - mean * scale


def _pad_col(v):
    v = v.astype(jnp.float32)
    return jnp.pad(v, (0, CP - v.shape[0])).reshape(CP, 1)


def _conv3_taps(w_oihw, scale, cin_pad=CP):
    """(Cout,Cin,3,3) OIHW -> (9, CP, cin_pad) tap-major, BN scale folded in."""
    co, ci, kh, kw = w_oihw.shape
    t = jnp.transpose(w_oihw, (2, 3, 0, 1)).reshape(kh * kw, co, ci)
    t = (t * scale[None, :, None]).astype(jnp.float32)
    out = jnp.zeros((kh * kw, CP, cin_pad), jnp.float32)
    return out.at[:, :co, :ci].set(t)


def _conv3_taps_concat(w_oihw, scale, n_first):
    """conv1 weights: input channels [0:n_first] read the upsampled branch
    (sublanes 0..CP), the rest read x2 (sublanes CP..2*CP)."""
    co, ci, kh, kw = w_oihw.shape
    t = jnp.transpose(w_oihw, (2, 3, 0, 1)).reshape(kh * kw, co, ci)
    t = (t * scale[None, :, None]).astype(jnp.float32)
    out = jnp.zeros((kh * kw, CP, 2 * CP), jnp.float32)
    out = out.at[:, :co, :n_first].set(t[:, :, :n_first])
    out = out.at[:, :co, CP:CP + (ci - n_first)].set(t[:, :, n_first:])
    return out


def _convT_taps(w_t):
    """(Cin,Cout,4,4) ConvTranspose weight -> flipped standard-conv taps
    (16, CP, CP) for the dilate+pad formulation."""
    ci, co, kh, kw = w_t.shape
    t = jnp.transpose(w_t[:, :, ::-1, ::-1], (2, 3, 1, 0)).reshape(kh * kw, co, ci)
    out = jnp.zeros((kh * kw, CP, CP), jnp.float32)
    return out.at[:, :co, :ci].set(t.astype(jnp.float32))


# ---------------------------------------------------------------------------
# Wrapper: layout plumbing + single fused pallas_call
# ---------------------------------------------------------------------------
def upblock_forward(params, x1_nchw, x2_nchw):
    B, c_in, H, W = x1_nchw.shape
    c_out = params["up_b"].shape[0]
    c_x2 = x2_nchw.shape[1]
    Ho, Wo = 2 * H, 2 * W                      # upsampled spatial size
    Hg, Wg = Ho + 2, Wo + 2                    # +1 halo for the 3x3 convs
    L = _round_up(Hg * Wg, 128)                # lane-dense flattened grid

    # ---- layout plumbing on the (tiny) inputs: NCHW -> channel-padded flat --
    x1f = jnp.pad(x1_nchw.astype(jnp.float32),
                  ((0, 0), (0, CP - c_in), (0, 0), (0, 0)))
    x1f = x1f.reshape(B, CP, H * W)
    x2p = jnp.pad(x2_nchw.astype(jnp.float32),
                  ((0, 0), (0, CP - c_x2), (1, 1), (1, 1)))
    x2p = x2p.reshape(B, CP, Hg * Wg)
    x2p = jnp.pad(x2p, ((0, 0), (0, 0), (0, L - Hg * Wg)))

    # ---- constant placement matrix: raw x1 pixel -> dilated+padded position -
    p = np.arange(H * W)
    ih, iw = p // W, p % W
    q = (2 * ih + 3) * Wg + (2 * iw + 3)
    d_np = np.zeros((H * W, L), np.float32)
    d_np[p, q] = 1.0
    d_mat = jnp.asarray(d_np)

    # ---- interior mask of the padded output grid ----------------------------
    qs = np.arange(L)
    r, c = qs // Wg, qs % Wg
    m = ((qs < Hg * Wg) & (r >= 1) & (r <= Ho) & (c >= 1) & (c <= Wo))
    mask = jnp.asarray(np.broadcast_to(m.astype(np.float32), (CP, L)))

    # ---- fold BN into the conv weights, build tap-major padded weights ------
    w0, g0, b0, m0, v0 = params["ca0"]
    w1, g1, b1, m1, v1 = params["ca1"]
    wc1, gc1, bc1, mc1, vc1 = params["c1"]
    wc2, gc2, bc2, mc2, vc2 = params["c2"]
    s0, sh0 = _fold_bn(g0, b0, m0, v0)
    s1, sh1 = _fold_bn(g1, b1, m1, v1)
    sc1, shc1 = _fold_bn(gc1, bc1, mc1, vc1)
    sc2, shc2 = _fold_bn(gc2, bc2, mc2, vc2)

    w_up_t = _convT_taps(params["up_w"])
    w_ca0_t = _conv3_taps(w0, s0)
    w_ca1_t = _conv3_taps(w1, s1)
    w_c1_t = _conv3_taps_concat(wc1, sc1, n_first=c_out)
    w_c2_t = _conv3_taps(wc2, sc2)
    shifts = jnp.stack([_pad_col(params["up_b"]), _pad_col(sh0), _pad_col(sh1),
                        _pad_col(shc1), _pad_col(shc2)])          # (5, CP, 1)

    kernel = functools.partial(_upblock_kernel, grid_w=Wg, flat_len=L,
                               slope=0.2)
    out = pl.pallas_call(
        kernel,
        out_shape=jax.ShapeDtypeStruct((B, CP, L), jnp.float32),
        grid=(B,),
        in_specs=[
            pl.BlockSpec((1, CP, H * W), lambda n: (n, 0, 0)),   # x1 (flat)
            pl.BlockSpec((1, CP, L), lambda n: (n, 0, 0)),       # x2 (padded)
            pl.BlockSpec((H * W, L), lambda n: (0, 0)),          # placement
            pl.BlockSpec((16, CP, CP), lambda n: (0, 0, 0)),     # w up
            pl.BlockSpec((9, CP, CP), lambda n: (0, 0, 0)),      # w ca0
            pl.BlockSpec((9, CP, CP), lambda n: (0, 0, 0)),      # w ca1
            pl.BlockSpec((9, CP, 2 * CP), lambda n: (0, 0, 0)),  # w c1
            pl.BlockSpec((9, CP, CP), lambda n: (0, 0, 0)),      # w c2
            pl.BlockSpec((5, CP, 1), lambda n: (0, 0, 0)),       # shifts
            pl.BlockSpec((CP, L), lambda n: (0, 0)),             # mask
        ],
        out_specs=pl.BlockSpec((1, CP, L), lambda n: (n, 0, 0)),
        compiler_params=pltpu.CompilerParams(
            dimension_semantics=("parallel",)),
    )(x1f, x2p, d_mat, w_up_t, w_ca0_t, w_ca1_t, w_c1_t, w_c2_t, shifts, mask)

    # lane-dense output slab -> NCHW (free reshape + interior slice)
    out = out[:, :c_out, :Hg * Wg].reshape(B, c_out, Hg, Wg)
    return out[:, :, 1:1 + Ho, 1:1 + Wo]


# ---------------------------------------------------------------------------
# Pure-JAX reference (independent of the Pallas path) for verification
# ---------------------------------------------------------------------------
def _ref_conv_block(x, w_oihw, gamma, beta, mean, var, eps=1e-5, slope=0.2):
    w_hwio = jnp.transpose(w_oihw, (2, 3, 1, 0))
    y = lax.conv_general_dilated(x, w_hwio, (1, 1), ((1, 1), (1, 1)),
                                 dimension_numbers=('NHWC', 'HWIO', 'NHWC'))
    scale = gamma / jnp.sqrt(var + eps)
    shift = beta - mean * scale
    y = y * scale + shift
    return jnp.where(y >= 0, y, slope * y)


def _ref_conv_transpose(x, w_t, bias):
    w_hwio = jnp.transpose(w_t[:, :, ::-1, ::-1], (2, 3, 0, 1))
    y = lax.conv_general_dilated(x, w_hwio, (1, 1), ((2, 2), (2, 2)),
                                 lhs_dilation=(2, 2),
                                 dimension_numbers=('NHWC', 'HWIO', 'NHWC'))
    return y + bias


def upblock_reference(params, x1_nchw, x2_nchw):
    x1 = jnp.transpose(x1_nchw, (0, 2, 3, 1))
    x2 = jnp.transpose(x2_nchw, (0, 2, 3, 1))
    y = _ref_conv_transpose(x1, params["up_w"], params["up_b"])
    y = _ref_conv_block(y, *params["ca0"])
    y = _ref_conv_block(y, *params["ca1"])
    ct = jnp.concatenate([y, x2], axis=-1)
    ct = _ref_conv_block(ct, *params["c1"])
    out = _ref_conv_block(ct, *params["c2"])
    return jnp.transpose(out, (0, 3, 1, 2))


# ---------------------------------------------------------------------------
# Main
# ---------------------------------------------------------------------------
if __name__ == "__main__":
    B, IN_F, OUT_F, H, W = 2, 4, 4, 8, 8
    CONCAT_F = OUT_F * 2

    key = jax.random.PRNGKey(0)
    keys = jax.random.split(key, 8)

    def bn_params(k, c):
        k1, k2, k3, k4 = jax.random.split(k, 4)
        gamma = 1.0 + 0.1 * jax.random.normal(k1, (c,), jnp.float32)
        beta = 0.1 * jax.random.normal(k2, (c,), jnp.float32)
        mean = 0.1 * jax.random.normal(k3, (c,), jnp.float32)
        var = 1.0 + 0.1 * jnp.abs(jax.random.normal(k4, (c,), jnp.float32))
        return gamma, beta, mean, var

    def convblock_params(k, cin, cout):
        kw_, kb = jax.random.split(k, 2)
        w = 0.1 * jax.random.normal(kw_, (cout, cin, 3, 3), jnp.float32)  # OIHW
        return (w,) + bn_params(kb, cout)

    params = {
        # ConvTranspose2d weight has PyTorch layout (Cin, Cout, kH, kW)
        "up_w": 0.1 * jax.random.normal(keys[2], (IN_F, OUT_F, 4, 4), jnp.float32),
        "up_b": 0.1 * jax.random.normal(keys[3], (OUT_F,), jnp.float32),
        "ca0": convblock_params(keys[4], OUT_F, OUT_F),
        "ca1": convblock_params(keys[5], OUT_F, OUT_F),
        "c1": convblock_params(keys[6], CONCAT_F, OUT_F),
        "c2": convblock_params(keys[7], OUT_F, OUT_F),
    }

    # x1 is upsampled 2x, so x2 has twice the spatial size (NCHW like PyTorch)
    x1 = jax.random.normal(keys[0], (B, IN_F, H, W), jnp.float32)
    x2 = jax.random.normal(keys[1], (B, OUT_F, 2 * H, 2 * W), jnp.float32)

    out = upblock_forward(params, x1, x2)
    out = jax.block_until_ready(out)

    assert out.shape == (B, OUT_F, 2 * H, 2 * W), out.shape

    ref = upblock_reference(params, x1, x2)
    max_err = float(jnp.max(jnp.abs(out - ref)))
    assert jnp.allclose(out, ref, atol=1e-4, rtol=1e-4), max_err

    print("KERNEL_OK")
</pallas_src>

<mosaic_0001>
module attributes {stable_mosaic.version = 11 : i64} {
  func.func @_upblock_kernel(%arg0: i32, %arg1: memref<1x8x64xf32, #tpu.memory_space<vmem>>, %arg2: memref<1x8x384xf32, #tpu.memory_space<vmem>>, %arg3: memref<64x384xf32, #tpu.memory_space<vmem>>, %arg4: memref<16x8x8xf32, #tpu.memory_space<vmem>>, %arg5: memref<9x8x8xf32, #tpu.memory_space<vmem>>, %arg6: memref<9x8x8xf32, #tpu.memory_space<vmem>>, %arg7: memref<9x8x16xf32, #tpu.memory_space<vmem>>, %arg8: memref<9x8x8xf32, #tpu.memory_space<vmem>>, %arg9: memref<5x8x1xf32, #tpu.memory_space<vmem>>, %arg10: memref<8x384xf32, #tpu.memory_space<vmem>>, %arg11: memref<1x8x384xf32, #tpu.memory_space<vmem>>) attributes {dimension_semantics = [#tpu.dimension_semantics<parallel>], iteration_bounds = array<i64: 2>, scalar_prefetch = 0 : i64, scratch_operands = 0 : i64, tpu.core_type = #tpu.core_type<tc>, window_params = [{transform_indices = @transform_0, window_bounds = array<i64: 1, 8, 64>}, {transform_indices = @transform_1, window_bounds = array<i64: 1, 8, 384>}, {pipeline_mode = #tpu.pipeline_mode<synchronous>, transform_indices = @transform_2, window_bounds = array<i64: 64, 384>}, {pipeline_mode = #tpu.pipeline_mode<synchronous>, transform_indices = @transform_3, window_bounds = array<i64: 16, 8, 8>}, {pipeline_mode = #tpu.pipeline_mode<synchronous>, transform_indices = @transform_4, window_bounds = array<i64: 9, 8, 8>}, {pipeline_mode = #tpu.pipeline_mode<synchronous>, transform_indices = @transform_5, window_bounds = array<i64: 9, 8, 8>}, {pipeline_mode = #tpu.pipeline_mode<synchronous>, transform_indices = @transform_6, window_bounds = array<i64: 9, 8, 16>}, {pipeline_mode = #tpu.pipeline_mode<synchronous>, transform_indices = @transform_7, window_bounds = array<i64: 9, 8, 8>}, {pipeline_mode = #tpu.pipeline_mode<synchronous>, transform_indices = @transform_8, window_bounds = array<i64: 5, 8, 1>}, {pipeline_mode = #tpu.pipeline_mode<synchronous>, transform_indices = @transform_9, window_bounds = array<i64: 8, 384>}, {transform_indices = @transform_10, window_bounds = array<i64: 1, 8, 384>}]} {
    %c0 = arith.constant 0 : index
    %c0_0 = arith.constant 0 : index
    %0 = vector.load %arg10[%c0, %c0_0] : memref<8x384xf32, #tpu.memory_space<vmem>>, vector<8x384xf32>
    %cst = arith.constant 0.000000e+00 : f32
    %1 = vector.broadcast %cst : f32 to vector<8x384xf32>
    %2 = arith.cmpf ogt, %0, %1 : vector<8x384xf32>
    %c0_1 = arith.constant 0 : index
    %c0_2 = arith.constant 0 : index
    %c0_3 = arith.constant 0 : index
    %3 = vector.load %arg1[%c0_1, %c0_2, %c0_3] : memref<1x8x64xf32, #tpu.memory_space<vmem>>, vector<1x8x64xf32>
    %4 = vector.shape_cast %3 : vector<1x8x64xf32> to vector<8x64xf32>
    %c0_4 = arith.constant 0 : index
    %c0_5 = arith.constant 0 : index
    %5 = vector.load %arg3[%c0_4, %c0_5] : memref<64x384xf32, #tpu.memory_space<vmem>>, vector<64x384xf32>
    %cst_6 = arith.constant dense<0.000000e+00> : vector<8x384xf32>
    %6 = tpu.matmul %4, %5, %cst_6 {dimension_numbers = #tpu.dot_dimension_numbers<[1], [0], [0], [1], [0, 0, 1, 1], [], []>} : vector<8x64xf32>, vector<64x384xf32>, vector<8x384xf32> -> vector<8x384xf32>
    %c0_7 = arith.constant 0 : index
    %c0_8 = arith.constant 0 : index
    %c0_9 = arith.constant 0 : index
    %7 = vector.load %arg9[%c0_7, %c0_8, %c0_9] : memref<5x8x1xf32, #tpu.memory_space<vmem>>, vector<1x8x1xf32>
    %8 = vector.shape_cast %7 : vector<1x8x1xf32> to vector<8x1xf32>
    %cst_10 = arith.constant 0.000000e+00 : f32
    %9 = vector.broadcast %cst_10 : f32 to vector<8x128xf32>
    %10 = tpu.concatenate %9, %6, %9 in 1 : vector<8x128xf32>, vector<8x384xf32>, vector<8x128xf32> -> vector<8x640xf32>
    %cst_11 = arith.constant 0.000000e+00 : f32
    %11 = vector.broadcast %cst_11 : f32 to vector<8x384xf32>
    %12 = vector.extract_strided_slice %10 {offsets = [0, 128], sizes = [8, 384], strides = [1, 1]} : vector<8x640xf32> to vector<8x384xf32>
    %c0_12 = arith.constant 0 : index
    %c0_13 = arith.constant 0 : index
    %c0_14 = arith.constant 0 : index
    %13 = vector.load %arg4[%c0_12, %c0_13, %c0_14] : memref<16x8x8xf32, #tpu.memory_space<vmem>>, vector<1x8x8xf32>
    %14 = vector.shape_cast %13 : vector<1x8x8xf32> to vector<8x8xf32>
    %cst_15 = arith.constant dense<0.000000e+00> : vector<8x384xf32>
    %15 = tpu.matmul %14, %12, %cst_15 {dimension_numbers = #tpu.dot_dimension_numbers<[1], [0], [0], [1], [0, 0, 1, 1], [], []>} : vector<8x8xf32>, vector<8x384xf32>, vector<8x384xf32> -> vector<8x384xf32>
    %16 = arith.addf %11, %15 : vector<8x384xf32>
    %17 = vector.extract_strided_slice %10 {offsets = [0, 129], sizes = [8, 384], strides = [1, 1]} : vector<8x640xf32> to vector<8x384xf32>
    %c1 = arith.constant 1 : index
    %c0_16 = arith.constant 0 : index
    %c0_17 = arith.constant 0 : index
    %18 = vector.load %arg4[%c1, %c0_16, %c0_17] : memref<16x8x8xf32, #tpu.memory_space<vmem>>, vector<1x8x8xf32>
    %19 = vector.shape_cast %18 : vector<1x8x8xf32> to vector<8x8xf32>
    %cst_18 = arith.constant dense<0.000000e+00> : vector<8x384xf32>
    %20 = tpu.matmul %19, %17, %cst_18 {dimension_numbers = #tpu.dot_dimension_numbers<[1], [0], [0], [1], [0, 0, 1, 1], [], []>} : vector<8x8xf32>, vector<8x384xf32>, vector<8x384xf32> -> vector<8x384xf32>
    %21 = arith.addf %16, %20 : vector<8x384xf32>
    %22 = vector.extract_strided_slice %10 {offsets = [0, 130], sizes = [8, 384], strides = [1, 1]} : vector<8x640xf32> to vector<8x384xf32>
    %c2 = arith.constant 2 : index
    %c0_19 = arith.constant 0 : index
    %c0_20 = arith.constant 0 : index
    %23 = vector.load %arg4[%c2, %c0_19, %c0_20] : memref<16x8x8xf32, #tpu.memory_space<vmem>>, vector<1x8x8xf32>
    %24 = vector.shape_cast %23 : vector<1x8x8xf32> to vector<8x8xf32>
    %cst_21 = arith.constant dense<0.000000e+00> : vector<8x384xf32>
    %25 = tpu.matmul %24, %22, %cst_21 {dimension_numbers = #tpu.dot_dimension_numbers<[1], [0], [0], [1], [0, 0, 1, 1], [], []>} : vector<8x8xf32>, vector<8x384xf32>, vector<8x384xf32> -> vector<8x384xf32>
    %26 = arith.addf %21, %25 : vector<8x384xf32>
    %27 = vector.extract_strided_slice %10 {offsets = [0, 131], sizes = [8, 384], strides = [1, 1]} : vector<8x640xf32> to vector<8x384xf32>
    %c3 = arith.constant 3 : index
    %c0_22 = arith.constant 0 : index
    %c0_23 = arith.constant 0 : index
    %28 = vector.load %arg4[%c3, %c0_22, %c0_23] : memref<16x8x8xf32, #tpu.memory_space<vmem>>, vector<1x8x8xf32>
    %29 = vector.shape_cast %28 : vector<1x8x8xf32> to vector<8x8xf32>
    %cst_24 = arith.constant dense<0.000000e+00> : vector<8x384xf32>
    %30 = tpu.matmul %29, %27, %cst_24 {dimension_numbers = #tpu.dot_dimension_numbers<[1], [0], [0], [1], [0, 0, 1, 1], [], []>} : vector<8x8xf32>, vector<8x384xf32>, vector<8x384xf32> -> vector<8x384xf32>
    %31 = arith.addf %26, %30 : vector<8x384xf32>
    %32 = vector.extract_strided_slice %10 {offsets = [0, 146], sizes = [8, 384], strides = [1, 1]} : vector<8x640xf32> to vector<8x384xf32>
    %c4 = arith.constant 4 : index
    %c0_25 = arith.constant 0 : index
    %c0_26 = arith.constant 0 : index
    %33 = vector.load %arg4[%c4, %c0_25, %c0_26] : memref<16x8x8xf32, #tpu.memory_space<vmem>>, vector<1x8x8xf32>
    %34 = vector.shape_cast %33 : vector<1x8x8xf32> to vector<8x8xf32>
    %cst_27 = arith.constant dense<0.000000e+00> : vector<8x384xf32>
    %35 = tpu.matmul %34, %32, %cst_27 {dimension_numbers = #tpu.dot_dimension_numbers<[1], [0], [0], [1], [0, 0, 1, 1], [], []>} : vector<8x8xf32>, vector<8x384xf32>, vector<8x384xf32> -> vector<8x384xf32>
    %36 = arith.addf %31, %35 : vector<8x384xf32>
    %37 = vector.extract_strided_slice %10 {offsets = [0, 147], sizes = [8, 384], strides = [1, 1]} : vector<8x640xf32> to vector<8x384xf32>
    %c5 = arith.constant 5 : index
    %c0_28 = arith.constant 0 : index
    %c0_29 = arith.constant 0 : index
    %38 = vector.load %arg4[%c5, %c0_28, %c0_29] : memref<16x8x8xf32, #tpu.memory_space<vmem>>, vector<1x8x8xf32>
    %39 = vector.shape_cast %38 : vector<1x8x8xf32> to vector<8x8xf32>
    %cst_30 = arith.constant dense<0.000000e+00> : vector<8x384xf32>
    %40 = tpu.matmul %39, %37, %cst_30 {dimension_numbers = #tpu.dot_dimension_numbers<[1], [0], [0], [1], [0, 0, 1, 1], [], []>} : vector<8x8xf32>, vector<8x384xf32>, vector<8x384xf32> -> vector<8x384xf32>
    %41 = arith.addf %36, %40 : vector<8x384xf32>
    %42 = vector.extract_strided_slice %10 {offsets = [0, 148], sizes = [8, 384], strides = [1, 1]} : vector<8x640xf32> to vector<8x384xf32>
    %c6 = arith.constant 6 : index
    %c0_31 = arith.constant 0 : index
    %c0_32 = arith.constant 0 : index
    %43 = vector.load %arg4[%c6, %c0_31, %c0_32] : memref<16x8x8xf32, #tpu.memory_space<vmem>>, vector<1x8x8xf32>
    %44 = vector.shape_cast %43 : vector<1x8x8xf32> to vector<8x8xf32>
    %cst_33 = arith.constant dense<0.000000e+00> : vector<8x384xf32>
    %45 = tpu.matmul %44, %42, %cst_33 {dimension_numbers = #tpu.dot_dimension_numbers<[1], [0], [0], [1], [0, 0, 1, 1], [], []>} : vector<8x8xf32>, vector<8x384xf32>, vector<8x384xf32> -> vector<8x384xf32>
    %46 = arith.addf %41, %45 : vector<8x384xf32>
    %47 = vector.extract_strided_slice %10 {offsets = [0, 149], sizes = [8, 384], strides = [1, 1]} : vector<8x640xf32> to vector<8x384xf32>
    %c7 = arith.constant 7 : index
    %c0_34 = arith.constant 0 : index
    %c0_35 = arith.constant 0 : index
    %48 = vector.load %arg4[%c7, %c0_34, %c0_35] : memref<16x8x8xf32, #tpu.memory_space<vmem>>, vector<1x8x8xf32>
    %49 = vector.shape_cast %48 : vector<1x8x8xf32> to vector<8x8xf32>
    %cst_36 = arith.constant dense<0.000000e+00> : vector<8x384xf32>
    %50 = tpu.matmul %49, %47, %cst_36 {dimension_numbers = #tpu.dot_dimension_numbers<[1], [0], [0], [1], [0, 0, 1, 1], [], []>} : vector<8x8xf32>, vector<8x384xf32>, vector<8x384xf32> -> vector<8x384xf32>
    %51 = arith.addf %46, %50 : vector<8x384xf32>
    %52 = vector.extract_strided_slice %10 {offsets = [0, 164], sizes = [8, 384], strides = [1, 1]} : vector<8x640xf32> to vector<8x384xf32>
    %c8 = arith.constant 8 : index
    %c0_37 = arith.constant 0 : index
    %c0_38 = arith.constant 0 : index
    %53 = vector.load %arg4[%c8, %c0_37, %c0_38] : memref<16x8x8xf32, #tpu.memory_space<vmem>>, vector<1x8x8xf32>
    %54 = vector.shape_cast %53 : vector<1x8x8xf32> to vector<8x8xf32>
    %cst_39 = arith.constant dense<0.000000e+00> : vector<8x384xf32>
    %55 = tpu.matmul %54, %52, %cst_39 {dimension_numbers = #tpu.dot_dimension_numbers<[1], [0], [0], [1], [0, 0, 1, 1], [], []>} : vector<8x8xf32>, vector<8x384xf32>, vector<8x384xf32> -> vector<8x384xf32>
    %56 = arith.addf %51, %55 : vector<8x384xf32>
    %57 = vector.extract_strided_slice %10 {offsets = [0, 165], sizes = [8, 384], strides = [1, 1]} : vector<8x640xf32> to vector<8x384xf32>
    %c9 = arith.constant 9 : index
    %c0_40 = arith.constant 0 : index
    %c0_41 = arith.constant 0 : index
    %58 = vector.load %arg4[%c9, %c0_40, %c0_41] : memref<16x8x8xf32, #tpu.memory_space<vmem>>, vector<1x8x8xf32>
    %59 = vector.shape_cast %58 : vector<1x8x8xf32> to vector<8x8xf32>
    %cst_42 = arith.constant dense<0.000000e+00> : vector<8x384xf32>
    %60 = tpu.matmul %59, %57, %cst_42 {dimension_numbers = #tpu.dot_dimension_numbers<[1], [0], [0], [1], [0, 0, 1, 1], [], []>} : vector<8x8xf32>, vector<8x384xf32>, vector<8x384xf32> -> vector<8x384xf32>
    %61 = arith.addf %56, %60 : vector<8x384xf32>
    %62 = vector.extract_strided_slice %10 {offsets = [0, 166], sizes = [8, 384], strides = [1, 1]} : vector<8x640xf32> to vector<8x384xf32>
    %c10 = arith.constant 10 : index
    %c0_43 = arith.constant 0 : index
    %c0_44 = arith.constant 0 : index
    %63 = vector.load %arg4[%c10, %c0_43, %c0_44] : memref<16x8x8xf32, #tpu.memory_space<vmem>>, vector<1x8x8xf32>
    %64 = vector.shape_cast %63 : vector<1x8x8xf32> to vector<8x8xf32>
    %cst_45 = arith.constant dense<0.000000e+00> : vector<8x384xf32>
    %65 = tpu.matmul %64, %62, %cst_45 {dimension_numbers = #tpu.dot_dimension_numbers<[1], [0], [0], [1], [0, 0, 1, 1], [], []>} : vector<8x8xf32>, vector<8x384xf32>, vector<8x384xf32> -> vector<8x384xf32>
    %66 = arith.addf %61, %65 : vector<8x384xf32>
    %67 = vector.extract_strided_slice %10 {offsets = [0, 167], sizes = [8, 384], strides = [1, 1]} : vector<8x640xf32> to vector<8x384xf32>
    %c11 = arith.constant 11 : index
    %c0_46 = arith.constant 0 : index
    %c0_47 = arith.constant 0 : index
    %68 = vector.load %arg4[%c11, %c0_46, %c0_47] : memref<16x8x8xf32, #tpu.memory_space<vmem>>, vector<1x8x8xf32>
    %69 = vector.shape_cast %68 : vector<1x8x8xf32> to vector<8x8xf32>
    %cst_48 = arith.constant dense<0.000000e+00> : vector<8x384xf32>
    %70 = tpu.matmul %69, %67, %cst_48 {dimension_numbers = #tpu.dot_dimension_numbers<[1], [0], [0], [1], [0, 0, 1, 1], [], []>} : vector<8x8xf32>, vector<8x384xf32>, vector<8x384xf32> -> vector<8x384xf32>
    %71 = arith.addf %66, %70 : vector<8x384xf32>
    %72 = vector.extract_strided_slice %10 {offsets = [0, 182], sizes = [8, 384], strides = [1, 1]} : vector<8x640xf32> to vector<8x384xf32>
    %c12 = arith.constant 12 : index
    %c0_49 = arith.constant 0 : index
    %c0_50 = arith.constant 0 : index
    %73 = vector.load %arg4[%c12, %c0_49, %c0_50] : memref<16x8x8xf32, #tpu.memory_space<vmem>>, vector<1x8x8xf32>
    %74 = vector.shape_cast %73 : vector<1x8x8xf32> to vector<8x8xf32>
    %cst_51 = arith.constant dense<0.000000e+00> : vector<8x384xf32>
    %75 = tpu.matmul %74, %72, %cst_51 {dimension_numbers = #tpu.dot_dimension_numbers<[1], [0], [0], [1], [0, 0, 1, 1], [], []>} : vector<8x8xf32>, vector<8x384xf32>, vector<8x384xf32> -> vector<8x384xf32>
    %76 = arith.addf %71, %75 : vector<8x384xf32>
    %77 = vector.extract_strided_slice %10 {offsets = [0, 183], sizes = [8, 384], strides = [1, 1]} : vector<8x640xf32> to vector<8x384xf32>
    %c13 = arith.constant 13 : index
    %c0_52 = arith.constant 0 : index
    %c0_53 = arith.constant 0 : index
    %78 = vector.load %arg4[%c13, %c0_52, %c0_53] : memref<16x8x8xf32, #tpu.memory_space<vmem>>, vector<1x8x8xf32>
    %79 = vector.shape_cast %78 : vector<1x8x8xf32> to vector<8x8xf32>
    %cst_54 = arith.constant dense<0.000000e+00> : vector<8x384xf32>
    %80 = tpu.matmul %79, %77, %cst_54 {dimension_numbers = #tpu.dot_dimension_numbers<[1], [0], [0], [1], [0, 0, 1, 1], [], []>} : vector<8x8xf32>, vector<8x384xf32>, vector<8x384xf32> -> vector<8x384xf32>
    %81 = arith.addf %76, %80 : vector<8x384xf32>
    %82 = vector.extract_strided_slice %10 {offsets = [0, 184], sizes = [8, 384], strides = [1, 1]} : vector<8x640xf32> to vector<8x384xf32>
    %c14 = arith.constant 14 : index
    %c0_55 = arith.constant 0 : index
    %c0_56 = arith.constant 0 : index
    %83 = vector.load %arg4[%c14, %c0_55, %c0_56] : memref<16x8x8xf32, #tpu.memory_space<vmem>>, vector<1x8x8xf32>
    %84 = vector.shape_cast %83 : vector<1x8x8xf32> to vector<8x8xf32>
    %cst_57 = arith.constant dense<0.000000e+00> : vector<8x384xf32>
    %85 = tpu.matmul %84, %82, %cst_57 {dimension_numbers = #tpu.dot_dimension_numbers<[1], [0], [0], [1], [0, 0, 1, 1], [], []>} : vector<8x8xf32>, vector<8x384xf32>, vector<8x384xf32> -> vector<8x384xf32>
    %86 = arith.addf %81, %85 : vector<8x384xf32>
    %87 = vector.extract_strided_slice %10 {offsets = [0, 185], sizes = [8, 384], strides = [1, 1]} : vector<8x640xf32> to vector<8x384xf32>
    %c15 = arith.constant 15 : index
    %c0_58 = arith.constant 0 : index
    %c0_59 = arith.constant 0 : index
    %88 = vector.load %arg4[%c15, %c0_58, %c0_59] : memref<16x8x8xf32, #tpu.memory_space<vmem>>, vector<1x8x8xf32>
    %89 = vector.shape_cast %88 : vector<1x8x8xf32> to vector<8x8xf32>
    %cst_60 = arith.constant dense<0.000000e+00> : vector<8x384xf32>
    %90 = tpu.matmul %89, %87, %cst_60 {dimension_numbers = #tpu.dot_dimension_numbers<[1], [0], [0], [1], [0, 0, 1, 1], [], []>} : vector<8x8xf32>, vector<8x384xf32>, vector<8x384xf32> -> vector<8x384xf32>
    %91 = arith.addf %86, %90 : vector<8x384xf32>
    %92 = vector.broadcast %8 : vector<8x1xf32> to vector<8x384xf32>
    %93 = arith.addf %91, %92 : vector<8x384xf32>
    %cst_61 = arith.constant 0.000000e+00 : f32
    %94 = vector.broadcast %cst_61 : f32 to vector<8x384xf32>
    %95 = arith.select %2, %93, %94 : vector<8x384xi1>, vector<8x384xf32>
    %c1_62 = arith.constant 1 : index
    %c0_63 = arith.constant 0 : index
    %c0_64 = arith.constant 0 : index
    %96 = vector.load %arg9[%c1_62, %c0_63, %c0_64] : memref<5x8x1xf32, #tpu.memory_space<vmem>>, vector<1x8x1xf32>
    %97 = vector.shape_cast %96 : vector<1x8x1xf32> to vector<8x1xf32>
    %cst_65 = arith.constant 0.000000e+00 : f32
    %98 = vector.broadcast %cst_65 : f32 to vector<8x128xf32>
    %99 = tpu.concatenate %98, %95, %98 in 1 : vector<8x128xf32>, vector<8x384xf32>, vector<8x128xf32> -> vector<8x640xf32>
    %cst_66 = arith.constant 0.000000e+00 : f32
    %100 = vector.broadcast %cst_66 : f32 to vector<8x384xf32>
    %101 = vector.extract_strided_slice %99 {offsets = [0, 109], sizes = [8, 384], strides = [1, 1]} : vector<8x640xf32> to vector<8x384xf32>
    %c0_67 = arith.constant 0 : index
    %c0_68 = arith.constant 0 : index
    %c0_69 = arith.constant 0 : index
    %102 = vector.load %arg5[%c0_67, %c0_68, %c0_69] : memref<9x8x8xf32, #tpu.memory_space<vmem>>, vector<1x8x8xf32>
    %103 = vector.shape_cast %102 : vector<1x8x8xf32> to vector<8x8xf32>
    %cst_70 = arith.constant dense<0.000000e+00> : vector<8x384xf32>
    %104 = tpu.matmul %103, %101, %cst_70 {dimension_numbers = #tpu.dot_dimension_numbers<[1], [0], [0], [1], [0, 0, 1, 1], [], []>} : vector<8x8xf32>, vector<8x384xf32>, vector<8x384xf32> -> vector<8x384xf32>
    %105 = arith.addf %100, %104 : vector<8x384xf32>
    %106 = vector.extract_strided_slice %99 {offsets = [0, 110], sizes = [8, 384], strides = [1, 1]} : vector<8x640xf32> to vector<8x384xf32>
    %c1_71 = arith.constant 1 : index
    %c0_72 = arith.constant 0 : index
    %c0_73 = arith.constant 0 : index
    %107 = vector.load %arg5[%c1_71, %c0_72, %c0_73] : memref<9x8x8xf32, #tpu.memory_space<vmem>>, vector<1x8x8xf32>
    %108 = vector.shape_cast %107 : vector<1x8x8xf32> to vector<8x8xf32>
    %cst_74 = arith.constant dense<0.000000e+00> : vector<8x384xf32>
    %109 = tpu.matmul %108, %106, %cst_74 {dimension_numbers = #tpu.dot_dimension_numbers<[1], [0], [0], [1], [0, 0, 1, 1], [], []>} : vector<8x8xf32>, vector<8x384xf32>, vector<8x384xf32> -> vector<8x384xf32>
    %110 = arith.addf %105, %109 : vector<8x384xf32>
    %111 = vector.extract_strided_slice %99 {offsets = [0, 111], sizes = [8, 384], strides = [1, 1]} : vector<8x640xf32> to vector<8x384xf32>
    %c2_75 = arith.constant 2 : index
    %c0_76 = arith.constant 0 : index
    %c0_77 = arith.constant 0 : index
    %112 = vector.load %arg5[%c2_75, %c0_76, %c0_77] : memref<9x8x8xf32, #tpu.memory_space<vmem>>, vector<1x8x8xf32>
    %113 = vector.shape_cast %112 : vector<1x8x8xf32> to vector<8x8xf32>
    %cst_78 = arith.constant dense<0.000000e+00> : vector<8x384xf32>
    %114 = tpu.matmul %113, %111, %cst_78 {dimension_numbers = #tpu.dot_dimension_numbers<[1], [0], [0], [1], [0, 0, 1, 1], [], []>} : vector<8x8xf32>, vector<8x384xf32>, vector<8x384xf32> -> vector<8x384xf32>
    %115 = arith.addf %110, %114 : vector<8x384xf32>
    %116 = vector.extract_strided_slice %99 {offsets = [0, 127], sizes = [8, 384], strides = [1, 1]} : vector<8x640xf32> to vector<8x384xf32>
    %c3_79 = arith.constant 3 : index
    %c0_80 = arith.constant 0 : index
    %c0_81 = arith.constant 0 : index
    %117 = vector.load %arg5[%c3_79, %c0_80, %c0_81] : memref<9x8x8xf32, #tpu.memory_space<vmem>>, vector<1x8x8xf32>
    %118 = vector.shape_cast %117 : vector<1x8x8xf32> to vector<8x8xf32>
    %cst_82 = arith.constant dense<0.000000e+00> : vector<8x384xf32>
    %119 = tpu.matmul %118, %116, %cst_82 {dimension_numbers = #tpu.dot_dimension_numbers<[1], [0], [0], [1], [0, 0, 1, 1], [], []>} : vector<8x8xf32>, vector<8x384xf32>, vector<8x384xf32> -> vector<8x384xf32>
    %120 = arith.addf %115, %119 : vector<8x384xf32>
    %121 = vector.extract_strided_slice %99 {offsets = [0, 128], sizes = [8, 384], strides = [1, 1]} : vector<8x640xf32> to vector<8x384xf32>
    %c4_83 = arith.constant 4 : index
    %c0_84 = arith.constant 0 : index
    %c0_85 = arith.constant 0 : index
    %122 = vector.load %arg5[%c4_83, %c0_84, %c0_85] : memref<9x8x8xf32, #tpu.memory_space<vmem>>, vector<1x8x8xf32>
    %123 = vector.shape_cast %122 : vector<1x8x8xf32> to vector<8x8xf32>
    %cst_86 = arith.constant dense<0.000000e+00> : vector<8x384xf32>
    %124 = tpu.matmul %123, %121, %cst_86 {dimension_numbers = #tpu.dot_dimension_numbers<[1], [0], [0], [1], [0, 0, 1, 1], [], []>} : vector<8x8xf32>, vector<8x384xf32>, vector<8x384xf32> -> vector<8x384xf32>
    %125 = arith.addf %120, %124 : vector<8x384xf32>
    %126 = vector.extract_strided_slice %99 {offsets = [0, 129], sizes = [8, 384], strides = [1, 1]} : vector<8x640xf32> to vector<8x384xf32>
    %c5_87 = arith.constant 5 : index
    %c0_88 = arith.constant 0 : index
    %c0_89 = arith.constant 0 : index
    %127 = vector.load %arg5[%c5_87, %c0_88, %c0_89] : memref<9x8x8xf32, #tpu.memory_space<vmem>>, vector<1x8x8xf32>
    %128 = vector.shape_cast %127 : vector<1x8x8xf32> to vector<8x8xf32>
    %cst_90 = arith.constant dense<0.000000e+00> : vector<8x384xf32>
    %129 = tpu.matmul %128, %126, %cst_90 {dimension_numbers = #tpu.dot_dimension_numbers<[1], [0], [0], [1], [0, 0, 1, 1], [], []>} : vector<8x8xf32>, vector<8x384xf32>, vector<8x384xf32> -> vector<8x384xf32>
    %130 = arith.addf %125, %129 : vector<8x384xf32>
    %131 = vector.extract_strided_slice %99 {offsets = [0, 145], sizes = [8, 384], strides = [1, 1]} : vector<8x640xf32> to vector<8x384xf32>
    %c6_91 = arith.constant 6 : index
    %c0_92 = arith.constant 0 : index
    %c0_93 = arith.constant 0 : index
    %132 = vector.load %arg5[%c6_91, %c0_92, %c0_93] : memref<9x8x8xf32, #tpu.memory_space<vmem>>, vector<1x8x8xf32>
    %133 = vector.shape_cast %132 : vector<1x8x8xf32> to vector<8x8xf32>
    %cst_94 = arith.constant dense<0.000000e+00> : vector<8x384xf32>
    %134 = tpu.matmul %133, %131, %cst_94 {dimension_numbers = #tpu.dot_dimension_numbers<[1], [0], [0], [1], [0, 0, 1, 1], [], []>} : vector<8x8xf32>, vector<8x384xf32>, vector<8x384xf32> -> vector<8x384xf32>
    %135 = arith.addf %130, %134 : vector<8x384xf32>
    %136 = vector.extract_strided_slice %99 {offsets = [0, 146], sizes = [8, 384], strides = [1, 1]} : vector<8x640xf32> to vector<8x384xf32>
    %c7_95 = arith.constant 7 : index
    %c0_96 = arith.constant 0 : index
    %c0_97 = arith.constant 0 : index
    %137 = vector.load %arg5[%c7_95, %c0_96, %c0_97] : memref<9x8x8xf32, #tpu.memory_space<vmem>>, vector<1x8x8xf32>
    %138 = vector.shape_cast %137 : vector<1x8x8xf32> to vector<8x8xf32>
    %cst_98 = arith.constant dense<0.000000e+00> : vector<8x384xf32>
    %139 = tpu.matmul %138, %136, %cst_98 {dimension_numbers = #tpu.dot_dimension_numbers<[1], [0], [0], [1], [0, 0, 1, 1], [], []>} : vector<8x8xf32>, vector<8x384xf32>, vector<8x384xf32> -> vector<8x384xf32>
    %140 = arith.addf %135, %139 : vector<8x384xf32>
    %141 = vector.extract_strided_slice %99 {offsets = [0, 147], sizes = [8, 384], strides = [1, 1]} : vector<8x640xf32> to vector<8x384xf32>
    %c8_99 = arith.constant 8 : index
    %c0_100 = arith.constant 0 : index
    %c0_101 = arith.constant 0 : index
    %142 = vector.load %arg5[%c8_99, %c0_100, %c0_101] : memref<9x8x8xf32, #tpu.memory_space<vmem>>, vector<1x8x8xf32>
    %143 = vector.shape_cast %142 : vector<1x8x8xf32> to vector<8x8xf32>
    %cst_102 = arith.constant dense<0.000000e+00> : vector<8x384xf32>
    %144 = tpu.matmul %143, %141, %cst_102 {dimension_numbers = #tpu.dot_dimension_numbers<[1], [0], [0], [1], [0, 0, 1, 1], [], []>} : vector<8x8xf32>, vector<8x384xf32>, vector<8x384xf32> -> vector<8x384xf32>
    %145 = arith.addf %140, %144 : vector<8x384xf32>
    %146 = vector.broadcast %97 : vector<8x1xf32> to vector<8x384xf32>
    %147 = arith.addf %145, %146 : vector<8x384xf32>
    %cst_103 = arith.constant 0.000000e+00 : f32
    %148 = vector.broadcast %cst_103 : f32 to vector<8x384xf32>
    %149 = arith.cmpf oge, %147, %148 : vector<8x384xf32>
    %cst_104 = arith.constant 2.000000e-01 : f32
    %150 = vector.broadcast %cst_104 : f32 to vector<8x384xf32>
    %151 = arith.mulf %150, %147 : vector<8x384xf32>
    %152 = arith.select %149, %147, %151 : vector<8x384xi1>, vector<8x384xf32>
    %cst_105 = arith.constant 0.000000e+00 : f32
    %153 = vector.broadcast %cst_105 : f32 to vector<8x384xf32>
    %154 = arith.select %2, %152, %153 : vector<8x384xi1>, vector<8x384xf32>
    %c2_106 = arith.constant 2 : index
    %c0_107 = arith.constant 0 : index
    %c0_108 = arith.constant 0 : index
    %155 = vector.load %arg9[%c2_106, %c0_107, %c0_108] : memref<5x8x1xf32, #tpu.memory_space<vmem>>, vector<1x8x1xf32>
    %156 = vector.shape_cast %155 : vector<1x8x1xf32> to vector<8x1xf32>
    %cst_109 = arith.constant 0.000000e+00 : f32
    %157 = vector.broadcast %cst_109 : f32 to vector<8x128xf32>
    %158 = tpu.concatenate %157, %154, %157 in 1 : vector<8x128xf32>, vector<8x384xf32>, vector<8x128xf32> -> vector<8x640xf32>
    %cst_110 = arith.constant 0.000000e+00 : f32
    %159 = vector.broadcast %cst_110 : f32 to vector<8x384xf32>
    %160 = vector.extract_strided_slice %158 {offsets = [0, 109], sizes = [8, 384], strides = [1, 1]} : vector<8x640xf32> to vector<8x384xf32>
    %c0_111 = arith.constant 0 : index
    %c0_112 = arith.constant 0 : index
    %c0_113 = arith.constant 0 : index
    %161 = vector.load %arg6[%c0_111, %c0_112, %c0_113] : memref<9x8x8xf32, #tpu.memory_space<vmem>>, vector<1x8x8xf32>
    %162 = vector.shape_cast %161 : vector<1x8x8xf32> to vector<8x8xf32>
    %cst_114 = arith.constant dense<0.000000e+00> : vector<8x384xf32>
    %163 = tpu.matmul %162, %160, %cst_114 {dimension_numbers = #tpu.dot_dimension_numbers<[1], [0], [0], [1], [0, 0, 1, 1], [], []>} : vector<8x8xf32>, vector<8x384xf32>, vector<8x384xf32> -> vector<8x384xf32>
    %164 = arith.addf %159, %163 : vector<8x384xf32>
    %165 = vector.extract_strided_slice %158 {offsets = [0, 110], sizes = [8, 384], strides = [1, 1]} : vector<8x640xf32> to vector<8x384xf32>
    %c1_115 = arith.constant 1 : index
    %c0_116 = arith.constant 0 : index
    %c0_117 = arith.constant 0 : index
    %166 = vector.load %arg6[%c1_115, %c0_116, %c0_117] : memref<9x8x8xf32, #tpu.memory_space<vmem>>, vector<1x8x8xf32>
    %167 = vector.shape_cast %166 : vector<1x8x8xf32> to vector<8x8xf32>
    %cst_118 = arith.constant dense<0.000000e+00> : vector<8x384xf32>
    %168 = tpu.matmul %167, %165, %cst_118 {dimension_numbers = #tpu.dot_dimension_numbers<[1], [0], [0], [1], [0, 0, 1, 1], [], []>} : vector<8x8xf32>, vector<8x384xf32>, vector<8x384xf32> -> vector<8x384xf32>
    %169 = arith.addf %164, %168 : vector<8x384xf32>
    %170 = vector.extract_strided_slice %158 {offsets = [0, 111], sizes = [8, 384], strides = [1, 1]} : vector<8x640xf32> to vector<8x384xf32>
    %c2_119 = arith.constant 2 : index
    %c0_120 = arith.constant 0 : index
    %c0_121 = arith.constant 0 : index
    %171 = vector.load %arg6[%c2_119, %c0_120, %c0_121] : memref<9x8x8xf32, #tpu.memory_space<vmem>>, vector<1x8x8xf32>
    %172 = vector.shape_cast %171 : vector<1x8x8xf32> to vector<8x8xf32>
    %cst_122 = arith.constant dense<0.000000e+00> : vector<8x384xf32>
    %173 = tpu.matmul %172, %170, %cst_122 {dimension_numbers = #tpu.dot_dimension_numbers<[1], [0], [0], [1], [0, 0, 1, 1], [], []>} : vector<8x8xf32>, vector<8x384xf32>, vector<8x384xf32> -> vector<8x384xf32>
    %174 = arith.addf %169, %173 : vector<8x384xf32>
    %175 = vector.extract_strided_slice %158 {offsets = [0, 127], sizes = [8, 384], strides = [1, 1]} : vector<8x640xf32> to vector<8x384xf32>
    %c3_123 = arith.constant 3 : index
    %c0_124 = arith.constant 0 : index
    %c0_125 = arith.constant 0 : index
    %176 = vector.load %arg6[%c3_123, %c0_124, %c0_125] : memref<9x8x8xf32, #tpu.memory_space<vmem>>, vector<1x8x8xf32>
    %177 = vector.shape_cast %176 : vector<1x8x8xf32> to vector<8x8xf32>
    %cst_126 = arith.constant dense<0.000000e+00> : vector<8x384xf32>
    %178 = tpu.matmul %177, %175, %cst_126 {dimension_numbers = #tpu.dot_dimension_numbers<[1], [0], [0], [1], [0, 0, 1, 1], [], []>} : vector<8x8xf32>, vector<8x384xf32>, vector<8x384xf32> -> vector<8x384xf32>
    %179 = arith.addf %174, %178 : vector<8x384xf32>
    %180 = vector.extract_strided_slice %158 {offsets = [0, 128], sizes = [8, 384], strides = [1, 1]} : vector<8x640xf32> to vector<8x384xf32>
    %c4_127 = arith.constant 4 : index
    %c0_128 = arith.constant 0 : index
    %c0_129 = arith.constant 0 : index
    %181 = vector.load %arg6[%c4_127, %c0_128, %c0_129] : memref<9x8x8xf32, #tpu.memory_space<vmem>>, vector<1x8x8xf32>
    %182 = vector.shape_cast %181 : vector<1x8x8xf32> to vector<8x8xf32>
    %cst_130 = arith.constant dense<0.000000e+00> : vector<8x384xf32>
    %183 = tpu.matmul %182, %180, %cst_130 {dimension_numbers = #tpu.dot_dimension_numbers<[1], [0], [0], [1], [0, 0, 1, 1], [], []>} : vector<8x8xf32>, vector<8x384xf32>, vector<8x384xf32> -> vector<8x384xf32>
    %184 = arith.addf %179, %183 : vector<8x384xf32>
    %185 = vector.extract_strided_slice %158 {offsets = [0, 129], sizes = [8, 384], strides = [1, 1]} : vector<8x640xf32> to vector<8x384xf32>
    %c5_131 = arith.constant 5 : index
    %c0_132 = arith.constant 0 : index
    %c0_133 = arith.constant 0 : index
    %186 = vector.load %arg6[%c5_131, %c0_132, %c0_133] : memref<9x8x8xf32, #tpu.memory_space<vmem>>, vector<1x8x8xf32>
    %187 = vector.shape_cast %186 : vector<1x8x8xf32> to vector<8x8xf32>
    %cst_134 = arith.constant dense<0.000000e+00> : vector<8x384xf32>
    %188 = tpu.matmul %187, %185, %cst_134 {dimension_numbers = #tpu.dot_dimension_numbers<[1], [0], [0], [1], [0, 0, 1, 1], [], []>} : vector<8x8xf32>, vector<8x384xf32>, vector<8x384xf32> -> vector<8x384xf32>
    %189 = arith.addf %184, %188 : vector<8x384xf32>
    %190 = vector.extract_strided_slice %158 {offsets = [0, 145], sizes = [8, 384], strides = [1, 1]} : vector<8x640xf32> to vector<8x384xf32>
    %c6_135 = arith.constant 6 : index
    %c0_136 = arith.constant 0 : index
    %c0_137 = arith.constant 0 : index
    %191 = vector.load %arg6[%c6_135, %c0_136, %c0_137] : memref<9x8x8xf32, #tpu.memory_space<vmem>>, vector<1x8x8xf32>
    %192 = vector.shape_cast %191 : vector<1x8x8xf32> to vector<8x8xf32>
    %cst_138 = arith.constant dense<0.000000e+00> : vector<8x384xf32>
    %193 = tpu.matmul %192, %190, %cst_138 {dimension_numbers = #tpu.dot_dimension_numbers<[1], [0], [0], [1], [0, 0, 1, 1], [], []>} : vector<8x8xf32>, vector<8x384xf32>, vector<8x384xf32> -> vector<8x384xf32>
    %194 = arith.addf %189, %193 : vector<8x384xf32>
    %195 = vector.extract_strided_slice %158 {offsets = [0, 146], sizes = [8, 384], strides = [1, 1]} : vector<8x640xf32> to vector<8x384xf32>
    %c7_139 = arith.constant 7 : index
    %c0_140 = arith.constant 0 : index
    %c0_141 = arith.constant 0 : index
    %196 = vector.load %arg6[%c7_139, %c0_140, %c0_141] : memref<9x8x8xf32, #tpu.memory_space<vmem>>, vector<1x8x8xf32>
    %197 = vector.shape_cast %196 : vector<1x8x8xf32> to vector<8x8xf32>
    %cst_142 = arith.constant dense<0.000000e+00> : vector<8x384xf32>
    %198 = tpu.matmul %197, %195, %cst_142 {dimension_numbers = #tpu.dot_dimension_numbers<[1], [0], [0], [1], [0, 0, 1, 1], [], []>} : vector<8x8xf32>, vector<8x384xf32>, vector<8x384xf32> -> vector<8x384xf32>
    %199 = arith.addf %194, %198 : vector<8x384xf32>
    %200 = vector.extract_strided_slice %158 {offsets = [0, 147], sizes = [8, 384], strides = [1, 1]} : vector<8x640xf32> to vector<8x384xf32>
    %c8_143 = arith.constant 8 : index
    %c0_144 = arith.constant 0 : index
    %c0_145 = arith.constant 0 : index
    %201 = vector.load %arg6[%c8_143, %c0_144, %c0_145] : memref<9x8x8xf32, #tpu.memory_space<vmem>>, vector<1x8x8xf32>
    %202 = vector.shape_cast %201 : vector<1x8x8xf32> to vector<8x8xf32>
    %cst_146 = arith.constant dense<0.000000e+00> : vector<8x384xf32>
    %203 = tpu.matmul %202, %200, %cst_146 {dimension_numbers = #tpu.dot_dimension_numbers<[1], [0], [0], [1], [0, 0, 1, 1], [], []>} : vector<8x8xf32>, vector<8x384xf32>, vector<8x384xf32> -> vector<8x384xf32>
    %204 = arith.addf %199, %203 : vector<8x384xf32>
    %205 = vector.broadcast %156 : vector<8x1xf32> to vector<8x384xf32>
    %206 = arith.addf %204, %205 : vector<8x384xf32>
    %cst_147 = arith.constant 0.000000e+00 : f32
    %207 = vector.broadcast %cst_147 : f32 to vector<8x384xf32>
    %208 = arith.cmpf oge, %206, %207 : vector<8x384xf32>
    %cst_148 = arith.constant 2.000000e-01 : f32
    %209 = vector.broadcast %cst_148 : f32 to vector<8x384xf32>
    %210 = arith.mulf %209, %206 : vector<8x384xf32>
    %211 = arith.select %208, %206, %210 : vector<8x384xi1>, vector<8x384xf32>
    %cst_149 = arith.constant 0.000000e+00 : f32
    %212 = vector.broadcast %cst_149 : f32 to vector<8x384xf32>
    %213 = arith.select %2, %211, %212 : vector<8x384xi1>, vector<8x384xf32>
    %c0_150 = arith.constant 0 : index
    %c0_151 = arith.constant 0 : index
    %c0_152 = arith.constant 0 : index
    %214 = vector.load %arg2[%c0_150, %c0_151, %c0_152] : memref<1x8x384xf32, #tpu.memory_space<vmem>>, vector<1x8x384xf32>
    %215 = vector.shape_cast %214 : vector<1x8x384xf32> to vector<8x384xf32>
    %216 = tpu.concatenate %213, %215 in 0 : vector<8x384xf32>, vector<8x384xf32> -> vector<16x384xf32>
    %c3_153 = arith.constant 3 : index
    %c0_154 = arith.constant 0 : index
    %c0_155 = arith.constant 0 : index
    %217 = vector.load %arg9[%c3_153, %c0_154, %c0_155] : memref<5x8x1xf32, #tpu.memory_space<vmem>>, vector<1x8x1xf32>
    %218 = vector.shape_cast %217 : vector<1x8x1xf32> to vector<8x1xf32>
    %cst_156 = arith.constant 0.000000e+00 : f32
    %219 = vector.broadcast %cst_156 : f32 to vector<16x128xf32>
    %220 = tpu.concatenate %219, %216, %219 in 1 : vector<16x128xf32>, vector<16x384xf32>, vector<16x128xf32> -> vector<16x640xf32>
    %cst_157 = arith.constant 0.000000e+00 : f32
    %221 = vector.broadcast %cst_157 : f32 to vector<8x384xf32>
    %222 = vector.extract_strided_slice %220 {offsets = [0, 109], sizes = [16, 384], strides = [1, 1]} : vector<16x640xf32> to vector<16x384xf32>
    %c0_158 = arith.constant 0 : index
    %c0_159 = arith.constant 0 : index
    %c0_160 = arith.constant 0 : index
    %223 = vector.load %arg7[%c0_158, %c0_159, %c0_160] : memref<9x8x16xf32, #tpu.memory_space<vmem>>, vector<1x8x16xf32>
    %224 = vector.shape_cast %223 : vector<1x8x16xf32> to vector<8x16xf32>
    %cst_161 = arith.constant dense<0.000000e+00> : vector<8x384xf32>
    %225 = tpu.matmul %224, %222, %cst_161 {dimension_numbers = #tpu.dot_dimension_numbers<[1], [0], [0], [1], [0, 0, 1, 1], [], []>} : vector<8x16xf32>, vector<16x384xf32>, vector<8x384xf32> -> vector<8x384xf32>
    %226 = arith.addf %221, %225 : vector<8x384xf32>
    %227 = vector.extract_strided_slice %220 {offsets = [0, 110], sizes = [16, 384], strides = [1, 1]} : vector<16x640xf32> to vector<16x384xf32>
    %c1_162 = arith.constant 1 : index
    %c0_163 = arith.constant 0 : index
    %c0_164 = arith.constant 0 : index
    %228 = vector.load %arg7[%c1_162, %c0_163, %c0_164] : memref<9x8x16xf32, #tpu.memory_space<vmem>>, vector<1x8x16xf32>
    %229 = vector.shape_cast %228 : vector<1x8x16xf32> to vector<8x16xf32>
    %cst_165 = arith.constant dense<0.000000e+00> : vector<8x384xf32>
    %230 = tpu.matmul %229, %227, %cst_165 {dimension_numbers = #tpu.dot_dimension_numbers<[1], [0], [0], [1], [0, 0, 1, 1], [], []>} : vector<8x16xf32>, vector<16x384xf32>, vector<8x384xf32> -> vector<8x384xf32>
    %231 = arith.addf %226, %230 : vector<8x384xf32>
    %232 = vector.extract_strided_slice %220 {offsets = [0, 111], sizes = [16, 384], strides = [1, 1]} : vector<16x640xf32> to vector<16x384xf32>
    %c2_166 = arith.constant 2 : index
    %c0_167 = arith.constant 0 : index
    %c0_168 = arith.constant 0 : index
    %233 = vector.load %arg7[%c2_166, %c0_167, %c0_168] : memref<9x8x16xf32, #tpu.memory_space<vmem>>, vector<1x8x16xf32>
    %234 = vector.shape_cast %233 : vector<1x8x16xf32> to vector<8x16xf32>
    %cst_169 = arith.constant dense<0.000000e+00> : vector<8x384xf32>
    %235 = tpu.matmul %234, %232, %cst_169 {dimension_numbers = #tpu.dot_dimension_numbers<[1], [0], [0], [1], [0, 0, 1, 1], [], []>} : vector<8x16xf32>, vector<16x384xf32>, vector<8x384xf32> -> vector<8x384xf32>
    %236 = arith.addf %231, %235 : vector<8x384xf32>
    %237 = vector.extract_strided_slice %220 {offsets = [0, 127], sizes = [16, 384], strides = [1, 1]} : vector<16x640xf32> to vector<16x384xf32>
    %c3_170 = arith.constant 3 : index
    %c0_171 = arith.constant 0 : index
    %c0_172 = arith.constant 0 : index
    %238 = vector.load %arg7[%c3_170, %c0_171, %c0_172] : memref<9x8x16xf32, #tpu.memory_space<vmem>>, vector<1x8x16xf32>
    %239 = vector.shape_cast %238 : vector<1x8x16xf32> to vector<8x16xf32>
    %cst_173 = arith.constant dense<0.000000e+00> : vector<8x384xf32>
    %240 = tpu.matmul %239, %237, %cst_173 {dimension_numbers = #tpu.dot_dimension_numbers<[1], [0], [0], [1], [0, 0, 1, 1], [], []>} : vector<8x16xf32>, vector<16x384xf32>, vector<8x384xf32> -> vector<8x384xf32>
    %241 = arith.addf %236, %240 : vector<8x384xf32>
    %242 = vector.extract_strided_slice %220 {offsets = [0, 128], sizes = [16, 384], strides = [1, 1]} : vector<16x640xf32> to vector<16x384xf32>
    %c4_174 = arith.constant 4 : index
    %c0_175 = arith.constant 0 : index
    %c0_176 = arith.constant 0 : index
    %243 = vector.load %arg7[%c4_174, %c0_175, %c0_176] : memref<9x8x16xf32, #tpu.memory_space<vmem>>, vector<1x8x16xf32>
    %244 = vector.shape_cast %243 : vector<1x8x16xf32> to vector<8x16xf32>
    %cst_177 = arith.constant dense<0.000000e+00> : vector<8x384xf32>
    %245 = tpu.matmul %244, %242, %cst_177 {dimension_numbers = #tpu.dot_dimension_numbers<[1], [0], [0], [1], [0, 0, 1, 1], [], []>} : vector<8x16xf32>, vector<16x384xf32>, vector<8x384xf32> -> vector<8x384xf32>
    %246 = arith.addf %241, %245 : vector<8x384xf32>
    %247 = vector.extract_strided_slice %220 {offsets = [0, 129], sizes = [16, 384], strides = [1, 1]} : vector<16x640xf32> to vector<16x384xf32>
    %c5_178 = arith.constant 5 : index
    %c0_179 = arith.constant 0 : index
    %c0_180 = arith.constant 0 : index
    %248 = vector.load %arg7[%c5_178, %c0_179, %c0_180] : memref<9x8x16xf32, #tpu.memory_space<vmem>>, vector<1x8x16xf32>
    %249 = vector.shape_cast %248 : vector<1x8x16xf32> to vector<8x16xf32>
    %cst_181 = arith.constant dense<0.000000e+00> : vector<8x384xf32>
    %250 = tpu.matmul %249, %247, %cst_181 {dimension_numbers = #tpu.dot_dimension_numbers<[1], [0], [0], [1], [0, 0, 1, 1], [], []>} : vector<8x16xf32>, vector<16x384xf32>, vector<8x384xf32> -> vector<8x384xf32>
    %251 = arith.addf %246, %250 : vector<8x384xf32>
    %252 = vector.extract_strided_slice %220 {offsets = [0, 145], sizes = [16, 384], strides = [1, 1]} : vector<16x640xf32> to vector<16x384xf32>
    %c6_182 = arith.constant 6 : index
    %c0_183 = arith.constant 0 : index
    %c0_184 = arith.constant 0 : index
    %253 = vector.load %arg7[%c6_182, %c0_183, %c0_184] : memref<9x8x16xf32, #tpu.memory_space<vmem>>, vector<1x8x16xf32>
    %254 = vector.shape_cast %253 : vector<1x8x16xf32> to vector<8x16xf32>
    %cst_185 = arith.constant dense<0.000000e+00> : vector<8x384xf32>
    %255 = tpu.matmul %254, %252, %cst_185 {dimension_numbers = #tpu.dot_dimension_numbers<[1], [0], [0], [1], [0, 0, 1, 1], [], []>} : vector<8x16xf32>, vector<16x384xf32>, vector<8x384xf32> -> vector<8x384xf32>
    %256 = arith.addf %251, %255 : vector<8x384xf32>
    %257 = vector.extract_strided_slice %220 {offsets = [0, 146], sizes = [16, 384], strides = [1, 1]} : vector<16x640xf32> to vector<16x384xf32>
    %c7_186 = arith.constant 7 : index
    %c0_187 = arith.constant 0 : index
    %c0_188 = arith.constant 0 : index
    %258 = vector.load %arg7[%c7_186, %c0_187, %c0_188] : memref<9x8x16xf32, #tpu.memory_space<vmem>>, vector<1x8x16xf32>
    %259 = vector.shape_cast %258 : vector<1x8x16xf32> to vector<8x16xf32>
    %cst_189 = arith.constant dense<0.000000e+00> : vector<8x384xf32>
    %260 = tpu.matmul %259, %257, %cst_189 {dimension_numbers = #tpu.dot_dimension_numbers<[1], [0], [0], [1], [0, 0, 1, 1], [], []>} : vector<8x16xf32>, vector<16x384xf32>, vector<8x384xf32> -> vector<8x384xf32>
    %261 = arith.addf %256, %260 : vector<8x384xf32>
    %262 = vector.extract_strided_slice %220 {offsets = [0, 147], sizes = [16, 384], strides = [1, 1]} : vector<16x640xf32> to vector<16x384xf32>
    %c8_190 = arith.constant 8 : index
    %c0_191 = arith.constant 0 : index
    %c0_192 = arith.constant 0 : index
    %263 = vector.load %arg7[%c8_190, %c0_191, %c0_192] : memref<9x8x16xf32, #tpu.memory_space<vmem>>, vector<1x8x16xf32>
    %264 = vector.shape_cast %263 : vector<1x8x16xf32> to vector<8x16xf32>
    %cst_193 = arith.constant dense<0.000000e+00> : vector<8x384xf32>
    %265 = tpu.matmul %264, %262, %cst_193 {dimension_numbers = #tpu.dot_dimension_numbers<[1], [0], [0], [1], [0, 0, 1, 1], [], []>} : vector<8x16xf32>, vector<16x384xf32>, vector<8x384xf32> -> vector<8x384xf32>
    %266 = arith.addf %261, %265 : vector<8x384xf32>
    %267 = vector.broadcast %218 : vector<8x1xf32> to vector<8x384xf32>
    %268 = arith.addf %266, %267 : vector<8x384xf32>
    %cst_194 = arith.constant 0.000000e+00 : f32
    %269 = vector.broadcast %cst_194 : f32 to vector<8x384xf32>
    %270 = arith.cmpf oge, %268, %269 : vector<8x384xf32>
    %cst_195 = arith.constant 2.000000e-01 : f32
    %271 = vector.broadcast %cst_195 : f32 to vector<8x384xf32>
    %272 = arith.mulf %271, %268 : vector<8x384xf32>
    %273 = arith.select %270, %268, %272 : vector<8x384xi1>, vector<8x384xf32>
    %cst_196 = arith.constant 0.000000e+00 : f32
    %274 = vector.broadcast %cst_196 : f32 to vector<8x384xf32>
    %275 = arith.select %2, %273, %274 : vector<8x384xi1>, vector<8x384xf32>
    %c4_197 = arith.constant 4 : index
    %c0_198 = arith.constant 0 : index
    %c0_199 = arith.constant 0 : index
    %276 = vector.load %arg9[%c4_197, %c0_198, %c0_199] : memref<5x8x1xf32, #tpu.memory_space<vmem>>, vector<1x8x1xf32>
    %277 = vector.shape_cast %276 : vector<1x8x1xf32> to vector<8x1xf32>
    %cst_200 = arith.constant 0.000000e+00 : f32
    %278 = vector.broadcast %cst_200 : f32 to vector<8x128xf32>
    %279 = tpu.concatenate %278, %275, %278 in 1 : vector<8x128xf32>, vector<8x384xf32>, vector<8x128xf32> -> vector<8x640xf32>
    %cst_201 = arith.constant 0.000000e+00 : f32
    %280 = vector.broadcast %cst_201 : f32 to vector<8x384xf32>
    %281 = vector.extract_strided_slice %279 {offsets = [0, 109], sizes = [8, 384], strides = [1, 1]} : vector<8x640xf32> to vector<8x384xf32>
    %c0_202 = arith.constant 0 : index
    %c0_203 = arith.constant 0 : index
    %c0_204 = arith.constant 0 : index
    %282 = vector.load %arg8[%c0_202, %c0_203, %c0_204] : memref<9x8x8xf32, #tpu.memory_space<vmem>>, vector<1x8x8xf32>
    %283 = vector.shape_cast %282 : vector<1x8x8xf32> to vector<8x8xf32>
    %cst_205 = arith.constant dense<0.000000e+00> : vector<8x384xf32>
    %284 = tpu.matmul %283, %281, %cst_205 {dimension_numbers = #tpu.dot_dimension_numbers<[1], [0], [0], [1], [0, 0, 1, 1], [], []>} : vector<8x8xf32>, vector<8x384xf32>, vector<8x384xf32> -> vector<8x384xf32>
    %285 = arith.addf %280, %284 : vector<8x384xf32>
    %286 = vector.extract_strided_slice %279 {offsets = [0, 110], sizes = [8, 384], strides = [1, 1]} : vector<8x640xf32> to vector<8x384xf32>
    %c1_206 = arith.constant 1 : index
    %c0_207 = arith.constant 0 : index
    %c0_208 = arith.constant 0 : index
    %287 = vector.load %arg8[%c1_206, %c0_207, %c0_208] : memref<9x8x8xf32, #tpu.memory_space<vmem>>, vector<1x8x8xf32>
    %288 = vector.shape_cast %287 : vector<1x8x8xf32> to vector<8x8xf32>
    %cst_209 = arith.constant dense<0.000000e+00> : vector<8x384xf32>
    %289 = tpu.matmul %288, %286, %cst_209 {dimension_numbers = #tpu.dot_dimension_numbers<[1], [0], [0], [1], [0, 0, 1, 1], [], []>} : vector<8x8xf32>, vector<8x384xf32>, vector<8x384xf32> -> vector<8x384xf32>
    %290 = arith.addf %285, %289 : vector<8x384xf32>
    %291 = vector.extract_strided_slice %279 {offsets = [0, 111], sizes = [8, 384], strides = [1, 1]} : vector<8x640xf32> to vector<8x384xf32>
    %c2_210 = arith.constant 2 : index
    %c0_211 = arith.constant 0 : index
    %c0_212 = arith.constant 0 : index
    %292 = vector.load %arg8[%c2_210, %c0_211, %c0_212] : memref<9x8x8xf32, #tpu.memory_space<vmem>>, vector<1x8x8xf32>
    %293 = vector.shape_cast %292 : vector<1x8x8xf32> to vector<8x8xf32>
    %cst_213 = arith.constant dense<0.000000e+00> : vector<8x384xf32>
    %294 = tpu.matmul %293, %291, %cst_213 {dimension_numbers = #tpu.dot_dimension_numbers<[1], [0], [0], [1], [0, 0, 1, 1], [], []>} : vector<8x8xf32>, vector<8x384xf32>, vector<8x384xf32> -> vector<8x384xf32>
    %295 = arith.addf %290, %294 : vector<8x384xf32>
    %296 = vector.extract_strided_slice %279 {offsets = [0, 127], sizes = [8, 384], strides = [1, 1]} : vector<8x640xf32> to vector<8x384xf32>
    %c3_214 = arith.constant 3 : index
    %c0_215 = arith.constant 0 : index
    %c0_216 = arith.constant 0 : index
    %297 = vector.load %arg8[%c3_214, %c0_215, %c0_216] : memref<9x8x8xf32, #tpu.memory_space<vmem>>, vector<1x8x8xf32>
    %298 = vector.shape_cast %297 : vector<1x8x8xf32> to vector<8x8xf32>
    %cst_217 = arith.constant dense<0.000000e+00> : vector<8x384xf32>
    %299 = tpu.matmul %298, %296, %cst_217 {dimension_numbers = #tpu.dot_dimension_numbers<[1], [0], [0], [1], [0, 0, 1, 1], [], []>} : vector<8x8xf32>, vector<8x384xf32>, vector<8x384xf32> -> vector<8x384xf32>
    %300 = arith.addf %295, %299 : vector<8x384xf32>
    %301 = vector.extract_strided_slice %279 {offsets = [0, 128], sizes = [8, 384], strides = [1, 1]} : vector<8x640xf32> to vector<8x384xf32>
    %c4_218 = arith.constant 4 : index
    %c0_219 = arith.constant 0 : index
    %c0_220 = arith.constant 0 : index
    %302 = vector.load %arg8[%c4_218, %c0_219, %c0_220] : memref<9x8x8xf32, #tpu.memory_space<vmem>>, vector<1x8x8xf32>
    %303 = vector.shape_cast %302 : vector<1x8x8xf32> to vector<8x8xf32>
    %cst_221 = arith.constant dense<0.000000e+00> : vector<8x384xf32>
    %304 = tpu.matmul %303, %301, %cst_221 {dimension_numbers = #tpu.dot_dimension_numbers<[1], [0], [0], [1], [0, 0, 1, 1], [], []>} : vector<8x8xf32>, vector<8x384xf32>, vector<8x384xf32> -> vector<8x384xf32>
    %305 = arith.addf %300, %304 : vector<8x384xf32>
    %306 = vector.extract_strided_slice %279 {offsets = [0, 129], sizes = [8, 384], strides = [1, 1]} : vector<8x640xf32> to vector<8x384xf32>
    %c5_222 = arith.constant 5 : index
    %c0_223 = arith.constant 0 : index
    %c0_224 = arith.constant 0 : index
    %307 = vector.load %arg8[%c5_222, %c0_223, %c0_224] : memref<9x8x8xf32, #tpu.memory_space<vmem>>, vector<1x8x8xf32>
    %308 = vector.shape_cast %307 : vector<1x8x8xf32> to vector<8x8xf32>
    %cst_225 = arith.constant dense<0.000000e+00> : vector<8x384xf32>
    %309 = tpu.matmul %308, %306, %cst_225 {dimension_numbers = #tpu.dot_dimension_numbers<[1], [0], [0], [1], [0, 0, 1, 1], [], []>} : vector<8x8xf32>, vector<8x384xf32>, vector<8x384xf32> -> vector<8x384xf32>
    %310 = arith.addf %305, %309 : vector<8x384xf32>
    %311 = vector.extract_strided_slice %279 {offsets = [0, 145], sizes = [8, 384], strides = [1, 1]} : vector<8x640xf32> to vector<8x384xf32>
    %c6_226 = arith.constant 6 : index
    %c0_227 = arith.constant 0 : index
    %c0_228 = arith.constant 0 : index
    %312 = vector.load %arg8[%c6_226, %c0_227, %c0_228] : memref<9x8x8xf32, #tpu.memory_space<vmem>>, vector<1x8x8xf32>
    %313 = vector.shape_cast %312 : vector<1x8x8xf32> to vector<8x8xf32>
    %cst_229 = arith.constant dense<0.000000e+00> : vector<8x384xf32>
    %314 = tpu.matmul %313, %311, %cst_229 {dimension_numbers = #tpu.dot_dimension_numbers<[1], [0], [0], [1], [0, 0, 1, 1], [], []>} : vector<8x8xf32>, vector<8x384xf32>, vector<8x384xf32> -> vector<8x384xf32>
    %315 = arith.addf %310, %314 : vector<8x384xf32>
    %316 = vector.extract_strided_slice %279 {offsets = [0, 146], sizes = [8, 384], strides = [1, 1]} : vector<8x640xf32> to vector<8x384xf32>
    %c7_230 = arith.constant 7 : index
    %c0_231 = arith.constant 0 : index
    %c0_232 = arith.constant 0 : index
    %317 = vector.load %arg8[%c7_230, %c0_231, %c0_232] : memref<9x8x8xf32, #tpu.memory_space<vmem>>, vector<1x8x8xf32>
    %318 = vector.shape_cast %317 : vector<1x8x8xf32> to vector<8x8xf32>
    %cst_233 = arith.constant dense<0.000000e+00> : vector<8x384xf32>
    %319 = tpu.matmul %318, %316, %cst_233 {dimension_numbers = #tpu.dot_dimension_numbers<[1], [0], [0], [1], [0, 0, 1, 1], [], []>} : vector<8x8xf32>, vector<8x384xf32>, vector<8x384xf32> -> vector<8x384xf32>
    %320 = arith.addf %315, %319 : vector<8x384xf32>
    %321 = vector.extract_strided_slice %279 {offsets = [0, 147], sizes = [8, 384], strides = [1, 1]} : vector<8x640xf32> to vector<8x384xf32>
    %c8_234 = arith.constant 8 : index
    %c0_235 = arith.constant 0 : index
    %c0_236 = arith.constant 0 : index
    %322 = vector.load %arg8[%c8_234, %c0_235, %c0_236] : memref<9x8x8xf32, #tpu.memory_space<vmem>>, vector<1x8x8xf32>
    %323 = vector.shape_cast %322 : vector<1x8x8xf32> to vector<8x8xf32>
    %cst_237 = arith.constant dense<0.000000e+00> : vector<8x384xf32>
    %324 = tpu.matmul %323, %321, %cst_237 {dimension_numbers = #tpu.dot_dimension_numbers<[1], [0], [0], [1], [0, 0, 1, 1], [], []>} : vector<8x8xf32>, vector<8x384xf32>, vector<8x384xf32> -> vector<8x384xf32>
    %325 = arith.addf %320, %324 : vector<8x384xf32>
    %326 = vector.broadcast %277 : vector<8x1xf32> to vector<8x384xf32>
    %327 = arith.addf %325, %326 : vector<8x384xf32>
    %cst_238 = arith.constant 0.000000e+00 : f32
    %328 = vector.broadcast %cst_238 : f32 to vector<8x384xf32>
    %329 = arith.cmpf oge, %327, %328 : vector<8x384xf32>
    %cst_239 = arith.constant 2.000000e-01 : f32
    %330 = vector.broadcast %cst_239 : f32 to vector<8x384xf32>
    %331 = arith.mulf %330, %327 : vector<8x384xf32>
    %332 = arith.select %329, %327, %331 : vector<8x384xi1>, vector<8x384xf32>
    %cst_240 = arith.constant 0.000000e+00 : f32
    %333 = vector.broadcast %cst_240 : f32 to vector<8x384xf32>
    %334 = arith.select %2, %332, %333 : vector<8x384xi1>, vector<8x384xf32>
    %335 = vector.shape_cast %334 : vector<8x384xf32> to vector<1x8x384xf32>
    %c0_241 = arith.constant 0 : index
    %c0_242 = arith.constant 0 : index
    %c0_243 = arith.constant 0 : index
    %336 = vector.load %arg11[%c0_241, %c0_242, %c0_243] : memref<1x8x384xf32, #tpu.memory_space<vmem>>, vector<1x8x384xf32>
    tpu.vector_store %arg11[%c0_241, %c0_242, %c0_243], %335 {strides = array<i32>} : memref<1x8x384xf32, #tpu.memory_space<vmem>>, vector<1x8x384xf32>,
    return
  }
  func.func @transform_0(%arg0: i32) -> (i32, i32, i32) {
    %c0_i32 = arith.constant 0 : i32
    %c0_i32_0 = arith.constant 0 : i32
    %c0_i32_1 = arith.constant 0 : i32
    return %arg0, %c0_i32, %c0_i32_0 : i32, i32, i32
  }
  func.func @transform_1(%arg0: i32) -> (i32, i32, i32) {
    %c0_i32 = arith.constant 0 : i32
    %c0_i32_0 = arith.constant 0 : i32
    %c0_i32_1 = arith.constant 0 : i32
    return %arg0, %c0_i32, %c0_i32_0 : i32, i32, i32
  }
  func.func @transform_2(%arg0: i32) -> (i32, i32) {
    %c0_i32 = arith.constant 0 : i32
    %c0_i32_0 = arith.constant 0 : i32
    %c0_i32_1 = arith.constant 0 : i32
    return %c0_i32, %c0_i32_0 : i32, i32
  }
  func.func @transform_3(%arg0: i32) -> (i32, i32, i32) {
    %c0_i32 = arith.constant 0 : i32
    %c0_i32_0 = arith.constant 0 : i32
    %c0_i32_1 = arith.constant 0 : i32
    %c0_i32_2 = arith.constant 0 : i32
    return %c0_i32, %c0_i32_0, %c0_i32_1 : i32, i32, i32
  }
  func.func @transform_4(%arg0: i32) -> (i32, i32, i32) {
    %c0_i32 = arith.constant 0 : i32
    %c0_i32_0 = arith.constant 0 : i32
    %c0_i32_1 = arith.constant 0 : i32
    %c0_i32_2 = arith.constant 0 : i32
    return %c0_i32, %c0_i32_0, %c0_i32_1 : i32, i32, i32
  }
  func.func @transform_5(%arg0: i32) -> (i32, i32, i32) {
    %c0_i32 = arith.constant 0 : i32
    %c0_i32_0 = arith.constant 0 : i32
    %c0_i32_1 = arith.constant 0 : i32
    %c0_i32_2 = arith.constant 0 : i32
    return %c0_i32, %c0_i32_0, %c0_i32_1 : i32, i32, i32
  }
  func.func @transform_6(%arg0: i32) -> (i32, i32, i32) {
    %c0_i32 = arith.constant 0 : i32
    %c0_i32_0 = arith.constant 0 : i32
    %c0_i32_1 = arith.constant 0 : i32
    %c0_i32_2 = arith.constant 0 : i32
    return %c0_i32, %c0_i32_0, %c0_i32_1 : i32, i32, i32
  }
  func.func @transform_7(%arg0: i32) -> (i32, i32, i32) {
    %c0_i32 = arith.constant 0 : i32
    %c0_i32_0 = arith.constant 0 : i32
    %c0_i32_1 = arith.constant 0 : i32
    %c0_i32_2 = arith.constant 0 : i32
    return %c0_i32, %c0_i32_0, %c0_i32_1 : i32, i32, i32
  }
  func.func @transform_8(%arg0: i32) -> (i32, i32, i32) {
    %c0_i32 = arith.constant 0 : i32
    %c0_i32_0 = arith.constant 0 : i32
    %c0_i32_1 = arith.constant 0 : i32
    %c0_i32_2 = arith.constant 0 : i32
    return %c0_i32, %c0_i32_0, %c0_i32_1 : i32, i32, i32
  }
  func.func @transform_9(%arg0: i32) -> (i32, i32) {
    %c0_i32 = arith.constant 0 : i32
    %c0_i32_0 = arith.constant 0 : i32
    %c0_i32_1 = arith.constant 0 : i32
    return %c0_i32, %c0_i32_0 : i32, i32
  }
  func.func @transform_10(%arg0: i32) -> (i32, i32, i32) {
    %c0_i32 = arith.constant 0 : i32
    %c0_i32_0 = arith.constant 0 : i32
    %c0_i32_1 = arith.constant 0 : i32
    return %arg0, %c0_i32, %c0_i32_0 : i32, i32, i32
  }
}

</mosaic_0001>

<bundles_post_ra>
// kernel: tpu_custom_call.1
= control target key start
LH: loop header
LB: loop body
LE: loop exit
PB: predicated region body
PF: predicated region fallthrough
CT: control target
= control target key end

     0   :  { %15 = vsyncpa [#allocation3], 0  ;;  %s11495_s0 = inlined_call_operand.vmem [shape: f32[2,8,64], index: 0, kind: input, shape index: {}]   ;;  %s11496_s1 = inlined_call_operand.vmem [shape: f32[2,8,384], index: 1, kind: input, shape index: {}]   ;;  %s11497_s2 = inlined_call_operand.vmem [shape: f32[64,384], index: 2, kind: input, shape index: {}]   ;;  %s11498_s3 = inlined_call_operand.vmem [shape: f32[16,8,8], index: 3, kind: input, shape index: {}]   ;;  %s11499_s4 = inlined_call_operand.vmem [shape: f32[9,8,8], index: 4, kind: input, shape index: {}]   ;;  %s11500_s5 = inlined_call_operand.vmem [shape: f32[9,8,8], index: 5, kind: input, shape index: {}]   ;;  %s11501_s6 = inlined_call_operand.vmem [shape: f32[9,8,16], index: 6, kind: input, shape index: {}]   ;;  %s11502_s7 = inlined_call_operand.vmem [shape: f32[9,8,8], index: 7, kind: input, shape index: {}]   ;;  %s11503_s8 = inlined_call_operand.vmem [shape: f32[5,8,1], index: 8, kind: input, shape index: {}]   ;;  %s11504_s9 = inlined_call_operand.vmem [shape: f32[8,384], index: 9, kind: input, shape index: {}]   ;;  %s11505_s10 = inlined_call_operand.hbm [shape: f32[2,8,384], index: 10, kind: output, shape index: {}]  }
   0x1   :  { %17 = vsyncpa [#allocation3 + $0x1], 0  ;;  %s10002_s13 = smov 0   ;;  %s10004_s14 = smov 0  }
   0x2   :  { %s10006_s15 = smov 0   ;;  %s10008_s16 = smov 0  }
   0x3 LB: > { %s10023_s17 = sadd.s32 4294967295, %s9921_s16   ;;  %s9197_s18 = sadd.s32 4294967294, %s9921_s16   ;;  %s9921_s16 = sphi %s10008_s16, %s11528_s16   ;;  %s9917_s15 = sphi %s10006_s15, %s11527_s15   ;;  %s9913_s14 = sphi %s10004_s14, %s11526_s14   ;;  %s9909_s13 = sphi %s10002_s13, %s11525_s13  }
   0x4   : > { %s10027_s19 = sadd.s32 1, %s9921_s16   ;;  %s250_s20 = sadd.s32 1, %s9917_s15 }
   0x5   : > { %s247_s21 = ssub.s32 %s9921_s16, %s10027_s19  ;;  %p260_p0 = scmp.ne.s32.totalorder %s9917_s15, %s9913_s14 }
   0x6   : > { %p248_p1 = scmp.eq.s32.totalorder %s247_s21, 0  ;;  %p261_p2 = scmp.eq.s32.totalorder %s10023_s17, 1 }
   0x7   : > { %p266_p3 = scmp.ne.s32.totalorder %s9913_s14, %s9909_s13  ;;  %p267_p4 = scmp.eq.s32.totalorder %s9197_s18, 1 }
   0x8   : > { %s10038_s22 = scalar_select %p248_p1, %s9917_s15, %s250_s20  }
   0x9   : > { %p10040_p5 = por %p261_p2, %p260_p0  ;;  %p10044_p6 = por %p267_p4, %p266_p3 }
   0xa   : > { %11516 = sst [smem:[#allocation5_spill]] %s10038_s22  ;;  %p9200_p7 = scmp.ge.s32.totalorder %s9921_s16, 1 }
   0xb   : > { %p324_p8 = scmp.lt.s32.totalorder %s9921_s16, 3 }
   0xd   : > { %p325_p9 = pnand %p9200_p7, %p324_p8 }
   0xe   : > { %p366_p10 = scmp.lt.s32.totalorder (!%p325_p9), %s10023_s17, 1  ;;  %s9925_s22 = smov (!%p325_p9), 126  }
   0xf   : > { %328 = sbr.rel (%p325_p9) target bundleno = 2169 (0x879), region = 60  ;;  %s9927_s25 = smov (!%p325_p9), 125  }
  0x10   : > { %s9928_s26 = smov (!%p325_p9), 110   ;;  %s9929_s28 = smov (!%p325_p9), 109  }
  0x11   : > { %s9930_s29 = smov (!%p325_p9), 108   ;;  %s9931_s11 = smov (!%p325_p9), 107  }
  0x12   : > { %s9933_s18 = smov (!%p325_p9), 91   ;;  %s9934_s20 = smov (!%p325_p9), 90  }
  0x13   : > { %s9935_s21 = smov (!%p325_p9), 89  }
  0x14   : > { %v404_v0 = vld [vmem:[%s11497_s2 + $0xb0] sm:$0xff]  ;;  %v403_v1 = vld [vmem:[%s11497_s2 + $0xa8] sm:$0xff]  ;;  %v405_v2 = vld [vmem:[%s11497_s2 + $0xb8] sm:$0xff]  ;;  %v9923_v3 = vmov 0.0   ;;  %s10093_s27 = scalar_select %p366_p10, %s10023_s17, 1  ;;  %vm406_vm0 = vcmask 523264  }
  0x15   : > { %426 = vmatprep.subr.mxu0 %v404_v0  ;;  %9497 = vmatprep.subr.mxu1 %v9923_v3  ;;  %v401_v4 = vld [vmem:[%s11497_s2 + $0x98] sm:$0xff]  ;;  %v400_v5 = vld [vmem:[%s11497_s2 + $0x90] sm:$0xff]  ;;  %v402_v6 = vld [vmem:[%s11497_s2 + $0xa0] sm:$0xff]  ;;  %vm9924_vm1 = vmmov 0   ;;  %v9940_v34 = vmov 0   ;;  %vm567_vm2 = vcmask 1039360  }
  0x16   : > { %427 = vmatpush1.msra.mxu0 %v403_v1  ;;  %9498 = vmatpush3.msra.mxu1 %v405_v2  ;;  %v398_v7 = vld [vmem:[%s11497_s2 + $0x80] sm:$0xff]  ;;  %v397_v8 = vld [vmem:[%s11497_s2 + $0x78] sm:$0xff]  ;;  %v399_v9 = vld [vmem:[%s11497_s2 + $0x88] sm:$0xff]  ;;  %s9201_s30 = sshll.u32 %s10093_s27, 3  ;;  %vm574_vm3 = vcmask 64512   ;;  %vm873_vm4 = vcmask 1031168  }
  0x17   : > { %428 = vmatprep.subr.mxu0 %v401_v4  ;;  %9499 = vmatprep.subr.mxu1 %v9923_v3  ;;  %v395_v10 = vld [vmem:[%s11497_s2 + $0x68] sm:$0xff]  ;;  %v394_v11 = vld [vmem:[%s11497_s2 + $0x60] sm:$0xff]  ;;  %v396_v12 = vld [vmem:[%s11497_s2 + $0x70] sm:$0xff]  ;;  %s369_s12 = scalar_lea.vmem %s11495_s0, %s9201_s30  ;;  %s11508_s30 = smov 127   ;;  %vm1037_vm5 = vcmask 1022976   ;;  %vm1201_vm6 = vcmask 900096  }
  0x18   : > { %429 = vmatpush1.msra.mxu0 %v400_v5  ;;  %9500 = vmatpush3.msra.mxu1 %v402_v6  ;;  %v392_v13 = vld [vmem:[%s11497_s2 + $0x50] sm:$0xff]  ;;  %v391_v14 = vld [vmem:[%s11497_s2 + $0x48] sm:$0xff]  ;;  %v393_v15 = vld [vmem:[%s11497_s2 + $0x58] sm:$0xff]  ;;  %vm1365_vm7 = vcmask 891904   ;;  %vm1529_vm8 = vcmask 883712   ;;  %vm1693_vm9 = vcmask 875520  }
  0x19   : > { %430 = vmatprep.subr.mxu0 %v398_v7  ;;  %9501 = vmatprep.subr.mxu1 %v9923_v3  ;;  %v389_v16 = vld [vmem:[%s11497_s2 + $0x38] sm:$0xff]  ;;  %v388_v17 = vld [vmem:[%s11497_s2 + $0x30] sm:$0xff]  ;;  %v390_v18 = vld [vmem:[%s11497_s2 + $0x40] sm:$0xff]  ;;  %vm1857_vm10 = vcmask 752640   ;;  %vm2021_vm11 = vcmask 744448   ;;  %vm2185_vm12 = vcmask 736256  }
  0x1a   : > { %431 = vmatpush1.msra.mxu0 %v397_v8  ;;  %9502 = vmatpush3.msra.mxu1 %v399_v9  ;;  %v386_v19 = vld [vmem:[%s11497_s2 + $0x20] sm:$0xff]  ;;  %v385_v20 = vld [vmem:[%s11497_s2 + $0x18] sm:$0xff]  ;;  %v387_v21 = vld [vmem:[%s11497_s2 + $0x28] sm:$0xff]  ;;  %vm2349_vm13 = vcmask 728064   ;;  %vm2513_vm14 = vcmask 605184   ;;  %vm2677_vm15 = vcmask 596992  }
  0x1b   : > { %432 = vmatprep.subr.mxu0 %v395_v10  ;;  %9503 = vmatprep.subr.mxu1 %v9923_v3  ;;  %v383_v22 = vld [vmem:[%s11497_s2 + $0x8] sm:$0xff]  ;;  %v382_v23 = vld [vmem:[%s11497_s2] sm:$0xff]  ;;  %v384_v24 = vld [vmem:[%s11497_s2 + $0x10] sm:$0xff] }
  0x1c   : > { %433 = vmatpush1.msra.mxu0 %v394_v11  ;;  %9504 = vmatpush3.msra.mxu1 %v396_v12  ;;  %v381_v25 = vld [vmem:[%s369_s12] sm:$0xff]  ;;  %s11506_s12 = smov 92   ;;  %v9205_v39 = vld [vmem:[%s11498_s3 + $0x8] sm:$0xff]  ;;  %v9210_v47 = vld [vmem:[%s11498_s3 + $0x10] sm:$0xff] }
  0x1d   : > { %434 = vmatprep.subr.mxu0 %v392_v13  ;;  %9505 = vmatprep.subr.mxu1 %v9923_v3  ;;  %v551_v33 = vld [vmem:[%s11503_s8] sm:$0xff]  ;;  %v9213_v51 = vld [vmem:[%s11498_s3 + $0x18] sm:$0xff]  ;;  %v10330_v59 = vld [vmem:[%s11498_s3 + $0x28] sm:$0xff] }
  0x1e   : > { %435 = vmatpush1.msra.mxu0 %v391_v14  ;;  %9506 = vmatpush3.msra.mxu1 %v393_v15  ;;  %v552_v43 = vld [vmem:[%s11498_s3] sm:$0xff]  ;;  %v9222_v11 = vld [vmem:[%s11498_s3 + $0x30] sm:$0xff] }
  0x1f   : > { %436 = vmatprep.subr.mxu0 %v389_v16  ;;  %9507 = vmatprep.subr.mxu1 %v9923_v3  ;;  %v9216_v55 = vld [vmem:[%s11498_s3 + $0x20] sm:$0xff] }
  0x20   : > { %437 = vmatpush1.msra.mxu0 %v388_v17  ;;  %9508 = vmatpush3.msra.mxu1 %v390_v18 }
  0x21   : > { %438 = vmatprep.subr.mxu0 %v386_v19  ;;  %9509 = vmatprep.subr.mxu1 %v9923_v3 }
  0x22   : > { %439 = vmatpush1.msra.mxu0 %v385_v20  ;;  %9510 = vmatpush3.msra.mxu1 %v387_v21 }
  0x23   : > { %440 = vmatprep.subr.mxu0 %v383_v22  ;;  %9511 = vmatprep.subr.mxu1 %v9923_v3 }
  0x24   : > { %441 = vmatpush1.msra.mxu0 %v382_v23  ;;  %474 = vmatprep.mubr.f32.mxu0 %v9923_v3 }
  0x25   : > { %9512 = vmatpush3.msra.mxu1 %v384_v24  ;;  %9513 = vmatprep.mubr.msk.f32.mxu1 %vm9924_vm1, %v9923_v3 }
  0x26   : > { %9203 = vmatmul.mubr.msk.f32.vlgmr.msra.gmra.mxu0 %vm406_vm0, %v381_v25  ;;  %9514 = vmatmul.mubr.msk.f32.vlgmr.msra.gmra.mxu1 %vm406_vm0, %v381_v25  ;;  %v9225_v25 = vld [vmem:[%s11498_s3 + $0x38] sm:$0xff]  ;;  %vm2841_vm0 = vcmask 588800  }
  0x27   : > { %871 = vrot.lane.b32.xlu0 %v9923_v3, %s9925_s22  ;;  %565 = vrot.lane.b32.xlu1 %v9923_v3, %s11508_s30 }
  0x28   : > { %9516 = vmatprep.subr.mxu1 %v9923_v3  ;;  %9518 = vmatprep.mubr.msk.f32.mxu1 %vm9924_vm1, %v9923_v3 }
  0x29   : > { %642 = vmatprep.mubr.f32.mxu0 %v9923_v3  ;;  %9859 = vset.pattern.permute.xlu0 %v9940_v34 }
  0x2a   : > { %9860 = vset.pattern.permute.xlu1 %v9940_v34  ;;  %v9228_v34 = vld [vmem:[%s11498_s3 + $0x40] sm:$0xff] }
  0x2b   : > { %1035 = vrot.lane.b32.xlu0 %v9923_v3, %s9927_s25 }
  0x2f   : > { %1199 = vrot.lane.b32.xlu0 %v9923_v3, %s9928_s26 }
  0x33   : > { %1363 = vrot.lane.b32.xlu0 %v9923_v3, %s9929_s28 }
  0x99   : > { %v872_v30 = vpop.permute.xlu0 %871  ;;  %v10259_v36 = vpop.permute.xlu1 %565 }
  0x9d   : > { %v1036_v31 = vpop.permute.xlu0 %1035 }
  0xa1   : > { %v10249_v32 = vpop.permute.xlu0 %1199 }
  0xa5   : > { %v10257_v35 = vpop.permute.xlu0 %1363 }
  0xe6   : > { %v10157_v26 = vpop.f32.mrf.mxu0  ;;  %v10159_v27 = vpop.f32.mrf.mxu1 }
  0xe7   : > { %563 = vrot.lane.b32.xlu0 %v10159_v27, %s11508_s30  ;;  %559 = vrot.lane.b32.xlu1 %v10157_v26, %s11508_s30 }
  0xe8   : > { %v9515_v28 = vpop.f32.mrf.mxu1  ;;  %v10193_v29 = vpop.f32.mrf.mxu0 }
  0xeb   : > { %869 = vrot.lane.b32.xlu0 %v10159_v27, %s9925_s22  ;;  %865 = vrot.lane.b32.xlu1 %v10157_v26, %s9925_s22 }
  0xef   : > { %1029 = vrot.lane.b32.xlu0 %v10157_v26, %s9927_s25  ;;  %1033 = vrot.lane.b32.xlu1 %v10159_v27, %s9927_s25 }
  0xf3   : > { %1193 = vrot.lane.b32.xlu0 %v10157_v26, %s9928_s26  ;;  %1197 = vrot.lane.b32.xlu1 %v10159_v27, %s9928_s26 }
  0xf7   : > { %1361 = vrot.lane.b32.xlu0 %v10159_v27, %s9929_s28  ;;  %1357 = vrot.lane.b32.xlu1 %v10157_v26, %s9929_s28 }
  0xfb   : > { %1525 = vrot.lane.b32.xlu0 %v10159_v27, %s9930_s29  ;;  %1521 = vrot.lane.b32.xlu1 %v10157_v26, %s9930_s29 }
  0xff   : > { %1689 = vrot.lane.b32.xlu0 %v10159_v27, %s9931_s11  ;;  %1685 = vrot.lane.b32.xlu1 %v10157_v26, %s9931_s11 }
 0x103   : > { %1853 = vrot.lane.b32.xlu0 %v10159_v27, %s11506_s12  ;;  %1849 = vrot.lane.b32.xlu1 %v10157_v26, %s11506_s12  ;;  %s9936_s12 = smov 74  }
 0x107   : > { %2013 = vrot.lane.b32.xlu1 %v10157_v26, %s9933_s18  ;;  %561 = vrot.lane.b32.xlu0 %v10193_v29, %s11508_s30  ;;  %s9938_s30 = smov 72  }
 0x10b   : > { %867 = vrot.lane.b32.xlu1 %v10193_v29, %s9925_s22  ;;  %2017 = vrot.lane.b32.xlu0 %v10159_v27, %s9933_s18  ;;  %s9937_s22 = smov 73  }
 0x10f   : > { %2177 = vrot.lane.b32.xlu1 %v10157_v26, %s9934_s20  ;;  %1527 = vrot.lane.b32.xlu0 %v9923_v3, %s9930_s29 }
 0x113   : > { %2341 = vrot.lane.b32.xlu1 %v10157_v26, %s9935_s21  ;;  %1031 = vrot.lane.b32.xlu0 %v10193_v29, %s9927_s25  ;;  %s11519_s25 = smov 92  }
 0x117   : > { %2505 = vrot.lane.b32.xlu1 %v10157_v26, %s9936_s12  ;;  %1195 = vrot.lane.b32.xlu0 %v10193_v29, %s9928_s26 }
 0x11b   : > { %2669 = vrot.lane.b32.xlu1 %v10157_v26, %s9937_s22  ;;  %2181 = vrot.lane.b32.xlu0 %v10159_v27, %s9934_s20 }
 0x11f   : > { %2833 = vrot.lane.b32.xlu1 %v10157_v26, %s9938_s30  ;;  %1691 = vrot.lane.b32.xlu0 %v9923_v3, %s9931_s11 }
 0x123   : > { %1359 = vrot.lane.b32.xlu1 %v10193_v29, %s9929_s28  ;;  %2345 = vrot.lane.b32.xlu0 %v10159_v27, %s9935_s21 }
 0x127   : > { %1523 = vrot.lane.b32.xlu1 %v10193_v29, %s9930_s29  ;;  %1855 = vrot.lane.b32.xlu0 %v9923_v3, %s11519_s25  ;;  %s9939_s29 = smov 71  }
 0x12b   : > { %1687 = vrot.lane.b32.xlu1 %v10193_v29, %s9931_s11  ;;  %2509 = vrot.lane.b32.xlu0 %v10159_v27, %s9936_s12  ;;  %s11510_s11 = smov 1  }
 0x12f   : > { %1851 = vrot.lane.b32.xlu1 %v10193_v29, %s11519_s25  ;;  %2019 = vrot.lane.b32.xlu0 %v9923_v3, %s9933_s18  ;;  %s9941_s25 = smov 18  }
 0x133   : > { %2015 = vrot.lane.b32.xlu1 %v10193_v29, %s9933_s18  ;;  %2673 = vrot.lane.b32.xlu0 %v10159_v27, %s9937_s22  ;;  %s9944_s18 = smov 19  }
 0x137   : > { %2179 = vrot.lane.b32.xlu1 %v10193_v29, %s9934_s20  ;;  %2183 = vrot.lane.b32.xlu0 %v9923_v3, %s9934_s20  ;;  %s11512_s20 = smov 111  }
 0x13b   : > { %2343 = vrot.lane.b32.xlu1 %v10193_v29, %s9935_s21  ;;  %2837 = vrot.lane.b32.xlu0 %v10159_v27, %s9938_s30 }
 0x13f   : > { %2507 = vrot.lane.b32.xlu1 %v10193_v29, %s9936_s12  ;;  %2347 = vrot.lane.b32.xlu0 %v9923_v3, %s9935_s21  ;;  %s363_s21 = sand.u32 1, %s9913_s14  }
 0x143   : > { %2671 = vrot.lane.b32.xlu1 %v10193_v29, %s9937_s22  ;;  %3001 = vrot.lane.b32.xlu0 %v10159_v27, %s9939_s29 }
 0x147   : > { %2835 = vrot.lane.b32.xlu1 %v10193_v29, %s9938_s30  ;;  %2511 = vrot.lane.b32.xlu0 %v9923_v3, %s9936_s12  ;;  %s11520_s12 = smov 127  }
 0x14b   : > { %2999 = vrot.lane.b32.xlu1 %v10193_v29, %s9939_s29  ;;  %2839 = vrot.lane.b32.xlu0 %v9923_v3, %s9938_s30  ;;  %s9795_s30 = smul.u32 24, %s10093_s27  ;;  %s11521_s27 = smov 17  }
 0x14f   : > { %2997 = vrot.lane.b32.xlu1 %v10157_v26, %s9939_s29  ;;  %3161 = vperm.xlu0 %9859, %v551_v33  }
 0x153   : > { %2675 = vrot.lane.b32.xlu1 %v9923_v3, %s9937_s22  ;;  %3178 = vrot.lane.b32.xlu0 %v9923_v3, %s9941_s25  ;;  %s9794_s22 = smul.u32 24, %s363_s21 }
 0x157   : > { %3003 = vrot.lane.b32.xlu1 %v9923_v3, %s9939_s29  ;;  %s11514_s29 = smov 17  }
 0x158   : > { %3498 = vrot.lane.b32.xlu0 %v9923_v3, %s11514_s29 }
 0x159   : > { %v564_v37 = vpop.permute.xlu0 %563  ;;  %v560_v38 = vpop.permute.xlu1 %559 }
 0x15a   : > { %v570_v40 = vsel %vm567_vm2, %v564_v37, %v10259_v36 }
 0x15b   : > { %9517 = vmatpush3.msra.mxu1 %v570_v40  ;;  %3337 = vrot.lane.b32.xlu1 %v9923_v3, %s9944_s18 }
 0x15c   : > { %9519 = vmatmul.mubr.msk.f32.vlgmr.msra.gmra.mxu1 %vm574_vm3, %v9205_v39  ;;  %9521 = vmatprep.subr.mxu1 %v9923_v3 }
 0x15d   : > { %9522 = vmatpush3.msra.mxu1 %v10159_v27  ;;  %v870_v41 = vpop.permute.xlu0 %869  ;;  %v10270_v42 = vpop.permute.xlu1 %865  ;;  %9523 = vmatprep.mubr.msk.f32.mxu1 %vm9924_vm1, %v9923_v3 }
 0x15e   : > { %9526 = vmatprep.subr.mxu1 %v9923_v3  ;;  %v876_v44 = vsel %vm873_vm4, %v870_v41, %v872_v30  ;;  %3662 = vrot.lane.b32.xlu0 %v9923_v3, %s11510_s11 }
 0x160   : > { %9524 = vmatmul.mubr.msk.f32.vlgmr.msra.gmra.mxu1 %vm574_vm3, %v552_v43 }
 0x161   : > { %9527 = vmatpush3.msra.mxu1 %v876_v44  ;;  %v10280_v45 = vpop.permute.xlu0 %1029  ;;  %v10282_v46 = vpop.permute.xlu1 %1033  ;;  %9528 = vmatprep.mubr.msk.f32.mxu1 %vm9924_vm1, %v9923_v3 }
 0x162   : > { %9531 = vmatprep.subr.mxu1 %v9923_v3  ;;  %v1040_v48 = vsel %vm1037_vm5, %v10282_v46, %v1036_v31 }
 0x164   : > { %9529 = vmatmul.mubr.msk.f32.vlgmr.msra.gmra.mxu1 %vm574_vm3, %v9210_v47 }
 0x165   : > { %9532 = vmatpush3.msra.mxu1 %v1040_v48  ;;  %v10293_v49 = vpop.permute.xlu0 %1193  ;;  %v10295_v50 = vpop.permute.xlu1 %1197  ;;  %9533 = vmatprep.mubr.msk.f32.mxu1 %vm9924_vm1, %v9923_v3 }
 0x166   : > { %9536 = vmatprep.subr.mxu1 %v9923_v3  ;;  %v1204_v52 = vsel %vm1201_vm6, %v10295_v50, %v10249_v32 }
 0x168   : > { %9534 = vmatmul.mubr.msk.f32.vlgmr.msra.gmra.mxu1 %vm574_vm3, %v9213_v51 }
 0x169   : > { %9537 = vmatpush3.msra.mxu1 %v1204_v52  ;;  %v10307_v53 = vpop.permute.xlu0 %1361  ;;  %v10309_v54 = vpop.permute.xlu1 %1357  ;;  %9538 = vmatprep.mubr.msk.f32.mxu1 %vm9924_vm1, %v9923_v3 }
 0x16a   : > { %9541 = vmatprep.subr.mxu1 %v9923_v3  ;;  %v1368_v56 = vsel %vm1365_vm7, %v10307_v53, %v10257_v35 }
 0x16c   : > { %9539 = vmatmul.mubr.msk.f32.vlgmr.msra.gmra.mxu1 %vm574_vm3, %v9216_v55 }
 0x16d   : > { %9542 = vmatpush3.msra.mxu1 %v1368_v56  ;;  %v10321_v57 = vpop.permute.xlu0 %1525  ;;  %v10323_v58 = vpop.permute.xlu1 %1521  ;;  %9543 = vmatprep.mubr.msk.f32.mxu1 %vm9924_vm1, %v9923_v3  ;;  %v9234_v56 = vld [vmem:[%s11498_s3 + $0x50] sm:$0xff] }
 0x16e   : > { %9546 = vmatprep.subr.mxu1 %v9923_v3 }
 0x170   : > { %9544 = vmatmul.mubr.msk.f32.vlgmr.msra.gmra.mxu1 %vm574_vm3, %v10330_v59 }
 0x171   : > { %v10335_v60 = vpop.permute.xlu0 %1689  ;;  %v10337_v61 = vpop.permute.xlu1 %1685  ;;  %9548 = vmatprep.mubr.msk.f32.mxu1 %vm9924_vm1, %v9923_v3 }
 0x175   : > { %v10341_v62 = vpop.permute.xlu0 %1853  ;;  %v10343_v63 = vpop.permute.xlu1 %1849 }
 0x179   : > { %v10345_v0 = vpop.permute.xlu1 %2013  ;;  %v562_v1 = vpop.permute.xlu0 %561 }
 0x17a   : > { %v569_v2 = vsel %vm567_vm2, %v562_v1, %v564_v37  ;;  %v568_v4 = vsel %vm567_vm2, %v560_v38, %v562_v1 }
 0x17b   : > { %608 = vmatprep.subr.mxu0 %v569_v2 }
 0x17c   : > { %609 = vmatpush1.msra.mxu0 %v568_v4 }
 0x17d   : > { %v868_v5 = vpop.permute.xlu1 %867  ;;  %9206 = vmatmul.mubr.msk.f32.vlgmr.msra.gmra.mxu0 %vm574_vm3, %v9205_v39  ;;  %752 = vmatprep.subr.mxu0 %v10193_v29  ;;  %v10351_v6 = vpop.permute.xlu0 %2017 }
 0x17e   : > { %753 = vmatpush1.msra.mxu0 %v10157_v26  ;;  %v875_v7 = vsel %vm873_vm4, %v868_v5, %v870_v41  ;;  %786 = vmatprep.mubr.f32.mxu0 %v9923_v3  ;;  %v874_v9 = vsel %vm873_vm4, %v10270_v42, %v868_v5  ;;  %vm3005_vm4 = vcmask 580608  }
 0x17f   : > { %913 = vmatprep.subr.mxu0 %v875_v7  ;;  %v9240_v7 = vld [vmem:[%s11498_s3 + $0x60] sm:$0xff] }
 0x181   : > { %v10356_v8 = vpop.permute.xlu1 %2177  ;;  %9208 = vmatmul.mubr.msk.f32.vlgmr.msra.gmra.mxu0 %vm574_vm3, %v552_v43  ;;  %v1528_v10 = vpop.permute.xlu0 %1527 }
 0x182   : > { %914 = vmatpush1.msra.mxu0 %v874_v9  ;;  %v1532_v12 = vsel %vm1529_vm8, %v10321_v57, %v1528_v10  ;;  %947 = vmatprep.mubr.f32.mxu0 %v9923_v3 }
 0x183   : > { %9547 = vmatpush3.msra.mxu1 %v1532_v12  ;;  %v9243_v12 = vld [vmem:[%s11498_s3 + $0x68] sm:$0xff] }
 0x184   : > { %9551 = vmatprep.subr.mxu1 %v9923_v3  ;;  %9549 = vmatmul.mubr.msk.f32.vlgmr.msra.gmra.mxu1 %vm574_vm3, %v9222_v11 }
 0x185   : > { %v10369_v13 = vpop.permute.xlu1 %2341  ;;  %v1032_v14 = vpop.permute.xlu0 %1031  ;;  %9211 = vmatmul.mubr.msk.f32.vlgmr.msra.gmra.mxu0 %vm574_vm3, %v9210_v47  ;;  %9553 = vmatprep.mubr.msk.f32.mxu1 %vm9924_vm1, %v9923_v3 }
 0x186   : > { %v1039_v15 = vsel %vm1037_vm5, %v1032_v14, %v10282_v46  ;;  %v1038_v16 = vsel %vm1037_vm5, %v10280_v45, %v1032_v14  ;;  %1111 = vmatprep.mubr.f32.mxu0 %v9923_v3  ;;  %v9231_v46 = vld [vmem:[%s11498_s3 + $0x48] sm:$0xff] }
 0x187   : > { %1077 = vmatprep.subr.mxu0 %v1039_v15 }
 0x188   : > { %1078 = vmatpush1.msra.mxu0 %v1038_v16 }
 0x189   : > { %v10379_v17 = vpop.permute.xlu1 %2505  ;;  %v1196_v18 = vpop.permute.xlu0 %1195  ;;  %9214 = vmatmul.mubr.msk.f32.vlgmr.msra.gmra.mxu0 %vm574_vm3, %v9213_v51 }
 0x18a   : > { %v1203_v19 = vsel %vm1201_vm6, %v1196_v18, %v10295_v50  ;;  %v1202_v20 = vsel %vm1201_vm6, %v10293_v49, %v1196_v18  ;;  %1275 = vmatprep.mubr.f32.mxu0 %v9923_v3  ;;  %v9246_v18 = vld [vmem:[%s11498_s3 + $0x70] sm:$0xff] }
 0x18b   : > { %1241 = vmatprep.subr.mxu0 %v1203_v19 }
 0x18c   : > { %1242 = vmatpush1.msra.mxu0 %v1202_v20 }
 0x18d   : > { %v10387_v21 = vpop.permute.xlu1 %2669  ;;  %v10389_v22 = vpop.permute.xlu0 %2181  ;;  %9217 = vmatmul.mubr.msk.f32.vlgmr.msra.gmra.mxu0 %vm574_vm3, %v9216_v55 }
 0x18e   : > { %1439 = vmatprep.mubr.f32.mxu0 %v9923_v3 }
 0x191   : > { %v10393_v23 = vpop.permute.xlu1 %2833  ;;  %v1692_v24 = vpop.permute.xlu0 %1691 }
 0x192   : > { %v1696_v26 = vsel %vm1693_vm9, %v10335_v60, %v1692_v24 }
 0x193   : > { %9552 = vmatpush3.msra.mxu1 %v1696_v26 }
 0x194   : > { %9556 = vmatprep.subr.mxu1 %v9923_v3  ;;  %9554 = vmatmul.mubr.msk.f32.vlgmr.msra.gmra.mxu1 %vm574_vm3, %v9225_v25 }
 0x195   : > { %v1360_v27 = vpop.permute.xlu1 %1359  ;;  %v10402_v28 = vpop.permute.xlu0 %2345  ;;  %9558 = vmatprep.mubr.msk.f32.mxu1 %vm9924_vm1, %v9923_v3 }
 0x196   : > { %v1367_v29 = vsel %vm1365_vm7, %v1360_v27, %v10307_v53  ;;  %v1366_v30 = vsel %vm1365_vm7, %v10309_v54, %v1360_v27 }
 0x197   : > { %1405 = vmatprep.subr.mxu0 %v1367_v29 }
 0x198   : > { %1406 = vmatpush1.msra.mxu0 %v1366_v30 }
 0x199   : > { %v1524_v31 = vpop.permute.xlu1 %1523  ;;  %9220 = vmatmul.mubr.msk.f32.vlgmr.msra.gmra.mxu0 %vm574_vm3, %v10330_v59  ;;  %v1856_v33 = vpop.permute.xlu0 %1855 }
 0x19a   : > { %v1860_v37 = vsel %vm1857_vm10, %v10341_v62, %v1856_v33  ;;  %v1531_v38 = vsel %vm1529_vm8, %v1524_v31, %v10321_v57  ;;  %v1530_v39 = vsel %vm1529_vm8, %v10323_v58, %v1524_v31  ;;  %1603 = vmatprep.mubr.f32.mxu0 %v9923_v3 }
 0x19b   : > { %1569 = vmatprep.subr.mxu0 %v1531_v38  ;;  %9557 = vmatpush3.msra.mxu1 %v1860_v37 }
 0x19c   : > { %1570 = vmatpush1.msra.mxu0 %v1530_v39  ;;  %9559 = vmatmul.mubr.msk.f32.vlgmr.msra.gmra.mxu1 %vm574_vm3, %v9228_v34 }
 0x19d   : > { %v1688_v40 = vpop.permute.xlu1 %1687  ;;  %9223 = vmatmul.mubr.msk.f32.vlgmr.msra.gmra.mxu0 %vm574_vm3, %v9222_v11  ;;  %v10424_v41 = vpop.permute.xlu0 %2509  ;;  %9561 = vmatprep.subr.mxu1 %v9923_v3 }
 0x19e   : > { %v1695_v42 = vsel %vm1693_vm9, %v1688_v40, %v10335_v60  ;;  %v1694_v43 = vsel %vm1693_vm9, %v10337_v61, %v1688_v40  ;;  %1767 = vmatprep.mubr.f32.mxu0 %v9923_v3  ;;  %9563 = vmatprep.mubr.msk.f32.mxu1 %vm9924_vm1, %v9923_v3 }
 0x19f   : > { %1733 = vmatprep.subr.mxu0 %v1695_v42 }
 0x1a0   : > { %1734 = vmatpush1.msra.mxu0 %v1694_v43 }
 0x1a1   : > { %v1852_v44 = vpop.permute.xlu1 %1851  ;;  %9226 = vmatmul.mubr.msk.f32.vlgmr.msra.gmra.mxu0 %vm574_vm3, %v9225_v25  ;;  %v2020_v45 = vpop.permute.xlu0 %2019 }
 0x1a2   : > { %v2024_v47 = vsel %vm2021_vm11, %v10351_v6, %v2020_v45  ;;  %v1859_v48 = vsel %vm1857_vm10, %v1852_v44, %v10341_v62  ;;  %v1858_v49 = vsel %vm1857_vm10, %v10343_v63, %v1852_v44  ;;  %1931 = vmatprep.mubr.f32.mxu0 %v9923_v3  ;;  %vm3186_vm10 = vcmask 146432  }
 0x1a3   : > { %1897 = vmatprep.subr.mxu0 %v1859_v48  ;;  %9562 = vmatpush3.msra.mxu1 %v2024_v47 }
 0x1a4   : > { %1898 = vmatpush1.msra.mxu0 %v1858_v49  ;;  %9564 = vmatmul.mubr.msk.f32.vlgmr.msra.gmra.mxu1 %vm574_vm3, %v9231_v46 }
 0x1a5   : > { %v2016_v50 = vpop.permute.xlu1 %2015  ;;  %9229 = vmatmul.mubr.msk.f32.vlgmr.msra.gmra.mxu0 %vm574_vm3, %v9228_v34  ;;  %v10447_v51 = vpop.permute.xlu0 %2673  ;;  %9566 = vmatprep.subr.mxu1 %v9923_v3 }
 0x1a6   : > { %v2023_v52 = vsel %vm2021_vm11, %v2016_v50, %v10351_v6  ;;  %v2022_v53 = vsel %vm2021_vm11, %v10345_v0, %v2016_v50  ;;  %2095 = vmatprep.mubr.f32.mxu0 %v9923_v3  ;;  %9568 = vmatprep.mubr.msk.f32.mxu1 %vm9924_vm1, %v9923_v3  ;;  %v9237_v0 = vld [vmem:[%s11498_s3 + $0x58] sm:$0xff]  ;;  %vm3345_vm11 = vcmask 154624  }
 0x1a7   : > { %2061 = vmatprep.subr.mxu0 %v2023_v52 }
 0x1a8   : > { %2062 = vmatpush1.msra.mxu0 %v2022_v53 }
 0x1a9   : > { %v2180_v54 = vpop.permute.xlu1 %2179  ;;  %9232 = vmatmul.mubr.msk.f32.vlgmr.msra.gmra.mxu0 %vm574_vm3, %v9231_v46  ;;  %v2184_v55 = vpop.permute.xlu0 %2183 }
 0x1aa   : > { %v2188_v57 = vsel %vm2185_vm12, %v10389_v22, %v2184_v55  ;;  %v2187_v58 = vsel %vm2185_vm12, %v2180_v54, %v10389_v22  ;;  %v2186_v59 = vsel %vm2185_vm12, %v10356_v8, %v2180_v54  ;;  %2259 = vmatprep.mubr.f32.mxu0 %v9923_v3  ;;  %v9249_v22 = vld [vmem:[%s11498_s3 + $0x78] sm:$0xff]  ;;  %vm3506_vm12 = vcmask 138240  }
 0x1ab   : > { %2225 = vmatprep.subr.mxu0 %v2187_v58  ;;  %9567 = vmatpush3.msra.mxu1 %v2188_v57 }
 0x1ac   : > { %2226 = vmatpush1.msra.mxu0 %v2186_v59  ;;  %9569 = vmatmul.mubr.msk.f32.vlgmr.msra.gmra.mxu1 %vm574_vm3, %v9234_v56 }
 0x1ad   : > { %v2344_v60 = vpop.permute.xlu1 %2343  ;;  %9235 = vmatmul.mubr.msk.f32.vlgmr.msra.gmra.mxu0 %vm574_vm3, %v9234_v56  ;;  %v10467_v61 = vpop.permute.xlu0 %2837  ;;  %9571 = vmatprep.subr.mxu1 %v9923_v3 }
 0x1ae   : > { %v2351_v62 = vsel %vm2349_vm13, %v2344_v60, %v10402_v28  ;;  %v2350_v63 = vsel %vm2349_vm13, %v10369_v13, %v2344_v60  ;;  %2423 = vmatprep.mubr.f32.mxu0 %v9923_v3  ;;  %9573 = vmatprep.mubr.msk.f32.mxu1 %vm9924_vm1, %v9923_v3 }
 0x1af   : > { %2389 = vmatprep.subr.mxu0 %v2351_v62 }
 0x1b0   : > { %2390 = vmatpush1.msra.mxu0 %v2350_v63 }
 0x1b1   : > { %v2508_v1 = vpop.permute.xlu1 %2507  ;;  %9238 = vmatmul.mubr.msk.f32.vlgmr.msra.gmra.mxu0 %vm574_vm3, %v9237_v0  ;;  %v2348_v2 = vpop.permute.xlu0 %2347 }
 0x1b2   : > { %v2352_v4 = vsel %vm2349_vm13, %v10402_v28, %v2348_v2  ;;  %v2515_v5 = vsel %vm2513_vm14, %v2508_v1, %v10424_v41  ;;  %v2514_v6 = vsel %vm2513_vm14, %v10379_v17, %v2508_v1  ;;  %2587 = vmatprep.mubr.f32.mxu0 %v9923_v3  ;;  %vm3670_vm13 = vcmask 7168  }
 0x1b3   : > { %9572 = vmatpush3.msra.mxu1 %v2352_v4  ;;  %2553 = vmatprep.subr.mxu0 %v2515_v5 }
 0x1b4   : > { %9574 = vmatmul.mubr.msk.f32.vlgmr.msra.gmra.mxu1 %vm574_vm3, %v9237_v0  ;;  %2554 = vmatpush1.msra.mxu0 %v2514_v6 }
 0x1b5   : > { %v2672_v8 = vpop.permute.xlu1 %2671  ;;  %9241 = vmatmul.mubr.msk.f32.vlgmr.msra.gmra.mxu0 %vm574_vm3, %v9240_v7  ;;  %v3002_v9 = vpop.permute.xlu0 %3001  ;;  %9576 = vmatprep.subr.mxu1 %v9923_v3 }
 0x1b6   : > { %v2679_v10 = vsel %vm2677_vm15, %v2672_v8, %v10447_v51  ;;  %v2678_v11 = vsel %vm2677_vm15, %v10387_v21, %v2672_v8  ;;  %2751 = vmatprep.mubr.f32.mxu0 %v9923_v3  ;;  %9578 = vmatprep.mubr.msk.f32.mxu1 %vm9924_vm1, %v9923_v3 }
 0x1b7   : > { %2717 = vmatprep.subr.mxu0 %v2679_v10 }
 0x1b8   : > { %2718 = vmatpush1.msra.mxu0 %v2678_v11 }
 0x1b9   : > { %v2836_v13 = vpop.permute.xlu1 %2835  ;;  %9244 = vmatmul.mubr.msk.f32.vlgmr.msra.gmra.mxu0 %vm574_vm3, %v9243_v12  ;;  %v2512_v14 = vpop.permute.xlu0 %2511 }
 0x1ba   : > { %v2516_v15 = vsel %vm2513_vm14, %v10424_v41, %v2512_v14  ;;  %v2843_v16 = vsel %vm2841_vm0, %v2836_v13, %v10467_v61  ;;  %v2842_v17 = vsel %vm2841_vm0, %v10393_v23, %v2836_v13  ;;  %2915 = vmatprep.mubr.f32.mxu0 %v9923_v3  ;;  %vm4144_vm14 = vcmask 908288  }
 0x1bb   : > { %9577 = vmatpush3.msra.mxu1 %v2516_v15  ;;  %2881 = vmatprep.subr.mxu0 %v2843_v16 }
 0x1bc   : > { %9579 = vmatmul.mubr.msk.f32.vlgmr.msra.gmra.mxu1 %vm574_vm3, %v9240_v7  ;;  %2882 = vmatpush1.msra.mxu0 %v2842_v17 }
 0x1bd   : > { %v3000_v19 = vpop.permute.xlu1 %2999  ;;  %9247 = vmatmul.mubr.msk.f32.vlgmr.msra.gmra.mxu0 %vm574_vm3, %v9246_v18  ;;  %9581 = vmatprep.subr.mxu1 %v9923_v3  ;;  %v2840_v24 = vpop.permute.xlu0 %2839 }
 0x1be   : > { %v3007_v20 = vsel %vm3005_vm4, %v3000_v19, %v3002_v9  ;;  %3079 = vmatprep.mubr.f32.mxu0 %v9923_v3  ;;  %9583 = vmatprep.mubr.msk.f32.mxu1 %vm9924_vm1, %v9923_v3  ;;  %v2844_v27 = vsel %vm2841_vm0, %v10467_v61, %v2840_v24 }
 0x1bf   : > { %3045 = vmatprep.subr.mxu0 %v3007_v20 }
 0x1c1   : > { %v2998_v21 = vpop.permute.xlu1 %2997 }
 0x1c2   : > { %v3006_v23 = vsel %vm3005_vm4, %v2998_v21, %v3000_v19 }
 0x1c3   : > { %3046 = vmatpush1.msra.mxu0 %v3006_v23 }
 0x1c4   : > { %9250 = vmatmul.mubr.msk.f32.vlgmr.msra.gmra.mxu0 %vm574_vm3, %v9249_v22 }
 0x1c5   : > { %v2676_v25 = vpop.permute.xlu1 %2675  ;;  %3260 = vmatprep.mubr.f32.mxu0 %v9923_v3 }
 0x1c6   : > { %v2680_v26 = vsel %vm2677_vm15, %v10447_v51, %v2676_v25 }
 0x1c7   : > { %9582 = vmatpush3.msra.mxu1 %v2680_v26 }
 0x1c8   : > { %9584 = vmatmul.mubr.msk.f32.vlgmr.msra.gmra.mxu1 %vm574_vm3, %v9243_v12  ;;  %9586 = vmatprep.subr.mxu1 %v9923_v3 }
 0x1c9   : > { %v3004_v28 = vpop.permute.xlu1 %3003  ;;  %9587 = vmatpush3.msra.mxu1 %v2844_v27  ;;  %9588 = vmatprep.mubr.msk.f32.mxu1 %vm9924_vm1, %v9923_v3 }
 0x1ca   : > { %v3008_v29 = vsel %vm3005_vm4, %v3002_v9, %v3004_v28  ;;  %9591 = vmatprep.subr.mxu1 %v9923_v3 }
 0x1cc   : > { %9589 = vmatmul.mubr.msk.f32.vlgmr.msra.gmra.mxu1 %vm574_vm3, %v9246_v18 }
 0x1cd   : > { %9592 = vmatpush3.msra.mxu1 %v3008_v29  ;;  %9593 = vmatprep.mubr.msk.f32.mxu1 %vm9924_vm1, %v9923_v3 }
 0x1ce   : > { %9596 = vmatprep.subr.mxu1 %v9923_v3 }
 0x1d0   : > { %9594 = vmatmul.mubr.msk.f32.vlgmr.msra.gmra.mxu1 %vm574_vm3, %v9249_v22 }
 0x1d1   : > { %9598 = vmatprep.mubr.msk.f32.mxu1 %vm9924_vm1, %v9923_v3 }
 0x21c   : > { %v715_v30 = vpop.f32.mrf.mxu1 }
 0x21e   : > { %v9520_v31 = vpop.f32.mrf.mxu1 }
 0x220   : > { %v859_v33 = vpop.f32.mrf.mxu1 }
 0x221   : > { %v860_v34 = vadd.f32 %v859_v33, %v715_v30 }
 0x222   : > { %v9525_v37 = vpop.f32.mrf.mxu1 }
 0x224   : > { %v1020_v38 = vpop.f32.mrf.mxu1 }
 0x225   : > { %v1026_v39 = vadd.f32 %v1020_v38, %v860_v34 }
 0x226   : > { %v9530_v40 = vpop.f32.mrf.mxu1 }
 0x228   : > { %v1184_v41 = vpop.f32.mrf.mxu1 }
 0x229   : > { %v1190_v42 = vadd.f32 %v1184_v41, %v1026_v39 }
 0x22a   : > { %v9535_v43 = vpop.f32.mrf.mxu1 }
 0x22c   : > { %v1348_v44 = vpop.f32.mrf.mxu1 }
 0x22d   : > { %v1354_v45 = vadd.f32 %v1348_v44, %v1190_v42 }
 0x22e   : > { %v9540_v46 = vpop.f32.mrf.mxu1 }
 0x230   : > { %v1512_v47 = vpop.f32.mrf.mxu1 }
 0x231   : > { %v1518_v48 = vadd.f32 %v1512_v47, %v1354_v45 }
 0x232   : > { %v9545_v49 = vpop.f32.mrf.mxu1 }
 0x23d   : > { %v644_v50 = vpop.f32.mrf.mxu0 }
 0x23f   : > { %v646_v51 = vpop.f32.mrf.mxu0 }
 0x241   : > { %v788_v52 = vpop.f32.mrf.mxu0 }
 0x242   : > { %v789_v4 = vadd.f32 %v788_v52, %v644_v50 }
 0x243   : > { %v790_v53 = vpop.f32.mrf.mxu0 }
 0x244   : > { %v1676_v54 = vpop.f32.mrf.mxu1  ;;  %v791_v10 = vadd.f32 %v790_v53, %v646_v51 }
 0x245   : > { %v949_v55 = vpop.f32.mrf.mxu0  ;;  %v1682_v42 = vadd.f32 %v1676_v54, %v1518_v48  ;;  %v10556_v54 = vld [vmem:[%s11504_s9] sm:$0xff] }
 0x246   : > { %v9550_v56 = vpop.f32.mrf.mxu1  ;;  %v1024_v8 = vadd.f32 %v949_v55, %v789_v4  ;;  %v3162_v4 = vpop.permute.xlu0 %3161  ;;  %vm378_vm5 = vcmp.gt.f32.partialorder %v10556_v54, 0.0 }
 0x247   : > { %v951_v57 = vpop.f32.mrf.mxu0 }
 0x248   : > { %v1025_v16 = vadd.f32 %v951_v57, %v791_v10 }
 0x249   : > { %v1113_v58 = vpop.f32.mrf.mxu0 }
 0x24a   : > { %v1188_v13 = vadd.f32 %v1113_v58, %v1024_v8 }
 0x24b   : > { %v1115_v59 = vpop.f32.mrf.mxu0 }
 0x24c   : > { %v1189_v20 = vadd.f32 %v1115_v59, %v1025_v16  ;;  %v10568_v16 = vld [vmem:[%s11504_s9 + $0x8] sm:$0xff] }
 0x24d   : > { %v1277_v60 = vpop.f32.mrf.mxu0  ;;  %vm379_vm8 = vcmp.gt.f32.partialorder %v10568_v16, 0.0 }
 0x24e   : > { %v1352_v18 = vadd.f32 %v1277_v60, %v1188_v13 }
 0x24f   : > { %v1279_v62 = vpop.f32.mrf.mxu0 }
 0x250   : > { %v1353_v26 = vadd.f32 %v1279_v62, %v1189_v20 }
 0x254   : > { %v1840_v61 = vpop.f32.mrf.mxu1 }
 0x255   : > { %v1846_v51 = vadd.f32 %v1840_v61, %v1682_v42 }
 0x256   : > { %v9555_v63 = vpop.f32.mrf.mxu1 }
 0x259   : > { %v1441_v0 = vpop.f32.mrf.mxu0 }
 0x25a   : > { %v1516_v23 = vadd.f32 %v1441_v0, %v1352_v18 }
 0x25b   : > { %v1443_v1 = vpop.f32.mrf.mxu0 }
 0x25c   : > { %v2004_v2 = vpop.f32.mrf.mxu1  ;;  %v1517_v30 = vadd.f32 %v1443_v1, %v1353_v26 }
 0x25d   : > { %v1605_v5 = vpop.f32.mrf.mxu0  ;;  %v2010_v59 = vadd.f32 %v2004_v2, %v1846_v51 }
 0x25e   : > { %v9560_v6 = vpop.f32.mrf.mxu1  ;;  %v1680_v28 = vadd.f32 %v1605_v5, %v1516_v23 }
 0x25f   : > { %v1607_v7 = vpop.f32.mrf.mxu0 }
 0x260   : > { %v1681_v39 = vadd.f32 %v1607_v7, %v1517_v30  ;;  %v10615_v30 = vpop.permute.xlu0 %3178 }
 0x261   : > { %v1769_v9 = vpop.f32.mrf.mxu0 }
 0x262   : > { %v1844_v34 = vadd.f32 %v1769_v9, %v1680_v28 }
 0x263   : > { %v1771_v11 = vpop.f32.mrf.mxu0 }
 0x264   : > { %v2168_v12 = vpop.f32.mrf.mxu1  ;;  %v1845_v43 = vadd.f32 %v1771_v11, %v1681_v39 }
 0x265   : > { %v1933_v14 = vpop.f32.mrf.mxu0  ;;  %v2174_v61 = vadd.f32 %v2168_v12, %v2010_v59  ;;  %v3172_v59 = vld [vmem:[%s11499_s4] sm:$0xff] }
 0x266   : > { %v9565_v15 = vpop.f32.mrf.mxu1  ;;  %v2008_v40 = vadd.f32 %v1933_v14, %v1844_v34 }
 0x267   : > { %v1935_v17 = vpop.f32.mrf.mxu0 }
 0x268   : > { %v2009_v46 = vadd.f32 %v1935_v17, %v1845_v43 }
 0x269   : > { %v2097_v19 = vpop.f32.mrf.mxu0 }
 0x26a   : > { %v2172_v44 = vadd.f32 %v2097_v19, %v2008_v40 }
 0x26b   : > { %v2099_v21 = vpop.f32.mrf.mxu0 }
 0x26c   : > { %v2332_v22 = vpop.f32.mrf.mxu1  ;;  %v2173_v52 = vadd.f32 %v2099_v21, %v2009_v46 }
 0x26d   : > { %v2261_v24 = vpop.f32.mrf.mxu0  ;;  %v2338_v8 = vadd.f32 %v2332_v22, %v2174_v61  ;;  %v10577_v22 = vld [vmem:[%s11504_s9 + $0x10] sm:$0xff] }
 0x26e   : > { %v9570_v25 = vpop.f32.mrf.mxu1  ;;  %v2336_v47 = vadd.f32 %v2261_v24, %v2172_v44  ;;  %vm380_vm9 = vcmp.gt.f32.partialorder %v10577_v22, 0.0 }
 0x26f   : > { %v2263_v27 = vpop.f32.mrf.mxu0 }
 0x270   : > { %v2337_v57 = vadd.f32 %v2263_v27, %v2173_v52 }
 0x271   : > { %v2425_v29 = vpop.f32.mrf.mxu0 }
 0x272   : > { %v2500_v53 = vadd.f32 %v2425_v29, %v2336_v47  ;;  %v9252_v29 = vld [vmem:[%s11503_s8 + $0x8] sm:$0xff] }
 0x273   : > { %v2427_v31 = vpop.f32.mrf.mxu0 }
 0x274   : > { %v2496_v33 = vpop.f32.mrf.mxu1  ;;  %v2501_v60 = vadd.f32 %v2427_v31, %v2337_v57  ;;  %v10617_v31 = vpop.permute.xlu0 %3498 }
 0x275   : > { %v2589_v37 = vpop.f32.mrf.mxu0  ;;  %v2502_v11 = vadd.f32 %v2496_v33, %v2338_v8 }
 0x276   : > { %v9575_v38 = vpop.f32.mrf.mxu1  ;;  %v2664_v58 = vadd.f32 %v2589_v37, %v2500_v53 }
 0x277   : > { %v2591_v41 = vpop.f32.mrf.mxu0  ;;  %v10623_v38 = vpop.permute.xlu1 %3337 }
 0x278   : > { %v2665_v0 = vadd.f32 %v2591_v41, %v2501_v60  ;;  %v10619_v33 = vpop.permute.xlu0 %3662 }
 0x279   : > { %v2753_v45 = vpop.f32.mrf.mxu0 }
 0x27a   : > { %v2828_v62 = vadd.f32 %v2753_v45, %v2664_v58 }
 0x27b   : > { %v2755_v49 = vpop.f32.mrf.mxu0 }
 0x27c   : > { %v2660_v50 = vpop.f32.mrf.mxu1  ;;  %v2829_v5 = vadd.f32 %v2755_v49, %v2665_v0 }
 0x27d   : > { %v2917_v55 = vpop.f32.mrf.mxu0  ;;  %v2666_v12 = vadd.f32 %v2660_v50, %v2502_v11  ;;  %v9253_v50 = vld [vmem:[%s11499_s4 + $0x8] sm:$0xff]  ;;  %v9264_v11 = vld [vmem:[%s11499_s4 + $0x20] sm:$0xff] }
 0x27e   : > { %v9580_v56 = vpop.f32.mrf.mxu1  ;;  %v2992_v48 = vadd.f32 %v2917_v55, %v2828_v62 }
 0x27f   : > { %v2919_v63 = vpop.f32.mrf.mxu0 }
 0x280   : > { %v2993_v2 = vadd.f32 %v2919_v63, %v2829_v5  ;;  %v9258_v63 = vld [vmem:[%s11499_s4 + $0x10] sm:$0xff]  ;;  %v9261_v5 = vld [vmem:[%s11499_s4 + $0x18] sm:$0xff] }
 0x284   : > { %v3081_v1 = vpop.f32.mrf.mxu0 }
 0x285   : > { %v3156_v6 = vadd.f32 %v3081_v1, %v2992_v48 }
 0x286   : > { %v3083_v7 = vpop.f32.mrf.mxu0 }
 0x287   : > { %v10559_v9 = vadd.f32 %v3162_v4, %v3156_v6  ;;  %v3157_v13 = vadd.f32 %v3083_v7, %v2993_v2 }
 0x288   : > { %v2824_v10 = vpop.f32.mrf.mxu1 }
 0x289   : > { %v3167_v14 = vsel %vm378_vm5, %v10559_v9, 0.0  ;;  %v10570_v18 = vadd.f32 %v3162_v4, %v3157_v13  ;;  %v2830_v19 = vadd.f32 %v2824_v10, %v2666_v12 }
 0x28a   : > { %v9585_v15 = vpop.f32.mrf.mxu1  ;;  %3500 = vrot.lane.b32.xlu0 %v3167_v14, %s11514_s29 }
 0x28b   : > { %v3168_v24 = vsel %vm379_vm8, %v10570_v18, 0.0 }
 0x28c   : > { %v2988_v17 = vpop.f32.mrf.mxu1 }
 0x28d   : > { %v2994_v21 = vadd.f32 %v2988_v17, %v2830_v19  ;;  %v9270_v17 = vld [vmem:[%s11499_s4 + $0x28] sm:$0xff] }
 0x28e   : > { %v9590_v20 = vpop.f32.mrf.mxu1  ;;  %3664 = vrot.lane.b32.xlu0 %v3167_v14, %s11510_s11 }
 0x290   : > { %v3152_v23 = vpop.f32.mrf.mxu1 }
 0x291   : > { %v3158_v25 = vadd.f32 %v3152_v23, %v2994_v21  ;;  %v9273_v23 = vld [vmem:[%s11499_s4 + $0x30] sm:$0xff] }
 0x292   : > { %v9595_v26 = vpop.f32.mrf.mxu1  ;;  %3341 = vrot.lane.b32.xlu0 %v3168_v24, %s9944_s18 }
 0x293   : > { %v10584_v27 = vadd.f32 %v3162_v4, %v3158_v25 }
 0x295   : > { %v3169_v28 = vsel %vm380_vm9, %v10584_v27, 0.0 }
 0x296   : > { %3184 = vrot.lane.b32.xlu1 %v3169_v28, %s9941_s25  ;;  %3504 = vrot.lane.b32.xlu0 %v3169_v28, %s11514_s29 }
 0x29a   : > { %3343 = vrot.lane.b32.xlu1 %v3169_v28, %s9944_s18  ;;  %3979 = vrot.lane.b32.xlu0 %v3169_v28, %s11520_s12 }
 0x29e   : > { %3668 = vrot.lane.b32.xlu0 %v3169_v28, %s11510_s11  ;;  %3180 = vrot.lane.b32.xlu1 %v3167_v14, %s9941_s25 }
 0x2a2   : > { %4140 = vrot.lane.b32.xlu0 %v3169_v28, %s11512_s20  ;;  %3339 = vrot.lane.b32.xlu1 %v3167_v14, %s9944_s18 }
 0x2a6   : > { %4300 = vrot.lane.b32.xlu0 %v3167_v14, %s9928_s26  ;;  %3182 = vrot.lane.b32.xlu1 %v3168_v24, %s9941_s25 }
 0x2aa   : > { %4302 = vrot.lane.b32.xlu0 %v3168_v24, %s9928_s26  ;;  %3975 = vrot.lane.b32.xlu1 %v3167_v14, %s11520_s12 }
 0x2ae   : > { %4465 = vrot.lane.b32.xlu0 %v3169_v28, %s9929_s28  ;;  %3502 = vrot.lane.b32.xlu1 %v3168_v24, %s11514_s29 }
 0x2b2   : > { %4142 = vrot.lane.b32.xlu0 %v9923_v3, %s11512_s20  ;;  %3666 = vrot.lane.b32.xlu1 %v3168_v24, %s11510_s11 }
 0x2b6   : > { %4136 = vrot.lane.b32.xlu1 %v3167_v14, %s11512_s20 }
 0x2ba   : > { %3977 = vrot.lane.b32.xlu1 %v3168_v24, %s11520_s12 }
 0x2be   : > { %4138 = vrot.lane.b32.xlu1 %v3168_v24, %s11512_s20 }
 0x2c2   : > { %4304 = vrot.lane.b32.xlu1 %v3169_v28, %s9928_s26 }
 0x2c6   : > { %4463 = vrot.lane.b32.xlu1 %v3168_v24, %s9929_s28 }
 0x2ca   : > { %4461 = vrot.lane.b32.xlu1 %v3167_v14, %s9929_s28 }
 0x2ce   : > { %4622 = vperm.xlu1 %9860, %v9252_v29  }
 0x2fc   : > { %v3501_v34 = vpop.permute.xlu0 %3500 }
 0x2fd   : > { %v3507_v4 = vsel %vm3506_vm12, %v10617_v31, %v3501_v34 }
 0x300   : > { %v10621_v37 = vpop.permute.xlu0 %3664 }
 0x301   : > { %v3671_v8 = vsel %vm3670_vm13, %v10619_v33, %v10621_v37 }
 0x304   : > { %v3342_v39 = vpop.permute.xlu0 %3341 }
 0x308   : > { %v3185_v40 = vpop.permute.xlu1 %3184  ;;  %v3505_v41 = vpop.permute.xlu0 %3504 }
 0x30c   : > { %v3344_v42 = vpop.permute.xlu1 %3343  ;;  %v10625_v43 = vpop.permute.xlu0 %3979 }
 0x30d   : > { %v3348_v56 = vsel %vm3345_vm11, %v3342_v39, %v3344_v42  ;;  %v3983_v13 = vsel %vm567_vm2, %v10625_v43, %v10259_v36 }
 0x310   : > { %v3181_v44 = vpop.permute.xlu1 %3180  ;;  %v3669_v45 = vpop.permute.xlu0 %3668 }
 0x311   : > { %v3187_v53 = vsel %vm3186_vm10, %v10615_v30, %v3181_v44 }
 0x314   : > { %v3340_v46 = vpop.permute.xlu1 %3339  ;;  %v10627_v47 = vpop.permute.xlu0 %4140 }
 0x315   : > { %v3347_v58 = vsel %vm3345_vm11, %v3340_v46, %v3342_v39  ;;  %v3346_v60 = vsel %vm3345_vm11, %v10623_v38, %v3340_v46  ;;  %v9279_v39 = vld [vmem:[%s11499_s4 + $0x40] sm:$0xff] }
 0x318   : > { %v3183_v49 = vpop.permute.xlu1 %3182  ;;  %v10636_v55 = vpop.permute.xlu0 %4300 }
 0x319   : > { %v3188_v51 = vsel %vm3186_vm10, %v3181_v44, %v3183_v49  ;;  %v3189_v52 = vsel %vm3186_vm10, %v3183_v49, %v3185_v40 }
 0x31a   : > { %3226 = vmatprep.subr.mxu0 %v3188_v51  ;;  %9597 = vmatpush3.msra.mxu1 %v3189_v52 }
 0x31b   : > { %3227 = vmatpush1.msra.mxu0 %v3187_v53  ;;  %9599 = vmatmul.mubr.msk.f32.vlgmr.msra.gmra.mxu1 %vm574_vm3, %v9253_v50 }
 0x31c   : > { %9601 = vmatprep.subr.mxu1 %v9923_v3  ;;  %v3976_v57 = vpop.permute.xlu1 %3975  ;;  %9254 = vmatmul.mubr.msk.f32.vlgmr.msra.gmra.mxu0 %vm574_vm3, %v9253_v50  ;;  %v10657_v0 = vpop.permute.xlu0 %4302 }
 0x31d   : > { %3385 = vmatprep.subr.mxu0 %v3347_v58  ;;  %9602 = vmatpush3.msra.mxu1 %v3348_v56  ;;  %v4306_v28 = vsel %vm1201_vm6, %v10636_v55, %v10657_v0 }
 0x31e   : > { %3386 = vmatpush1.msra.mxu0 %v3346_v60  ;;  %9603 = vmatprep.mubr.msk.f32.mxu1 %vm9924_vm1, %v9923_v3 }
 0x31f   : > { %3419 = vmatprep.mubr.f32.mxu0 %v9923_v3  ;;  %9604 = vmatmul.mubr.msk.f32.vlgmr.msra.gmra.mxu1 %vm574_vm3, %v3172_v59 }
 0x320   : > { %v3503_v62 = vpop.permute.xlu1 %3502  ;;  %9256 = vmatmul.mubr.msk.f32.vlgmr.msra.gmra.mxu0 %vm574_vm3, %v3172_v59  ;;  %9606 = vmatprep.subr.mxu1 %v9923_v3  ;;  %v4466_v2 = vpop.permute.xlu0 %4465 }
 0x321   : > { %v3508_v48 = vsel %vm3506_vm12, %v3501_v34, %v3503_v62  ;;  %v3509_v1 = vsel %vm3506_vm12, %v3503_v62, %v3505_v41  ;;  %9608 = vmatprep.mubr.msk.f32.mxu1 %vm9924_vm1, %v9923_v3  ;;  %3580 = vmatprep.mubr.f32.mxu0 %v9923_v3  ;;  %v4469_v34 = vsel %vm1365_vm7, %v4466_v2, %v10257_v35 }
 0x322   : > { %3546 = vmatprep.subr.mxu0 %v3508_v48  ;;  %9607 = vmatpush3.msra.mxu1 %v3509_v1 }
 0x323   : > { %3547 = vmatpush1.msra.mxu0 %v3507_v4  ;;  %9609 = vmatmul.mubr.msk.f32.vlgmr.msra.gmra.mxu1 %vm574_vm3, %v9258_v63 }
 0x324   : > { %v3667_v61 = vpop.permute.xlu1 %3666  ;;  %9259 = vmatmul.mubr.msk.f32.vlgmr.msra.gmra.mxu0 %vm574_vm3, %v9258_v63  ;;  %9611 = vmatprep.subr.mxu1 %v9923_v3  ;;  %v10705_v15 = vpop.permute.xlu0 %4142 }
 0x325   : > { %v3672_v6 = vsel %vm3670_vm13, %v10621_v37, %v3667_v61  ;;  %v3673_v7 = vsel %vm3670_vm13, %v3667_v61, %v3669_v45  ;;  %9613 = vmatprep.mubr.msk.f32.mxu1 %vm9924_vm1, %v9923_v3  ;;  %3744 = vmatprep.mubr.f32.mxu0 %v9923_v3 }
 0x326   : > { %3710 = vmatprep.subr.mxu0 %v3672_v6  ;;  %9612 = vmatpush3.msra.mxu1 %v3673_v7 }
 0x327   : > { %3711 = vmatpush1.msra.mxu0 %v3671_v8  ;;  %9614 = vmatmul.mubr.msk.f32.vlgmr.msra.gmra.mxu1 %vm574_vm3, %v9261_v5 }
 0x328   : > { %9616 = vmatprep.subr.mxu1 %v9923_v3  ;;  %v4137_v10 = vpop.permute.xlu1 %4136  ;;  %9262 = vmatmul.mubr.msk.f32.vlgmr.msra.gmra.mxu0 %vm574_vm3, %v9261_v5 }
 0x329   : > { %9265 = vmatprep.subr.msk.mxu0 %vm379_vm8, %v10570_v18  ;;  %9617 = vmatpush3.msk.msra.mxu1 %vm380_vm9, %v10584_v27  ;;  %v4147_v18 = vsel %vm4144_vm14, %v10627_v47, %v10705_v15  ;;  %v9276_v27 = vld [vmem:[%s11499_s4 + $0x38] sm:$0xff] }
 0x32a   : > { %9266 = vmatpush1.msk.msra.mxu0 %vm378_vm5, %v10559_v9  ;;  %9618 = vmatprep.mubr.msk.f32.mxu1 %vm9924_vm1, %v9923_v3 }
 0x32b   : > { %9621 = vmatprep.subr.mxu1 %v9923_v3  ;;  %3893 = vmatprep.mubr.f32.mxu0 %v9923_v3 }
 0x32c   : > { %9619 = vmatmul.mubr.msk.f32.vlgmr.msra.gmra.mxu1 %vm574_vm3, %v9264_v11  ;;  %v3978_v14 = vpop.permute.xlu1 %3977  ;;  %9267 = vmatmul.mubr.msk.f32.vlgmr.msra.gmra.mxu0 %vm574_vm3, %v9264_v11 }
 0x32d   : > { %9622 = vmatpush3.msra.mxu1 %v3983_v13  ;;  %v3982_v9 = vsel %vm567_vm2, %v3978_v14, %v10625_v43  ;;  %9623 = vmatprep.mubr.msk.f32.mxu1 %vm9924_vm1, %v9923_v3  ;;  %v3981_v12 = vsel %vm567_vm2, %v3976_v57, %v3978_v14 }
 0x32e   : > { %4020 = vmatprep.subr.mxu0 %v3982_v9  ;;  %9626 = vmatprep.subr.mxu1 %v9923_v3 }
 0x32f   : > { %4021 = vmatpush1.msra.mxu0 %v3981_v12  ;;  %4054 = vmatprep.mubr.f32.mxu0 %v9923_v3 }
 0x330   : > { %9624 = vmatmul.mubr.msk.f32.vlgmr.msra.gmra.mxu1 %vm574_vm3, %v9270_v17  ;;  %v4139_v19 = vpop.permute.xlu1 %4138  ;;  %9271 = vmatmul.mubr.msk.f32.vlgmr.msra.gmra.mxu0 %vm574_vm3, %v9270_v17 }
 0x331   : > { %9627 = vmatpush3.msra.mxu1 %v4147_v18  ;;  %v4146_v20 = vsel %vm4144_vm14, %v4139_v19, %v10627_v47  ;;  %9628 = vmatprep.mubr.msk.f32.mxu1 %vm9924_vm1, %v9923_v3  ;;  %v4145_v21 = vsel %vm4144_vm14, %v4137_v10, %v4139_v19 }
 0x332   : > { %4184 = vmatprep.subr.mxu0 %v4146_v20  ;;  %4218 = vmatprep.mubr.f32.mxu0 %v9923_v3 }
 0x333   : > { %4185 = vmatpush1.msra.mxu0 %v4145_v21  ;;  %9631 = vmatprep.subr.mxu1 %v9923_v3 }
 0x334   : > { %9629 = vmatmul.mubr.msk.f32.vlgmr.msra.gmra.mxu1 %vm574_vm3, %v9273_v23  ;;  %v4305_v24 = vpop.permute.xlu1 %4304  ;;  %9274 = vmatmul.mubr.msk.f32.vlgmr.msra.gmra.mxu0 %vm574_vm3, %v9273_v23 }
 0x335   : > { %v4307_v25 = vsel %vm1201_vm6, %v10657_v0, %v4305_v24  ;;  %v4308_v26 = vsel %vm1201_vm6, %v4305_v24, %v10249_v32  ;;  %9633 = vmatprep.mubr.msk.f32.mxu1 %vm9924_vm1, %v9923_v3  ;;  %4379 = vmatprep.mubr.f32.mxu0 %v9923_v3 }
 0x336   : > { %4345 = vmatprep.subr.mxu0 %v4307_v25  ;;  %9632 = vmatpush3.msra.mxu1 %v4308_v26 }
 0x337   : > { %4346 = vmatpush1.msra.mxu0 %v4306_v28  ;;  %9636 = vmatprep.subr.mxu1 %v9923_v3 }
 0x338   : > { %9634 = vmatmul.mubr.msk.f32.vlgmr.msra.gmra.mxu1 %vm574_vm3, %v9276_v27  ;;  %v4464_v29 = vpop.permute.xlu1 %4463  ;;  %9277 = vmatmul.mubr.msk.f32.vlgmr.msra.gmra.mxu0 %vm574_vm3, %v9276_v27 }
 0x339   : > { %9637 = vmatpush3.msra.mxu1 %v4469_v34  ;;  %v4468_v37 = vsel %vm1365_vm7, %v4464_v29, %v4466_v2  ;;  %9638 = vmatprep.mubr.msk.f32.mxu1 %vm9924_vm1, %v9923_v3 }
 0x33a   : > { %4506 = vmatprep.subr.mxu0 %v4468_v37  ;;  %4540 = vmatprep.mubr.f32.mxu0 %v9923_v3 }
 0x33b   : > { %9641 = vmatprep.subr.mxu1 %v9923_v3 }
 0x33c   : > { %9639 = vmatmul.mubr.msk.f32.vlgmr.msra.gmra.mxu1 %vm574_vm3, %v9279_v39  ;;  %v4462_v40 = vpop.permute.xlu1 %4461 }
 0x33d   : > { %v4467_v41 = vsel %vm1365_vm7, %v4462_v40, %v4464_v29  ;;  %9643 = vmatprep.mubr.msk.f32.mxu1 %vm9924_vm1, %v9923_v3 }
 0x33e   : > { %4507 = vmatpush1.msra.mxu0 %v4467_v41 }
 0x33f   : > { %9280 = vmatmul.mubr.msk.f32.vlgmr.msra.gmra.mxu0 %vm574_vm3, %v9279_v39 }
 0x340   : > { %4727 = vmatprep.mubr.f32.mxu0 %v9923_v3 }
 0x349   : > { %v4623_v40 = vpop.permute.xlu1 %4622 }
 0x3db   : > { %v3333_v42 = vpop.f32.mrf.mxu1 }
 0x3dc   : > { %v3262_v43 = vpop.f32.mrf.mxu0 }
 0x3dd   : > { %v9600_v44 = vpop.f32.mrf.mxu1 }
 0x3de   : > { %v3264_v45 = vpop.f32.mrf.mxu0 }
 0x3df   : > { %v3492_v46 = vpop.f32.mrf.mxu1 }
 0x3e0   : > { %v3421_v47 = vpop.f32.mrf.mxu0  ;;  %v3493_v1 = vadd.f32 %v3492_v46, %v3333_v42 }
 0x3e1   : > { %v9605_v49 = vpop.f32.mrf.mxu1  ;;  %v3422_v63 = vadd.f32 %v3421_v47, %v3262_v43 }
 0x3e2   : > { %v3423_v50 = vpop.f32.mrf.mxu0 }
 0x3e3   : > { %v3653_v51 = vpop.f32.mrf.mxu1  ;;  %v3424_v6 = vadd.f32 %v3423_v50, %v3264_v45 }
 0x3e4   : > { %v3582_v52 = vpop.f32.mrf.mxu0  ;;  %v3659_v5 = vadd.f32 %v3653_v51, %v3493_v1 }
 0x3e5   : > { %v9610_v53 = vpop.f32.mrf.mxu1  ;;  %v3657_v7 = vadd.f32 %v3582_v52, %v3422_v63 }
 0x3e6   : > { %v3584_v55 = vpop.f32.mrf.mxu0 }
 0x3e7   : > { %v3817_v56 = vpop.f32.mrf.mxu1  ;;  %v3658_v9 = vadd.f32 %v3584_v55, %v3424_v6 }
 0x3e8   : > { %v3746_v57 = vpop.f32.mrf.mxu0  ;;  %v3823_v10 = vadd.f32 %v3817_v56, %v3659_v5 }
 0x3e9   : > { %v9615_v58 = vpop.f32.mrf.mxu1  ;;  %v3821_v12 = vadd.f32 %v3746_v57, %v3657_v7 }
 0x3ea   : > { %v3748_v59 = vpop.f32.mrf.mxu0 }
 0x3eb   : > { %v3822_v20 = vadd.f32 %v3748_v59, %v3658_v9 }
 0x3ec   : > { %v3966_v60 = vpop.f32.mrf.mxu1  ;;  %v3895_v62 = vpop.f32.mrf.mxu0 }
 0x3ed   : > { %v3972_v14 = vadd.f32 %v3966_v60, %v3823_v10  ;;  %v3970_v21 = vadd.f32 %v3895_v62, %v3821_v12 }
 0x3ee   : > { %v9620_v0 = vpop.f32.mrf.mxu1  ;;  %v3897_v48 = vpop.f32.mrf.mxu0 }
 0x3ef   : > { %v3971_v26 = vadd.f32 %v3897_v48, %v3822_v20 }
 0x3f0   : > { %v4127_v4 = vpop.f32.mrf.mxu1  ;;  %v4056_v61 = vpop.f32.mrf.mxu0 }
 0x3f1   : > { %v4133_v19 = vadd.f32 %v4127_v4, %v3972_v14  ;;  %v4131_v27 = vadd.f32 %v4056_v61, %v3970_v21  ;;  %v9282_v4 = vld [vmem:[%s11503_s8 + $0x10] sm:$0xff] }
 0x3f2   : > { %v9625_v8 = vpop.f32.mrf.mxu1  ;;  %v4058_v2 = vpop.f32.mrf.mxu0 }
 0x3f3   : > { %v4132_v34 = vadd.f32 %v4058_v2, %v3971_v26 }
 0x3f4   : > { %v4291_v11 = vpop.f32.mrf.mxu1  ;;  %v4220_v13 = vpop.f32.mrf.mxu0 }
 0x3f5   : > { %v4297_v24 = vadd.f32 %v4291_v11, %v4133_v19  ;;  %v4295_v37 = vadd.f32 %v4220_v13, %v4131_v27  ;;  %v9283_v13 = vld [vmem:[%s11500_s5 + $0x8] sm:$0xff] }
 0x3f6   : > { %v9630_v17 = vpop.f32.mrf.mxu1  ;;  %v4222_v18 = vpop.f32.mrf.mxu0 }
 0x3f7   : > { %v4296_v43 = vadd.f32 %v4222_v18, %v4132_v34  ;;  %v4642_v17 = vld [vmem:[%s11500_s5] sm:$0xff] }
 0x3f8   : > { %v4452_v23 = vpop.f32.mrf.mxu1  ;;  %v4381_v25 = vpop.f32.mrf.mxu0 }
 0x3f9   : > { %v4458_v29 = vadd.f32 %v4452_v23, %v4297_v24  ;;  %v4456_v44 = vadd.f32 %v4381_v25, %v4295_v37  ;;  %v9288_v24 = vld [vmem:[%s11500_s5 + $0x10] sm:$0xff] }
 0x3fa   : > { %v9635_v28 = vpop.f32.mrf.mxu1  ;;  %v4383_v41 = vpop.f32.mrf.mxu0 }
 0x3fb   : > { %v4457_v49 = vadd.f32 %v4383_v41, %v4296_v43  ;;  %v9291_v41 = vld [vmem:[%s11500_s5 + $0x18] sm:$0xff] }
 0x3fc   : > { %v4613_v39 = vpop.f32.mrf.mxu1 }
 0x3fd   : > { %v4619_v42 = vadd.f32 %v4613_v39, %v4458_v29 }
 0x3fe   : > { %v9640_v45 = vpop.f32.mrf.mxu1 }
 0x3ff   : > { %v4627_v46 = vadd.f32 %v4623_v40, %v4619_v42  ;;  %v4542_v47 = vpop.f32.mrf.mxu0 }
 0x400   : > { %v4617_v50 = vadd.f32 %v4542_v47, %v4456_v44 }
 0x401   : > { %vm4630_vm15 = vcmp.ge.f32.partialorder %v4627_v46, 0.0  ;;  %v4633_v51 = vmul.f32 0.2, %v4627_v46  ;;  %v4544_v52 = vpop.f32.mrf.mxu0 }
 0x402   : > { %v4625_v53 = vadd.f32 %v4623_v40, %v4617_v50  ;;  %v4618_v55 = vadd.f32 %v4544_v52, %v4457_v49  ;;  %v9294_v49 = vld [vmem:[%s11500_s5 + $0x20] sm:$0xff] }
 0x403   : > { %v10766_v56 = vsel %vm4630_vm15, %v4627_v46, %v4633_v51 }
 0x404   : > { %v4639_v57 = vsel %vm380_vm9, %v10766_v56, 0.0  ;;  %vm4628_vm0 = vcmp.ge.f32.partialorder %v4625_v53, 0.0  ;;  %v4631_v58 = vmul.f32 0.2, %v4625_v53  ;;  %v4626_v59 = vadd.f32 %v4623_v40, %v4618_v55 }
 0x405   : > { %4808 = vrot.lane.b32.xlu1 %v4639_v57, %s9944_s18  ;;  %4652 = vrot.lane.b32.xlu0 %v4639_v57, %s9941_s25 }
 0x406   : > { %v10773_v60 = vsel %vm4628_vm0, %v4625_v53, %v4631_v58  ;;  %vm4629_vm4 = vcmp.ge.f32.partialorder %v4626_v59, 0.0  ;;  %v4632_v62 = vmul.f32 0.2, %v4626_v59 }
 0x407   : > { %v4637_v63 = vsel %vm378_vm5, %v10773_v60, 0.0 }
 0x408   : > { %v10778_v0 = vsel %vm4629_vm4, %v4626_v59, %v4632_v62  ;;  %v9303_v62 = vld [vmem:[%s11500_s5 + $0x30] sm:$0xff] }
 0x409   : > { %5123 = vrot.lane.b32.xlu1 %v4637_v63, %s11510_s11  ;;  %4966 = vrot.lane.b32.xlu0 %v4639_v57, %s11514_s29  ;;  %v4638_v48 = vsel %vm379_vm8, %v10778_v0, 0.0 }
 0x40d   : > { %4650 = vrot.lane.b32.xlu1 %v4638_v48, %s9941_s25  ;;  %5437 = vrot.lane.b32.xlu0 %v4639_v57, %s11520_s12 }
 0x411   : > { %4806 = vrot.lane.b32.xlu1 %v4638_v48, %s9944_s18  ;;  %4648 = vrot.lane.b32.xlu0 %v4637_v63, %s9941_s25 }
 0x415   : > { %4964 = vrot.lane.b32.xlu1 %v4638_v48, %s11514_s29  ;;  %4804 = vrot.lane.b32.xlu0 %v4637_v63, %s9944_s18 }
 0x419   : > { %5127 = vrot.lane.b32.xlu1 %v4639_v57, %s11510_s11  ;;  %4962 = vrot.lane.b32.xlu0 %v4637_v63, %s11514_s29  ;;  %s11522_s29 = smov 1  }
 0x41d   : > { %5594 = vrot.lane.b32.xlu1 %v4637_v63, %s11512_s20  ;;  %5125 = vrot.lane.b32.xlu0 %v4638_v48, %s11510_s11  ;;  %s374_s11 = scalar_lea.vmem %s11496_s1, %s9795_s30  ;;  %s365_s30 = scalar_lea.vmem [#allocation2], %s9794_s22 }
 0x41e   : > { %v10809_v1 = vld [vmem:[%s374_s11] sm:$0xff]  ;;  %v10816_v61 = vld [vmem:[%s374_s11 + $0x8] sm:$0xff]  ;;  %v10822_v5 = vld [vmem:[%s374_s11 + $0x10] sm:$0xff]  ;;  %s11523_s11 = smov 111  }
 0x421   : > { %5435 = vrot.lane.b32.xlu1 %v4638_v48, %s11520_s12  ;;  %5433 = vrot.lane.b32.xlu0 %v4637_v63, %s11520_s12 }
 0x425   : > { %5596 = vrot.lane.b32.xlu1 %v4638_v48, %s11512_s20  ;;  %5598 = vrot.lane.b32.xlu0 %v4639_v57, %s11512_s20  ;;  %s9796_s20 = smul.u32 384, %s10023_s17 }
 0x427   : > { %s11456_s17 = scalar_lea.hbm %s11505_s10, %s9796_s20 }
 0x429   : > { %5759 = vrot.lane.b32.xlu1 %v4639_v57, %s9928_s26  ;;  %5755 = vrot.lane.b32.xlu0 %v4637_v63, %s9928_s26 }
 0x42d   : > { %5918 = vrot.lane.b32.xlu1 %v4638_v48, %s9929_s28  ;;  %5757 = vrot.lane.b32.xlu0 %v4638_v48, %s9928_s26 }
 0x431   : > { %5916 = vrot.lane.b32.xlu1 %v4637_v63, %s9929_s28  ;;  %5920 = vrot.lane.b32.xlu0 %v4639_v57, %s9929_s28 }
 0x435   : > { %6115 = vrot.lane.b32.xlu1 %v10809_v1, %s9941_s25  ;;  %6077 = vperm.xlu0 %9859, %v9282_v4  }
 0x439   : > { %6284 = vrot.lane.b32.xlu1 %v10809_v1, %s9944_s18  ;;  %6117 = vrot.lane.b32.xlu0 %v10816_v61, %s9941_s25 }
 0x43d   : > { %6119 = vrot.lane.b32.xlu1 %v10822_v5, %s9941_s25  ;;  %6286 = vrot.lane.b32.xlu0 %v10816_v61, %s9944_s18 }
 0x441   : > { %6454 = vrot.lane.b32.xlu1 %v10809_v1, %s11521_s27  ;;  %6456 = vrot.lane.b32.xlu0 %v10816_v61, %s11521_s27 }
 0x445   : > { %6288 = vrot.lane.b32.xlu1 %v10822_v5, %s9944_s18  ;;  %6629 = vrot.lane.b32.xlu0 %v10816_v61, %s11522_s29 }
 0x449   : > { %6627 = vrot.lane.b32.xlu1 %v10809_v1, %s11522_s29  ;;  %6953 = vrot.lane.b32.xlu0 %v10822_v5, %s11520_s12 }
 0x44d   : > { %7126 = vrot.lane.b32.xlu0 %v10822_v5, %s11523_s11  ;;  %6458 = vrot.lane.b32.xlu1 %v10822_v5, %s11521_s27 }
 0x451   : > { %6631 = vrot.lane.b32.xlu1 %v10822_v5, %s11522_s29 }
 0x455   : > { %6951 = vrot.lane.b32.xlu1 %v10816_v61, %s11520_s12 }
 0x459   : > { %6949 = vrot.lane.b32.xlu1 %v10809_v1, %s11520_s12 }
 0x45d   : > { %7124 = vrot.lane.b32.xlu1 %v10816_v61, %s11523_s11 }
 0x461   : > { %7122 = vrot.lane.b32.xlu1 %v10809_v1, %s11523_s11 }
 0x477   : > { %v4809_v6 = vpop.permute.xlu1 %4808  ;;  %v4653_v7 = vpop.permute.xlu0 %4652 }
 0x47b   : > { %v5124_v8 = vpop.permute.xlu1 %5123  ;;  %v4967_v2 = vpop.permute.xlu0 %4966 }
 0x47c   : > { %v5129_v44 = vsel %vm3670_vm13, %v10619_v33, %v5124_v8 }
 0x47f   : > { %v4651_v10 = vpop.permute.xlu1 %4650  ;;  %v10854_v11 = vpop.permute.xlu0 %5437 }
 0x480   : > { %v4656_v14 = vsel %vm3186_vm10, %v4651_v10, %v4653_v7  ;;  %v5441_v50 = vsel %vm567_vm2, %v10854_v11, %v10259_v36  ;;  %v9306_v7 = vld [vmem:[%s11500_s5 + $0x38] sm:$0xff] }
 0x481   : > { %9642 = vmatpush3.msra.mxu1 %v4656_v14  ;;  %v9309_v14 = vld [vmem:[%s11500_s5 + $0x40] sm:$0xff] }
 0x482   : > { %9644 = vmatmul.mubr.msk.f32.vlgmr.msra.gmra.mxu1 %vm574_vm3, %v9283_v13  ;;  %9646 = vmatprep.subr.mxu1 %v9923_v3 }
 0x483   : > { %v4807_v9 = vpop.permute.xlu1 %4806  ;;  %v4649_v12 = vpop.permute.xlu0 %4648  ;;  %9648 = vmatprep.mubr.msk.f32.mxu1 %vm9924_vm1, %v9923_v3 }
 0x484   : > { %v4812_v18 = vsel %vm3345_vm11, %v4807_v9, %v4809_v6  ;;  %v4654_v19 = vsel %vm3186_vm10, %v10615_v30, %v4649_v12  ;;  %v4655_v20 = vsel %vm3186_vm10, %v4649_v12, %v4651_v10 }
 0x485   : > { %4693 = vmatprep.subr.mxu0 %v4655_v20  ;;  %9647 = vmatpush3.msra.mxu1 %v4812_v18 }
 0x486   : > { %4694 = vmatpush1.msra.mxu0 %v4654_v19  ;;  %9649 = vmatmul.mubr.msk.f32.vlgmr.msra.gmra.mxu1 %vm574_vm3, %v4642_v17 }
 0x487   : > { %v4965_v21 = vpop.permute.xlu1 %4964  ;;  %9284 = vmatmul.mubr.msk.f32.vlgmr.msra.gmra.mxu0 %vm574_vm3, %v9283_v13  ;;  %v4805_v23 = vpop.permute.xlu0 %4804  ;;  %9651 = vmatprep.subr.mxu1 %v9923_v3 }
 0x488   : > { %v4970_v25 = vsel %vm3506_vm12, %v4965_v21, %v4967_v2  ;;  %v4810_v26 = vsel %vm3345_vm11, %v10623_v38, %v4805_v23  ;;  %v4811_v27 = vsel %vm3345_vm11, %v4805_v23, %v4807_v9  ;;  %9653 = vmatprep.mubr.msk.f32.mxu1 %vm9924_vm1, %v9923_v3  ;;  %4883 = vmatprep.mubr.f32.mxu0 %v9923_v3 }
 0x489   : > { %4849 = vmatprep.subr.mxu0 %v4811_v27  ;;  %9652 = vmatpush3.msra.mxu1 %v4970_v25 }
 0x48a   : > { %4850 = vmatpush1.msra.mxu0 %v4810_v26  ;;  %9654 = vmatmul.mubr.msk.f32.vlgmr.msra.gmra.mxu1 %vm574_vm3, %v9288_v24 }
 0x48b   : > { %v5128_v28 = vpop.permute.xlu1 %5127  ;;  %9286 = vmatmul.mubr.msk.f32.vlgmr.msra.gmra.mxu0 %vm574_vm3, %v4642_v17  ;;  %v4963_v29 = vpop.permute.xlu0 %4962  ;;  %9656 = vmatprep.subr.mxu1 %v9923_v3 }
 0x48c   : > { %v4968_v34 = vsel %vm3506_vm12, %v10617_v31, %v4963_v29  ;;  %v4969_v37 = vsel %vm3506_vm12, %v4963_v29, %v4965_v21  ;;  %5041 = vmatprep.mubr.f32.mxu0 %v9923_v3  ;;  %9658 = vmatprep.mubr.msk.f32.mxu1 %vm9924_vm1, %v9923_v3 }
 0x48d   : > { %5007 = vmatprep.subr.mxu0 %v4969_v37 }
 0x48e   : > { %5008 = vmatpush1.msra.mxu0 %v4968_v34 }
 0x48f   : > { %v5595_v39 = vpop.permute.xlu1 %5594  ;;  %9289 = vmatmul.mubr.msk.f32.vlgmr.msra.gmra.mxu0 %vm574_vm3, %v9288_v24  ;;  %v5126_v40 = vpop.permute.xlu0 %5125 }
 0x490   : > { %v5131_v42 = vsel %vm3670_vm13, %v5126_v40, %v5128_v28  ;;  %v5130_v43 = vsel %vm3670_vm13, %v5124_v8, %v5126_v40  ;;  %5202 = vmatprep.mubr.f32.mxu0 %v9923_v3 }
 0x491   : > { %5168 = vmatprep.subr.mxu0 %v5130_v43  ;;  %9657 = vmatpush3.msra.mxu1 %v5131_v42 }
 0x492   : > { %5169 = vmatpush1.msra.mxu0 %v5129_v44  ;;  %9659 = vmatmul.mubr.msk.f32.vlgmr.msra.gmra.mxu1 %vm574_vm3, %v9291_v41 }
 0x493   : > { %9661 = vmatprep.subr.mxu1 %v9923_v3  ;;  %v5436_v45 = vpop.permute.xlu1 %5435  ;;  %9292 = vmatmul.mubr.msk.f32.vlgmr.msra.gmra.mxu0 %vm574_vm3, %v9291_v41  ;;  %v5434_v46 = vpop.permute.xlu0 %5433 }
 0x494   : > { %9295 = vmatprep.subr.msk.mxu0 %vm379_vm8, %v10778_v0  ;;  %9662 = vmatpush3.msk.msra.mxu1 %vm380_vm9, %v10766_v56  ;;  %v5440_v47 = vsel %vm567_vm2, %v5436_v45, %v10854_v11  ;;  %v5439_v53 = vsel %vm567_vm2, %v5434_v46, %v5436_v45  ;;  %v9300_v56 = vld [vmem:[%s11500_s5 + $0x28] sm:$0xff] }
 0x495   : > { %9296 = vmatpush1.msk.msra.mxu0 %vm378_vm5, %v10773_v60  ;;  %9663 = vmatprep.mubr.msk.f32.mxu1 %vm9924_vm1, %v9923_v3 }
 0x496   : > { %5478 = vmatprep.subr.mxu0 %v5440_v47  ;;  %9666 = vmatprep.subr.mxu1 %v9923_v3 }
 0x497   : > { %5351 = vmatprep.mubr.f32.mxu0 %v9923_v3  ;;  %9664 = vmatmul.mubr.msk.f32.vlgmr.msra.gmra.mxu1 %vm574_vm3, %v9294_v49  ;;  %v5597_v51 = vpop.permute.xlu1 %5596  ;;  %v5599_v52 = vpop.permute.xlu0 %5598 }
 0x498   : > { %9667 = vmatpush3.msra.mxu1 %v5441_v50  ;;  %9297 = vmatmul.mubr.msk.f32.vlgmr.msra.gmra.mxu0 %vm574_vm3, %v9294_v49  ;;  %v5601_v55 = vsel %vm4144_vm14, %v5597_v51, %v5599_v52  ;;  %v5602_v57 = vsel %vm4144_vm14, %v5599_v52, %v10705_v15  ;;  %v5600_v60 = vsel %vm4144_vm14, %v5595_v39, %v5597_v51 }
 0x499   : > { %5479 = vmatpush1.msra.mxu0 %v5439_v53  ;;  %9668 = vmatprep.mubr.msk.f32.mxu1 %vm9924_vm1, %v9923_v3 }
 0x49a   : > { %5639 = vmatprep.subr.mxu0 %v5601_v55  ;;  %9671 = vmatprep.subr.mxu1 %v9923_v3 }
 0x49b   : > { %5512 = vmatprep.mubr.f32.mxu0 %v9923_v3  ;;  %9669 = vmatmul.mubr.msk.f32.vlgmr.msra.gmra.mxu1 %vm574_vm3, %v9300_v56  ;;  %v5760_v58 = vpop.permute.xlu1 %5759  ;;  %v5756_v59 = vpop.permute.xlu0 %5755 }
 0x49c   : > { %9672 = vmatpush3.msra.mxu1 %v5602_v57  ;;  %9301 = vmatmul.mubr.msk.f32.vlgmr.msra.gmra.mxu0 %vm574_vm3, %v9300_v56  ;;  %v5763_v63 = vsel %vm1201_vm6, %v5760_v58, %v10249_v32 }
 0x49d   : > { %5640 = vmatpush1.msra.mxu0 %v5600_v60  ;;  %9673 = vmatprep.mubr.msk.f32.mxu1 %vm9924_vm1, %v9923_v3 }
 0x49e   : > { %9676 = vmatprep.subr.mxu1 %v9923_v3  ;;  %5673 = vmatprep.mubr.f32.mxu0 %v9923_v3 }
 0x49f   : > { %9674 = vmatmul.mubr.msk.f32.vlgmr.msra.gmra.mxu1 %vm574_vm3, %v9303_v62  ;;  %v5919_v0 = vpop.permute.xlu1 %5918  ;;  %v5758_v48 = vpop.permute.xlu0 %5757 }
 0x4a0   : > { %9677 = vmatpush3.msra.mxu1 %v5763_v63  ;;  %9304 = vmatmul.mubr.msk.f32.vlgmr.msra.gmra.mxu0 %vm574_vm3, %v9303_v62  ;;  %v5761_v4 = vsel %vm1201_vm6, %v5756_v59, %v5758_v48  ;;  %v5762_v6 = vsel %vm1201_vm6, %v5758_v48, %v5760_v58 }
 0x4a1   : > { %5800 = vmatprep.subr.mxu0 %v5762_v6  ;;  %9678 = vmatprep.mubr.msk.f32.mxu1 %vm9924_vm1, %v9923_v3 }
 0x4a2   : > { %5801 = vmatpush1.msra.mxu0 %v5761_v4  ;;  %5834 = vmatprep.mubr.f32.mxu0 %v9923_v3 }
 0x4a3   : > { %9679 = vmatmul.mubr.msk.f32.vlgmr.msra.gmra.mxu1 %vm574_vm3, %v9306_v7  ;;  %v5917_v8 = vpop.permute.xlu1 %5916  ;;  %v5921_v2 = vpop.permute.xlu0 %5920  ;;  %9681 = vmatprep.subr.mxu1 %v9923_v3 }
 0x4a4   : > { %v5922_v10 = vsel %vm1365_vm7, %v5917_v8, %v5919_v0  ;;  %9307 = vmatmul.mubr.msk.f32.vlgmr.msra.gmra.mxu0 %vm574_vm3, %v9306_v7  ;;  %v5924_v11 = vsel %vm1365_vm7, %v5921_v2, %v10257_v35  ;;  %v5923_v13 = vsel %vm1365_vm7, %v5919_v0, %v5921_v2  ;;  %9683 = vmatprep.mubr.msk.f32.mxu1 %vm9924_vm1, %v9923_v3 }
 0x4a5   : > { %5961 = vmatprep.subr.mxu0 %v5923_v13  ;;  %9682 = vmatpush3.msra.mxu1 %v5924_v11 }
 0x4a6   : > { %5962 = vmatpush1.msra.mxu0 %v5922_v10  ;;  %5995 = vmatprep.mubr.f32.mxu0 %v9923_v3 }
 0x4a7   : > { %9684 = vmatmul.mubr.msk.f32.vlgmr.msra.gmra.mxu1 %vm574_vm3, %v9309_v14  ;;  %9686 = vmatprep.subr.mxu1 %v9923_v3  ;;  %v6116_v9 = vpop.permute.xlu1 %6115 }
 0x4a8   : > { %9310 = vmatmul.mubr.msk.f32.vlgmr.msra.gmra.mxu0 %vm574_vm3, %v9309_v14  ;;  %9690 = vmatprep.mubr.msk.f32.mxu1 %vm9924_vm1, %v9923_v3  ;;  %v6124_v23 = vsel %vm3186_vm10, %v10615_v30, %v6116_v9 }
 0x4a9   : > { %6201 = vmatprep.mubr.f32.mxu0 %v9923_v3 }
 0x4ab   : > { %v10980_v12 = vpop.permute.xlu1 %6284 }
 0x4af   : > { %v6120_v18 = vpop.permute.xlu1 %6119 }
 0x4b0   : > { %v10982_v17 = vpop.permute.xlu0 %6077 }
 0x4b4   : > { %v6118_v19 = vpop.permute.xlu0 %6117 }
 0x4b5   : > { %v6126_v20 = vsel %vm3186_vm10, %v6118_v19, %v6120_v18  ;;  %v6125_v21 = vsel %vm3186_vm10, %v6116_v9, %v6118_v19 }
 0x4b6   : > { %6165 = vmatprep.subr.mxu0 %v6125_v21  ;;  %9687 = vmatpush3.msra.mxu1 %v6126_v20 }
 0x4b7   : > { %6166 = vmatpush1.msra.mxu0 %v6124_v23  ;;  %9688 = vmatprep.subr.mxu1 %v9923_v3 }
 0x542   : > { %v4800_v24 = vpop.f32.mrf.mxu1 }
 0x544   : > { %v9645_v25 = vpop.f32.mrf.mxu1 }
 0x546   : > { %v4956_v26 = vpop.f32.mrf.mxu1 }
 0x547   : > { %v4729_v27 = vpop.f32.mrf.mxu0  ;;  %v4957_v56 = vadd.f32 %v4956_v26, %v4800_v24 }
 0x548   : > { %v9650_v28 = vpop.f32.mrf.mxu1 }
 0x549   : > { %v4731_v29 = vpop.f32.mrf.mxu0 }
 0x54a   : > { %v5114_v34 = vpop.f32.mrf.mxu1 }
 0x54b   : > { %v4885_v37 = vpop.f32.mrf.mxu0  ;;  %v5120_v60 = vadd.f32 %v5114_v34, %v4957_v56 }
 0x54c   : > { %v9655_v39 = vpop.f32.mrf.mxu1  ;;  %v4886_v41 = vadd.f32 %v4885_v37, %v4729_v27 }
 0x54d   : > { %v4887_v40 = vpop.f32.mrf.mxu0 }
 0x54e   : > { %v4888_v52 = vadd.f32 %v4887_v40, %v4731_v29 }
 0x54f   : > { %v5043_v42 = vpop.f32.mrf.mxu0 }
 0x550   : > { %v5118_v45 = vadd.f32 %v5043_v42, %v4886_v41 }
 0x551   : > { %v5045_v43 = vpop.f32.mrf.mxu0 }
 0x552   : > { %v5275_v44 = vpop.f32.mrf.mxu1  ;;  %v5119_v62 = vadd.f32 %v5045_v43, %v4888_v52 }
 0x553   : > { %v5204_v46 = vpop.f32.mrf.mxu0  ;;  %v5281_v48 = vadd.f32 %v5275_v44, %v5120_v60 }
 0x554   : > { %v9660_v47 = vpop.f32.mrf.mxu1  ;;  %v5279_v50 = vadd.f32 %v5204_v46, %v5118_v45 }
 0x555   : > { %v5206_v49 = vpop.f32.mrf.mxu0 }
 0x556   : > { %v5280_v8 = vadd.f32 %v5206_v49, %v5119_v62  ;;  %v6287_v62 = vpop.permute.xlu0 %6286 }
 0x557   : > { %v5424_v51 = vpop.f32.mrf.mxu1 }
 0x558   : > { %v5353_v53 = vpop.f32.mrf.mxu0  ;;  %v5430_v2 = vadd.f32 %v5424_v51, %v5281_v48 }
 0x559   : > { %v9665_v55 = vpop.f32.mrf.mxu1  ;;  %v5428_v58 = vadd.f32 %v5353_v53, %v5279_v50 }
 0x55a   : > { %v5355_v57 = vpop.f32.mrf.mxu0 }
 0x55b   : > { %v5585_v59 = vpop.f32.mrf.mxu1  ;;  %v5429_v19 = vadd.f32 %v5355_v57, %v5280_v8  ;;  %v9312_v57 = vld [vmem:[%s11503_s8 + $0x18] sm:$0xff] }
 0x55c   : > { %v5514_v63 = vpop.f32.mrf.mxu0  ;;  %v5591_v13 = vadd.f32 %v5585_v59, %v5430_v2 }
 0x55d   : > { %v9670_v0 = vpop.f32.mrf.mxu1  ;;  %v5589_v6 = vadd.f32 %v5514_v63, %v5428_v58  ;;  %v11046_v58 = vpop.permute.xlu1 %6454 }
 0x55e   : > { %v5516_v4 = vpop.f32.mrf.mxu0  ;;  %v6457_v0 = vpop.permute.xlu0 %6456 }
 0x55f   : > { %v5746_v7 = vpop.f32.mrf.mxu1  ;;  %v5590_v28 = vadd.f32 %v5516_v4, %v5429_v19 }
 0x560   : > { %v5675_v10 = vpop.f32.mrf.mxu0  ;;  %v5752_v20 = vadd.f32 %v5746_v7, %v5591_v13 }
 0x561   : > { %v9675_v11 = vpop.f32.mrf.mxu1  ;;  %v5750_v9 = vadd.f32 %v5675_v10, %v5589_v6  ;;  %v6289_v59 = vpop.permute.xlu1 %6288 }
 0x562   : > { %v5677_v14 = vpop.f32.mrf.mxu0  ;;  %v11052_v4 = vpop.permute.xlu0 %6629 }
 0x563   : > { %v5907_v18 = vpop.f32.mrf.mxu1  ;;  %v5751_v41 = vadd.f32 %v5677_v14, %v5590_v28 }
 0x564   : > { %v5836_v21 = vpop.f32.mrf.mxu0  ;;  %v5913_v24 = vadd.f32 %v5907_v18, %v5752_v20 }
 0x565   : > { %v9680_v23 = vpop.f32.mrf.mxu1  ;;  %v5911_v26 = vadd.f32 %v5836_v21, %v5750_v9  ;;  %v11048_v60 = vpop.permute.xlu1 %6627 }
 0x566   : > { %v5838_v25 = vpop.f32.mrf.mxu0  ;;  %v11056_v7 = vpop.permute.xlu0 %6953 }
 0x567   : > { %v6068_v27 = vpop.f32.mrf.mxu1  ;;  %v5912_v45 = vadd.f32 %v5838_v25, %v5751_v41  ;;  %v6295_v41 = vsel %vm3345_vm11, %v6287_v62, %v6289_v59 }
 0x568   : > { %v6074_v29 = vadd.f32 %v6068_v27, %v5913_v24  ;;  %v5997_v34 = vpop.f32.mrf.mxu0 }
 0x569   : > { %v6072_v37 = vadd.f32 %v5997_v34, %v5911_v26  ;;  %v9685_v39 = vpop.f32.mrf.mxu1  ;;  %v6459_v63 = vpop.permute.xlu1 %6458 }
 0x56a   : > { %v6082_v40 = vadd.f32 %v10982_v17, %v6074_v29  ;;  %v5999_v44 = vpop.f32.mrf.mxu0  ;;  %v11060_v2 = vpop.permute.xlu0 %7126  ;;  %v9313_v29 = vld [vmem:[%s11501_s6 + $0x8] sm:$0xff] }
 0x56b   : > { %v6080_v43 = vadd.f32 %v10982_v17, %v6072_v37  ;;  %v6073_v50 = vadd.f32 %v5999_v44, %v5912_v45  ;;  %v6293_v44 = vsel %vm3345_vm11, %v10623_v38, %v10980_v12 }
 0x56c   : > { %vm6085_vm15 = vcmp.ge.f32.partialorder %v6082_v40, 0.0  ;;  %v6088_v42 = vmul.f32 0.2, %v6082_v40 }
 0x56d   : > { %v6086_v49 = vmul.f32 0.2, %v6080_v43  ;;  %vm6083_vm0 = vcmp.ge.f32.partialorder %v6080_v43, 0.0  ;;  %v6081_v52 = vadd.f32 %v10982_v17, %v6073_v50  ;;  %v11050_v48 = vpop.permute.xlu1 %6631 }
 0x56e   : > { %v10991_v46 = vsel %vm6085_vm15, %v6082_v40, %v6088_v42  ;;  %vm6133_vm15 = vcmask 130048   ;;  %v6294_v42 = vsel %vm3345_vm11, %v10980_v12, %v6287_v62  ;;  %v9318_v62 = vld [vmem:[%s11501_s6 + $0x10] sm:$0xff] }
 0x56f   : > { %v6094_v47 = vsel %vm380_vm9, %v10991_v46, 0.0  ;;  %v10998_v51 = vsel %vm6083_vm0, %v6080_v43, %v6086_v49  ;;  %v6087_v55 = vmul.f32 0.2, %v6081_v52  ;;  %vm6084_vm4 = vcmp.ge.f32.partialorder %v6081_v52, 0.0  ;;  %v6100_v49 = vld [vmem:[%s11501_s6] sm:$0xff] }
 0x570   : > { %6947 = vrot.lane.b32.xlu1 %v6094_v47, %s11520_s12  ;;  %6113 = vrot.lane.b32.xlu0 %v6094_v47, %s9941_s25  ;;  %v6092_v53 = vsel %vm378_vm5, %v10998_v51, 0.0 }
 0x571   : > { %v11008_v56 = vsel %vm6084_vm4, %v6081_v52, %v6087_v55  ;;  %v11054_v6 = vpop.permute.xlu1 %6951  ;;  %v6464_v55 = vsel %vm3506_vm12, %v11046_v58, %v6457_v0 }
 0x572   : > { %v6093_v17 = vsel %vm379_vm8, %v11008_v56, 0.0 }
 0x574   : > { %7120 = vrot.lane.b32.xlu1 %v6094_v47, %s11523_s11  ;;  %6282 = vrot.lane.b32.xlu0 %v6094_v47, %s9944_s18 }
 0x575   : > { %v11058_v8 = vpop.permute.xlu1 %6949 }
 0x578   : > { %6109 = vrot.lane.b32.xlu1 %v6092_v53, %s9941_s25  ;;  %6452 = vrot.lane.b32.xlu0 %v6094_v47, %s11521_s27 }
 0x579   : > { %v11062_v10 = vpop.permute.xlu1 %7124 }
 0x57c   : > { %7297 = vrot.lane.b32.xlu1 %v10816_v61, %s9928_s26  ;;  %6625 = vrot.lane.b32.xlu0 %v6094_v47, %s11522_s29 }
 0x57d   : > { %v11064_v14 = vpop.permute.xlu1 %7122 }
 0x580   : > { %6280 = vrot.lane.b32.xlu1 %v6093_v17, %s9944_s18  ;;  %6278 = vrot.lane.b32.xlu0 %v6092_v53, %s9944_s18 }
 0x584   : > { %6450 = vrot.lane.b32.xlu1 %v6093_v17, %s11521_s27  ;;  %6448 = vrot.lane.b32.xlu0 %v6092_v53, %s11521_s27 }
 0x588   : > { %6623 = vrot.lane.b32.xlu1 %v6093_v17, %s11522_s29  ;;  %6621 = vrot.lane.b32.xlu0 %v6092_v53, %s11522_s29 }
 0x58c   : > { %7295 = vrot.lane.b32.xlu1 %v10809_v1, %s9928_s26  ;;  %6943 = vrot.lane.b32.xlu0 %v6092_v53, %s11520_s12 }
 0x590   : > { %7293 = vrot.lane.b32.xlu1 %v6094_v47, %s9928_s26  ;;  %6111 = vrot.lane.b32.xlu0 %v6093_v17, %s9941_s25 }
 0x594   : > { %7470 = vrot.lane.b32.xlu1 %v10816_v61, %s9929_s28  ;;  %7116 = vrot.lane.b32.xlu0 %v6092_v53, %s11523_s11 }
 0x598   : > { %7468 = vrot.lane.b32.xlu1 %v10809_v1, %s9929_s28  ;;  %7299 = vrot.lane.b32.xlu0 %v10822_v5, %s9928_s26 }
 0x59c   : > { %7466 = vrot.lane.b32.xlu1 %v6094_v47, %s9929_s28  ;;  %7289 = vrot.lane.b32.xlu0 %v6092_v53, %s9928_s26 }
 0x5a0   : > { %7635 = vperm.xlu1 %9860, %v9312_v57   ;;  %7472 = vrot.lane.b32.xlu0 %v10822_v5, %s9929_s28 }
 0x5a4   : > { %6945 = vrot.lane.b32.xlu0 %v6093_v17, %s11520_s12 }
 0x5a8   : > { %7118 = vrot.lane.b32.xlu0 %v6093_v17, %s11523_s11 }
 0x5ac   : > { %7291 = vrot.lane.b32.xlu0 %v6093_v17, %s9928_s26 }
 0x5b0   : > { %7464 = vrot.lane.b32.xlu0 %v6093_v17, %s9929_s28  ;;  %v6463_v17 = vsel %vm3506_vm12, %v10617_v31, %v11046_v58 }
 0x5b4   : > { %7462 = vrot.lane.b32.xlu0 %v6092_v53, %s9929_s28  ;;  %v6465_v53 = vsel %vm3506_vm12, %v6457_v0, %v6459_v63 }
 0x5e2   : > { %v6114_v11 = vpop.permute.xlu0 %6113  ;;  %v11066_v18 = vpop.permute.xlu1 %6947 }
 0x5e6   : > { %v6283_v13 = vpop.permute.xlu0 %6282  ;;  %v11070_v21 = vpop.permute.xlu1 %7120 }
 0x5ea   : > { %v6453_v9 = vpop.permute.xlu0 %6452  ;;  %v6110_v24 = vpop.permute.xlu1 %6109 }
 0x5eb   : > { %v6121_v39 = vsel %vm3186_vm10, %v10615_v30, %v6110_v24 }
 0x5ee   : > { %v11068_v19 = vpop.permute.xlu0 %6625  ;;  %v11076_v27 = vpop.permute.xlu1 %7297 }
 0x5f2   : > { %v6279_v20 = vpop.permute.xlu0 %6278  ;;  %v6281_v40 = vpop.permute.xlu1 %6280 }
 0x5f3   : > { %v6292_v45 = vsel %vm3345_vm11, %v6281_v40, %v6283_v13  ;;  %v6291_v47 = vsel %vm3345_vm11, %v6279_v20, %v6281_v40  ;;  %v6290_v50 = vsel %vm3345_vm11, %v10623_v38, %v6279_v20  ;;  %v6637_v13 = vsel %vm3670_vm13, %v11048_v60, %v11052_v4 }
 0x5f4   : > { %v6636_v20 = vsel %vm3670_vm13, %v10619_v33, %v11048_v60  ;;  %v7130_v40 = vsel %vm4144_vm14, %v11070_v21, %v10705_v15 }
 0x5f6   : > { %v6449_v23 = vpop.permute.xlu0 %6448  ;;  %v6451_v52 = vpop.permute.xlu1 %6450 }
 0x5f7   : > { %v6462_v57 = vsel %vm3506_vm12, %v6451_v52, %v6453_v9  ;;  %v6461_v59 = vsel %vm3506_vm12, %v6449_v23, %v6451_v52  ;;  %v6460_v0 = vsel %vm3506_vm12, %v10617_v31, %v6449_v23 }
 0x5fa   : > { %v11072_v25 = vpop.permute.xlu0 %6621  ;;  %v6624_v58 = vpop.permute.xlu1 %6623 }
 0x5fb   : > { %v6635_v23 = vsel %vm3670_vm13, %v6624_v58, %v11068_v19 }
 0x5fe   : > { %v11074_v26 = vpop.permute.xlu0 %6943  ;;  %v11158_v19 = vpop.permute.xlu1 %7295 }
 0x602   : > { %v6112_v28 = vpop.permute.xlu0 %6111 }
 0x603   : > { %v6123_v34 = vsel %vm3186_vm10, %v6112_v28, %v6114_v11  ;;  %v6122_v37 = vsel %vm3186_vm10, %v6110_v24, %v6112_v28  ;;  %v6638_v11 = vsel %vm3670_vm13, %v11052_v4, %v11050_v48  ;;  %v6634_v48 = vsel %vm3670_vm13, %v11072_v25, %v6624_v58  ;;  %v9321_v4 = vld [vmem:[%s11501_s6 + $0x18] sm:$0xff] }
 0x604   : > { %6167 = vmatprep.subr.mxu0 %v6122_v37  ;;  %9689 = vmatpush3.msra.mxu1 %v6123_v34  ;;  %v6633_v24 = vsel %vm3670_vm13, %v10619_v33, %v11072_v25  ;;  %v9324_v25 = vld [vmem:[%s11501_s6 + $0x20] sm:$0xff]  ;;  %v7131_v37 = vsel %vm4144_vm14, %v11064_v14, %v11062_v10 }
 0x605   : > { %6168 = vmatpush1.msra.mxu0 %v6121_v39  ;;  %9691 = vmatmul.mubr.msk.f32.vlgmr.msra.gmra.mxu1 %vm6133_vm15, %v9313_v29 }
 0x606   : > { %9693 = vmatprep.subr.mxu1 %v9923_v3  ;;  %9314 = vmatmul.mubr.msk.f32.vlgmr.msra.gmra.mxu0 %vm6133_vm15, %v9313_v29  ;;  %v11091_v43 = vpop.permute.xlu0 %7116  ;;  %v6957_v29 = vsel %vm567_vm2, %v11066_v18, %v10259_v36 }
 0x607   : > { %6333 = vmatprep.subr.mxu0 %v6294_v42  ;;  %9694 = vmatpush3.msra.mxu1 %v6295_v41 }
 0x608   : > { %6334 = vmatpush1.msra.mxu0 %v6293_v44  ;;  %9695 = vmatprep.subr.mxu1 %v9923_v3 }
 0x609   : > { %6335 = vmatprep.subr.mxu0 %v6291_v47  ;;  %9696 = vmatpush3.msra.mxu1 %v6292_v45  ;;  %v9336_v47 = vld [vmem:[%s11501_s6 + $0x38] sm:$0xff] }
 0x60a   : > { %9697 = vmatprep.mubr.msk.f32.mxu1 %vm9924_vm1, %v9923_v3  ;;  %6336 = vmatpush1.msra.mxu0 %v6290_v50  ;;  %v11106_v12 = vpop.permute.xlu0 %7299 }
 0x60b   : > { %6369 = vmatprep.mubr.f32.mxu0 %v9923_v3  ;;  %9698 = vmatmul.mubr.msk.f32.vlgmr.msra.gmra.mxu1 %vm6133_vm15, %v6100_v49  ;;  %v7305_v41 = vsel %vm1201_vm6, %v11076_v27, %v11106_v12 }
 0x60c   : > { %9700 = vmatprep.subr.mxu1 %v9923_v3  ;;  %9316 = vmatmul.mubr.msk.f32.vlgmr.msra.gmra.mxu0 %vm6133_vm15, %v6100_v49 }
 0x60d   : > { %6503 = vmatprep.subr.mxu0 %v6464_v55  ;;  %9701 = vmatpush3.msra.mxu1 %v6465_v53 }
 0x60e   : > { %6504 = vmatpush1.msra.mxu0 %v6463_v17  ;;  %9702 = vmatprep.subr.mxu1 %v9923_v3  ;;  %v11124_v63 = vpop.permute.xlu0 %7289 }
 0x60f   : > { %6505 = vmatprep.subr.mxu0 %v6461_v59  ;;  %9703 = vmatpush3.msra.mxu1 %v6462_v57  ;;  %v9339_v57 = vld [vmem:[%s11501_s6 + $0x40] sm:$0xff] }
 0x610   : > { %9704 = vmatprep.mubr.msk.f32.mxu1 %vm9924_vm1, %v9923_v3  ;;  %6506 = vmatpush1.msra.mxu0 %v6460_v0 }
 0x611   : > { %6539 = vmatprep.mubr.f32.mxu0 %v9923_v3  ;;  %9705 = vmatmul.mubr.msk.f32.vlgmr.msra.gmra.mxu1 %vm6133_vm15, %v9318_v62 }
 0x612   : > { %9707 = vmatprep.subr.mxu1 %v9923_v3  ;;  %9319 = vmatmul.mubr.msk.f32.vlgmr.msra.gmra.mxu0 %vm6133_vm15, %v9318_v62  ;;  %v11140_v9 = vpop.permute.xlu0 %7472 }
 0x613   : > { %6676 = vmatprep.subr.mxu0 %v6637_v13  ;;  %9708 = vmatpush3.msra.mxu1 %v6638_v11  ;;  %v7479_v50 = vsel %vm1365_vm7, %v11140_v9, %v10257_v35 }
 0x614   : > { %6677 = vmatpush1.msra.mxu0 %v6636_v20  ;;  %9709 = vmatprep.subr.mxu1 %v9923_v3 }
 0x615   : > { %6678 = vmatprep.subr.mxu0 %v6634_v48  ;;  %9710 = vmatpush3.msra.mxu1 %v6635_v23 }
 0x616   : > { %9711 = vmatprep.mubr.msk.f32.mxu1 %vm9924_vm1, %v9923_v3  ;;  %6679 = vmatpush1.msra.mxu0 %v6633_v24  ;;  %v6946_v60 = vpop.permute.xlu0 %6945 }
 0x617   : > { %6712 = vmatprep.mubr.f32.mxu0 %v9923_v3  ;;  %9712 = vmatmul.mubr.msk.f32.vlgmr.msra.gmra.mxu1 %vm6133_vm15, %v9321_v4  ;;  %v6955_v28 = vsel %vm567_vm2, %v11074_v26, %v6946_v60  ;;  %v7132_v26 = vsel %vm4144_vm14, %v11062_v10, %v11060_v2 }
 0x618   : > { %9714 = vmatprep.subr.mxu1 %v9923_v3  ;;  %9322 = vmatmul.mubr.msk.f32.vlgmr.msra.gmra.mxu0 %vm6133_vm15, %v9321_v4 }
 0x619   : > { %6825 = vmatprep.subr.mxu0 %v10816_v61  ;;  %9715 = vmatpush3.msra.mxu1 %v10822_v5  ;;  %v7294_v61 = vpop.permute.xlu1 %7293  ;;  %v6960_v5 = vsel %vm567_vm2, %v11056_v7, %v10259_v36 }
 0x61a   : > { %6826 = vmatpush1.msra.mxu0 %v10809_v1  ;;  %9716 = vmatprep.subr.mxu1 %v9923_v3  ;;  %v7119_v1 = vpop.permute.xlu0 %7118  ;;  %v7303_v45 = vsel %vm1201_vm6, %v7294_v61, %v10249_v32 }
 0x61b   : > { %9325 = vmatprep.subr.msk.mxu0 %vm379_vm8, %v11008_v56  ;;  %9717 = vmatpush3.msk.msra.mxu1 %vm380_vm9, %v10991_v46  ;;  %v6959_v46 = vsel %vm567_vm2, %v11054_v6, %v11056_v7  ;;  %v6958_v56 = vsel %vm567_vm2, %v11058_v8, %v11054_v6  ;;  %v9330_v7 = vld [vmem:[%s11501_s6 + $0x28] sm:$0xff]  ;;  %v7129_v34 = vsel %vm4144_vm14, %v7119_v1, %v11070_v21 }
 0x61c   : > { %9718 = vmatprep.mubr.msk.f32.mxu1 %vm9924_vm1, %v9923_v3  ;;  %9326 = vmatpush1.msk.msra.mxu0 %vm378_vm5, %v10998_v51  ;;  %v6956_v51 = vsel %vm567_vm2, %v6946_v60, %v11066_v18  ;;  %v7133_v18 = vsel %vm4144_vm14, %v11060_v2, %v10705_v15  ;;  %v7128_v39 = vsel %vm4144_vm14, %v11091_v43, %v7119_v1  ;;  %v9333_v2 = vld [vmem:[%s11501_s6 + $0x30] sm:$0xff] }
 0x61d   : > { %6861 = vmatprep.mubr.f32.mxu0 %v9923_v3  ;;  %9719 = vmatmul.mubr.msk.f32.vlgmr.msra.gmra.mxu1 %vm6133_vm15, %v9324_v25  ;;  %v7471_v8 = vpop.permute.xlu1 %7470  ;;  %v7306_v21 = vsel %vm1201_vm6, %v11106_v12, %v10249_v32  ;;  %v7304_v43 = vsel %vm1201_vm6, %v11158_v19, %v11076_v27 }
 0x61e   : > { %9721 = vmatprep.subr.mxu1 %v9923_v3  ;;  %9327 = vmatmul.mubr.msk.f32.vlgmr.msra.gmra.mxu0 %vm6133_vm15, %v9324_v25  ;;  %v7292_v6 = vpop.permute.xlu0 %7291  ;;  %v7478_v12 = vsel %vm1365_vm7, %v7471_v8, %v11140_v9 }
 0x61f   : > { %6998 = vmatprep.subr.mxu0 %v6959_v46  ;;  %9722 = vmatpush3.msra.mxu1 %v6960_v5  ;;  %v7302_v42 = vsel %vm1201_vm6, %v7292_v6, %v7294_v61  ;;  %v7301_v44 = vsel %vm1201_vm6, %v11124_v63, %v7292_v6 }
 0x620   : > { %6999 = vmatpush1.msra.mxu0 %v6958_v56  ;;  %9723 = vmatprep.subr.mxu1 %v9923_v3 }
 0x621   : > { %7000 = vmatprep.subr.mxu0 %v6956_v51  ;;  %9724 = vmatpush3.msra.mxu1 %v6957_v29  ;;  %v7469_v14 = vpop.permute.xlu1 %7468 }
 0x622   : > { %9725 = vmatprep.mubr.msk.f32.mxu1 %vm9924_vm1, %v9923_v3  ;;  %7001 = vmatpush1.msra.mxu0 %v6955_v28  ;;  %v7465_v10 = vpop.permute.xlu0 %7464  ;;  %v7477_v53 = vsel %vm1365_vm7, %v7469_v14, %v7471_v8 }
 0x623   : > { %7034 = vmatprep.mubr.f32.mxu0 %v9923_v3  ;;  %9726 = vmatmul.mubr.msk.f32.vlgmr.msra.gmra.mxu1 %vm6133_vm15, %v9330_v7 }
 0x624   : > { %9728 = vmatprep.subr.mxu1 %v9923_v3  ;;  %9331 = vmatmul.mubr.msk.f32.vlgmr.msra.gmra.mxu0 %vm6133_vm15, %v9330_v7 }
 0x625   : > { %7171 = vmatprep.subr.mxu0 %v7132_v26  ;;  %9729 = vmatpush3.msra.mxu1 %v7133_v18  ;;  %v7467_v49 = vpop.permute.xlu1 %7466 }
 0x626   : > { %7172 = vmatpush1.msra.mxu0 %v7131_v37  ;;  %9730 = vmatprep.subr.mxu1 %v9923_v3  ;;  %v7463_v27 = vpop.permute.xlu0 %7462  ;;  %v7475_v52 = vsel %vm1365_vm7, %v7465_v10, %v7467_v49  ;;  %v7476_v17 = vsel %vm1365_vm7, %v7467_v49, %v10257_v35 }
 0x627   : > { %7173 = vmatprep.subr.mxu0 %v7129_v34  ;;  %9731 = vmatpush3.msra.mxu1 %v7130_v40  ;;  %v7474_v55 = vsel %vm1365_vm7, %v7463_v27, %v7465_v10 }
 0x628   : > { %9732 = vmatprep.mubr.msk.f32.mxu1 %vm9924_vm1, %v9923_v3  ;;  %7174 = vmatpush1.msra.mxu0 %v7128_v39 }
 0x629   : > { %7207 = vmatprep.mubr.f32.mxu0 %v9923_v3  ;;  %9733 = vmatmul.mubr.msk.f32.vlgmr.msra.gmra.mxu1 %vm6133_vm15, %v9333_v2 }
 0x62a   : > { %9735 = vmatprep.subr.mxu1 %v9923_v3  ;;  %9334 = vmatmul.mubr.msk.f32.vlgmr.msra.gmra.mxu0 %vm6133_vm15, %v9333_v2 }
 0x62b   : > { %7344 = vmatprep.subr.mxu0 %v7305_v41  ;;  %9736 = vmatpush3.msra.mxu1 %v7306_v21 }
 0x62c   : > { %7345 = vmatpush1.msra.mxu0 %v7304_v43  ;;  %9737 = vmatprep.subr.mxu1 %v9923_v3 }
 0x62d   : > { %7346 = vmatprep.subr.mxu0 %v7302_v42  ;;  %9738 = vmatpush3.msra.mxu1 %v7303_v45 }
 0x62e   : > { %9739 = vmatprep.mubr.msk.f32.mxu1 %vm9924_vm1, %v9923_v3  ;;  %7347 = vmatpush1.msra.mxu0 %v7301_v44 }
 0x62f   : > { %7380 = vmatprep.mubr.f32.mxu0 %v9923_v3  ;;  %9740 = vmatmul.mubr.msk.f32.vlgmr.msra.gmra.mxu1 %vm6133_vm15, %v9336_v47 }
 0x630   : > { %9742 = vmatprep.subr.mxu1 %v9923_v3  ;;  %9337 = vmatmul.mubr.msk.f32.vlgmr.msra.gmra.mxu0 %vm6133_vm15, %v9336_v47 }
 0x631   : > { %7517 = vmatprep.subr.mxu0 %v7478_v12  ;;  %9743 = vmatpush3.msra.mxu1 %v7479_v50 }
 0x632   : > { %7518 = vmatpush1.msra.mxu0 %v7477_v53  ;;  %9744 = vmatprep.subr.mxu1 %v9923_v3 }
 0x633   : > { %7519 = vmatprep.subr.mxu0 %v7475_v52  ;;  %9745 = vmatpush3.msra.mxu1 %v7476_v17 }
 0x634   : > { %9746 = vmatprep.mubr.msk.f32.mxu1 %vm9924_vm1, %v9923_v3  ;;  %7520 = vmatpush1.msra.mxu0 %v7474_v55 }
 0x635   : > { %9747 = vmatmul.mubr.msk.f32.vlgmr.msra.gmra.mxu1 %vm6133_vm15, %v9339_v57  ;;  %7553 = vmatprep.mubr.f32.mxu0 %v9923_v3 }
 0x636   : > { %9340 = vmatmul.mubr.msk.f32.vlgmr.msra.gmra.mxu0 %vm6133_vm15, %v9339_v57  ;;  %9749 = vmatprep.subr.mxu1 %v9923_v3 }
 0x637   : > { %9751 = vmatprep.mubr.msk.f32.mxu1 %vm9924_vm1, %v9923_v3  ;;  %7740 = vmatprep.mubr.f32.mxu0 %v9923_v3 }
 0x6c5   : > { %v6274_v59 = vpop.f32.mrf.mxu1 }
 0x6c6   : > { %v6203_v62 = vpop.f32.mrf.mxu0 }
 0x6c7   : > { %v9692_v63 = vpop.f32.mrf.mxu1 }
 0x6c8   : > { %v6205_v0 = vpop.f32.mrf.mxu0 }
 0x6cb   : > { %v6442_v58 = vpop.f32.mrf.mxu1 }
 0x6cc   : > { %v6371_v11 = vpop.f32.mrf.mxu0  ;;  %v6443_v7 = vadd.f32 %v6442_v58, %v6274_v59 }
 0x6cd   : > { %v9699_v13 = vpop.f32.mrf.mxu1  ;;  %v6372_v6 = vadd.f32 %v6371_v11, %v6203_v62 }
 0x6ce   : > { %v6373_v9 = vpop.f32.mrf.mxu0 }
 0x6cf   : > { %v6374_v34 = vadd.f32 %v6373_v9, %v6205_v0  ;;  %v7636_v0 = vpop.permute.xlu1 %7635 }
 0x6d1   : > { %v6612_v20 = vpop.f32.mrf.mxu1 }
 0x6d2   : > { %v6541_v23 = vpop.f32.mrf.mxu0  ;;  %v6618_v18 = vadd.f32 %v6612_v20, %v6443_v7 }
 0x6d3   : > { %v9706_v48 = vpop.f32.mrf.mxu1  ;;  %v6616_v37 = vadd.f32 %v6541_v23, %v6372_v6 }
 0x6d4   : > { %v6543_v4 = vpop.f32.mrf.mxu0 }
 0x6d5   : > { %v6617_v10 = vadd.f32 %v6543_v4, %v6374_v34 }
 0x6d7   : > { %v6785_v24 = vpop.f32.mrf.mxu1 }
 0x6d8   : > { %v6714_v60 = vpop.f32.mrf.mxu0  ;;  %v6791_v40 = vadd.f32 %v6785_v24, %v6618_v18 }
 0x6d9   : > { %v9713_v19 = vpop.f32.mrf.mxu1  ;;  %v6789_v14 = vadd.f32 %v6714_v60, %v6616_v37 }
 0x6da   : > { %v6716_v25 = vpop.f32.mrf.mxu0 }
 0x6db   : > { %v6790_v41 = vadd.f32 %v6716_v25, %v6617_v10 }
 0x6dd   : > { %v6934_v1 = vpop.f32.mrf.mxu1 }
 0x6de   : > { %v6863_v61 = vpop.f32.mrf.mxu0  ;;  %v6940_v21 = vadd.f32 %v6934_v1, %v6791_v40 }
 0x6df   : > { %v9720_v5 = vpop.f32.mrf.mxu1  ;;  %v6938_v42 = vadd.f32 %v6863_v61, %v6789_v14  ;;  %v7655_v14 = vld [vmem:[%s11502_s7] sm:$0xff] }
 0x6e0   : > { %v6865_v46 = vpop.f32.mrf.mxu0 }
 0x6e1   : > { %v6939_v47 = vadd.f32 %v6865_v46, %v6790_v41 }
 0x6e3   : > { %v7107_v51 = vpop.f32.mrf.mxu1 }
 0x6e4   : > { %v7036_v56 = vpop.f32.mrf.mxu0  ;;  %v7113_v44 = vadd.f32 %v7107_v51, %v6940_v21 }
 0x6e5   : > { %v9727_v28 = vpop.f32.mrf.mxu1  ;;  %v7111_v27 = vadd.f32 %v7036_v56, %v6938_v42  ;;  %v9342_v56 = vld [vmem:[%s11503_s8 + $0x20] sm:$0xff] }
 0x6e6   : > { %v7038_v29 = vpop.f32.mrf.mxu0 }
 0x6e7   : > { %v7112_v12 = vadd.f32 %v7038_v29, %v6939_v47 }
 0x6e9   : > { %v7280_v8 = vpop.f32.mrf.mxu1 }
 0x6ea   : > { %v7209_v26 = vpop.f32.mrf.mxu0  ;;  %v7286_v50 = vadd.f32 %v7280_v8, %v7113_v44 }
 0x6eb   : > { %v9734_v39 = vpop.f32.mrf.mxu1  ;;  %v7284_v52 = vadd.f32 %v7209_v26, %v7111_v27  ;;  %v9343_v26 = vld [vmem:[%s11502_s7 + $0x8] sm:$0xff]  ;;  %v9348_v27 = vld [vmem:[%s11502_s7 + $0x10] sm:$0xff] }
 0x6ec   : > { %v7211_v2 = vpop.f32.mrf.mxu0 }
 0x6ed   : > { %v7285_v17 = vadd.f32 %v7211_v2, %v7112_v12 }
 0x6ef   : > { %v7453_v43 = vpop.f32.mrf.mxu1 }
 0x6f0   : > { %v7382_v45 = vpop.f32.mrf.mxu0  ;;  %v7459_v53 = vadd.f32 %v7453_v43, %v7286_v50 }
 0x6f1   : > { %v9741_v49 = vpop.f32.mrf.mxu1  ;;  %v7457_v57 = vadd.f32 %v7382_v45, %v7284_v52 }
 0x6f2   : > { %v7384_v55 = vpop.f32.mrf.mxu0 }
 0x6f3   : > { %v7458_v58 = vadd.f32 %v7384_v55, %v7285_v17 }
 0x6f5   : > { %v7626_v59 = vpop.f32.mrf.mxu1 }
 0x6f6   : > { %v7632_v62 = vadd.f32 %v7626_v59, %v7459_v53  ;;  %v7555_v63 = vpop.f32.mrf.mxu0 }
 0x6f7   : > { %v9748_v11 = vpop.f32.mrf.mxu1  ;;  %v7630_v13 = vadd.f32 %v7555_v63, %v7457_v57 }
 0x6f8   : > { %v7640_v9 = vadd.f32 %v7636_v0, %v7632_v62  ;;  %v7557_v20 = vpop.f32.mrf.mxu0 }
 0x6f9   : > { %v7638_v23 = vadd.f32 %v7636_v0, %v7630_v13  ;;  %v7631_v48 = vadd.f32 %v7557_v20, %v7458_v58  ;;  %v9360_v58 = vld [vmem:[%s11502_s7 + $0x28] sm:$0xff] }
 0x6fa   : > { %vm7643_vm0 = vcmp.ge.f32.partialorder %v7640_v9, 0.0  ;;  %v7646_v4 = vmul.f32 0.2, %v7640_v9 }
 0x6fb   : > { %vm7641_vm4 = vcmp.ge.f32.partialorder %v7638_v23, 0.0  ;;  %v7644_v24 = vmul.f32 0.2, %v7638_v23  ;;  %v7639_v60 = vadd.f32 %v7636_v0, %v7631_v48 }
 0x6fc   : > { %v11285_v19 = vsel %vm7643_vm0, %v7640_v9, %v7646_v4 }
 0x6fd   : > { %v7652_v25 = vsel %vm380_vm9, %v11285_v19, 0.0  ;;  %v11290_v1 = vsel %vm7641_vm4, %v7638_v23, %v7644_v24  ;;  %v7645_v61 = vmul.f32 0.2, %v7639_v60  ;;  %vm7642_vm15 = vcmp.ge.f32.partialorder %v7639_v60, 0.0  ;;  %v9363_v23 = vld [vmem:[%s11502_s7 + $0x30] sm:$0xff] }
 0x6fe   : > { %7821 = vrot.lane.b32.xlu1 %v7652_v25, %s9944_s18  ;;  %7665 = vrot.lane.b32.xlu0 %v7652_v25, %s9941_s25  ;;  %v7650_v5 = vsel %vm378_vm5, %v11290_v1, 0.0 }
 0x6ff   : > { %v11297_v46 = vsel %vm7642_vm15, %v7639_v60, %v7645_v61 }
 0x700   : > { %v7651_v51 = vsel %vm379_vm8, %v11297_v46, 0.0 }
 0x702   : > { %7817 = vrot.lane.b32.xlu1 %v7650_v5, %s9944_s18  ;;  %7979 = vrot.lane.b32.xlu0 %v7652_v25, %s11521_s27 }
 0x706   : > { %7663 = vrot.lane.b32.xlu1 %v7651_v51, %s9941_s25  ;;  %7661 = vrot.lane.b32.xlu0 %v7650_v5, %s9941_s25  ;;  %s9126_s25 = sshll.u32 %s365_s30, 4  ;;  %s9127_s25 = int_to_ptr.vmem [resolvable:$true] %s9126_s25 }
 0x70a   : > { %8136 = vrot.lane.b32.xlu1 %v7650_v5, %s11522_s29  ;;  %7975 = vrot.lane.b32.xlu0 %v7650_v5, %s11521_s27 }
 0x70e   : > { %7977 = vrot.lane.b32.xlu1 %v7651_v51, %s11521_s27  ;;  %7819 = vrot.lane.b32.xlu0 %v7651_v51, %s9944_s18  ;;  %s9112_s27 = scalar_lea.sflag [#allocation3], %s363_s21 }
 0x712   : > { %8140 = vrot.lane.b32.xlu1 %v7652_v25, %s11522_s29  ;;  %8446 = vrot.lane.b32.xlu0 %v7650_v5, %s11520_s12 }
 0x716   : > { %8450 = vrot.lane.b32.xlu1 %v7652_v25, %s11520_s12  ;;  %8138 = vrot.lane.b32.xlu0 %v7651_v51, %s11522_s29 }
 0x71a   : > { %8607 = vrot.lane.b32.xlu1 %v7650_v5, %s11523_s11  ;;  %8611 = vrot.lane.b32.xlu0 %v7652_v25, %s11523_s11 }
 0x71e   : > { %8609 = vrot.lane.b32.xlu1 %v7651_v51, %s11523_s11  ;;  %8448 = vrot.lane.b32.xlu0 %v7651_v51, %s11520_s12 }
 0x722   : > { %8772 = vrot.lane.b32.xlu1 %v7652_v25, %s9928_s26  ;;  %8768 = vrot.lane.b32.xlu0 %v7650_v5, %s9928_s26 }
 0x726   : > { %8931 = vrot.lane.b32.xlu1 %v7651_v51, %s9929_s28  ;;  %8770 = vrot.lane.b32.xlu0 %v7651_v51, %s9928_s26  ;;  %s9861_s26 = scalar_lea.vmem %s9127_s25, 384 }
 0x727   : > { %p9862_p11 = scmp.ne.s32.totalorder %s9127_s25, %s9861_s26 }
 0x729   : > { %p9863_p12 = pnand %p9862_p11, %p10040_p5 }
 0x72a   : > { %8929 = vrot.lane.b32.xlu1 %v7650_v5, %s9929_s28  ;;  %8933 = vrot.lane.b32.xlu0 %v7652_v25, %s9929_s28  ;;  %s9946_s28 = smov [#allocation2]  }
 0x72b   : > { %p9864_p13 = pneg %p9863_p12  ;;  %s9865_s29 = sshll.u32 %s9946_s28, 4  ;;  %s9866_s29 = int_to_ptr.vmem [resolvable:$false] %s9865_s29 }
 0x72c   : > { %s9867_s11 = scalar_lea.vmem %s9866_s29, 768  ;;  %p9868_p0 = scmp.lt.s32.totalorder %s9127_s25, %s9866_s29 }
 0x72d   : > { %p9869_p1 = scmp.lt.s32.totalorder %s9867_s11, %s9861_s26 }
 0x72e   : > { %9090 = vperm.xlu0 %9859, %v9342_v56  }
 0x72f   : > { %p9870_p2 = por %p9869_p1, %p9868_p0 }
 0x731   : > { %p9871_p3 = pnand %p9870_p2, %p9864_p13 }
 0x770   : > { %v7822_v28 = vpop.permute.xlu1 %7821  ;;  %v7666_v29 = vpop.permute.xlu0 %7665 }
 0x774   : > { %v7818_v7 = vpop.permute.xlu1 %7817  ;;  %v7980_v6 = vpop.permute.xlu0 %7979 }
 0x775   : > { %v7823_v42 = vsel %vm3345_vm11, %v10623_v38, %v7818_v7 }
 0x778   : > { %v7664_v8 = vpop.permute.xlu1 %7663  ;;  %v7662_v18 = vpop.permute.xlu0 %7661 }
 0x779   : > { %v7669_v34 = vsel %vm3186_vm10, %v7664_v8, %v7666_v29  ;;  %v7667_v37 = vsel %vm3186_vm10, %v10615_v30, %v7662_v18  ;;  %v7668_v39 = vsel %vm3186_vm10, %v7662_v18, %v7664_v8 }
 0x77a   : > { %7706 = vmatprep.subr.mxu0 %v7668_v39  ;;  %9750 = vmatpush3.msra.mxu1 %v7669_v34 }
 0x77b   : > { %7707 = vmatpush1.msra.mxu0 %v7667_v37  ;;  %9752 = vmatmul.mubr.msk.f32.vlgmr.msra.gmra.mxu1 %vm574_vm3, %v9343_v26 }
 0x77c   : > { %v8137_v40 = vpop.permute.xlu1 %8136  ;;  %v7976_v2 = vpop.permute.xlu0 %7975  ;;  %9344 = vmatmul.mubr.msk.f32.vlgmr.msra.gmra.mxu0 %vm574_vm3, %v9343_v26  ;;  %9754 = vmatprep.subr.mxu1 %v9923_v3 }
 0x77d   : > { %9756 = vmatprep.mubr.msk.f32.mxu1 %vm9924_vm1, %v9923_v3  ;;  %7896 = vmatprep.mubr.f32.mxu0 %v9923_v3  ;;  %v7981_v38 = vsel %vm3506_vm12, %v10617_v31, %v7976_v2  ;;  %v9351_v31 = vld [vmem:[%s11502_s7 + $0x18] sm:$0xff]  ;;  %v8142_v53 = vsel %vm3670_vm13, %v10619_v33, %v8137_v40  ;;  %v9354_v33 = vld [vmem:[%s11502_s7 + $0x20] sm:$0xff] }
 0x780   : > { %v7978_v10 = vpop.permute.xlu1 %7977  ;;  %v7820_v30 = vpop.permute.xlu0 %7819 }
 0x781   : > { %v7825_v21 = vsel %vm3345_vm11, %v7820_v30, %v7822_v28  ;;  %v7824_v41 = vsel %vm3345_vm11, %v7818_v7, %v7820_v30  ;;  %v7983_v43 = vsel %vm3506_vm12, %v7978_v10, %v7980_v6  ;;  %v7982_v45 = vsel %vm3506_vm12, %v7976_v2, %v7978_v10 }
 0x782   : > { %7862 = vmatprep.subr.mxu0 %v7824_v41  ;;  %9755 = vmatpush3.msra.mxu1 %v7825_v21 }
 0x783   : > { %7863 = vmatpush1.msra.mxu0 %v7823_v42  ;;  %9757 = vmatmul.mubr.msk.f32.vlgmr.msra.gmra.mxu1 %vm574_vm3, %v7655_v14 }
 0x784   : > { %9759 = vmatprep.subr.mxu1 %v9923_v3  ;;  %v8141_v44 = vpop.permute.xlu1 %8140  ;;  %9346 = vmatmul.mubr.msk.f32.vlgmr.msra.gmra.mxu0 %vm574_vm3, %v7655_v14  ;;  %v8447_v47 = vpop.permute.xlu0 %8446 }
 0x785   : > { %8020 = vmatprep.subr.mxu0 %v7982_v45  ;;  %9760 = vmatpush3.msra.mxu1 %v7983_v43 }
 0x786   : > { %8021 = vmatpush1.msra.mxu0 %v7981_v38  ;;  %9761 = vmatprep.mubr.msk.f32.mxu1 %vm9924_vm1, %v9923_v3 }
 0x787   : > { %8054 = vmatprep.mubr.f32.mxu0 %v9923_v3  ;;  %9762 = vmatmul.mubr.msk.f32.vlgmr.msra.gmra.mxu1 %vm574_vm3, %v9348_v27 }
 0x788   : > { %v8451_v49 = vpop.permute.xlu1 %8450  ;;  %9349 = vmatmul.mubr.msk.f32.vlgmr.msra.gmra.mxu0 %vm574_vm3, %v9348_v27  ;;  %v8139_v50 = vpop.permute.xlu0 %8138  ;;  %9764 = vmatprep.subr.mxu1 %v9923_v3 }
 0x789   : > { %v8144_v12 = vsel %vm3670_vm13, %v8139_v50, %v8141_v44  ;;  %v8143_v52 = vsel %vm3670_vm13, %v8137_v40, %v8139_v50  ;;  %9766 = vmatprep.mubr.msk.f32.mxu1 %vm9924_vm1, %v9923_v3  ;;  %8215 = vmatprep.mubr.f32.mxu0 %v9923_v3  ;;  %v8454_v57 = vsel %vm567_vm2, %v8451_v49, %v10259_v36 }
 0x78a   : > { %8181 = vmatprep.subr.mxu0 %v8143_v52  ;;  %9765 = vmatpush3.msra.mxu1 %v8144_v12 }
 0x78b   : > { %8182 = vmatpush1.msra.mxu0 %v8142_v53  ;;  %9767 = vmatmul.mubr.msk.f32.vlgmr.msra.gmra.mxu1 %vm574_vm3, %v9351_v31 }
 0x78c   : > { %9769 = vmatprep.subr.mxu1 %v9923_v3  ;;  %v8608_v55 = vpop.permute.xlu1 %8607  ;;  %9352 = vmatmul.mubr.msk.f32.vlgmr.msra.gmra.mxu0 %vm574_vm3, %v9351_v31  ;;  %v8612_v17 = vpop.permute.xlu0 %8611 }
 0x78d   : > { %9355 = vmatprep.subr.msk.mxu0 %vm379_vm8, %v11297_v46  ;;  %9770 = vmatpush3.msk.msra.mxu1 %vm380_vm9, %v11285_v19  ;;  %v8615_v36 = vsel %vm4144_vm14, %v8612_v17, %v10705_v15  ;;  %v9369_v46 = vld [vmem:[%s11502_s7 + $0x40] sm:$0xff] }
 0x78e   : > { %9356 = vmatpush1.msk.msra.mxu0 %vm378_vm5, %v11290_v1  ;;  %9771 = vmatprep.mubr.msk.f32.mxu1 %vm9924_vm1, %v9923_v3 }
 0x78f   : > { %9774 = vmatprep.subr.mxu1 %v9923_v3  ;;  %8364 = vmatprep.mubr.f32.mxu0 %v9923_v3 }
 0x790   : > { %9772 = vmatmul.mubr.msk.f32.vlgmr.msra.gmra.mxu1 %vm574_vm3, %v9354_v33  ;;  %v8610_v59 = vpop.permute.xlu1 %8609  ;;  %9357 = vmatmul.mubr.msk.f32.vlgmr.msra.gmra.mxu0 %vm574_vm3, %v9354_v33  ;;  %v8449_v62 = vpop.permute.xlu0 %8448 }
 0x791   : > { %9775 = vmatpush3.msra.mxu1 %v8454_v57  ;;  %v8452_v63 = vsel %vm567_vm2, %v8447_v47, %v8449_v62  ;;  %v8453_v0 = vsel %vm567_vm2, %v8449_v62, %v8451_v49  ;;  %9776 = vmatprep.mubr.msk.f32.mxu1 %vm9924_vm1, %v9923_v3  ;;  %v8614_v13 = vsel %vm4144_vm14, %v8610_v59, %v8612_v17 }
 0x792   : > { %8491 = vmatprep.subr.mxu0 %v8453_v0  ;;  %9779 = vmatprep.subr.mxu1 %v9923_v3  ;;  %v8613_v20 = vsel %vm4144_vm14, %v8608_v55, %v8610_v59 }
 0x793   : > { %8492 = vmatpush1.msra.mxu0 %v8452_v63  ;;  %8525 = vmatprep.mubr.f32.mxu0 %v9923_v3 }
 0x794   : > { %9777 = vmatmul.mubr.msk.f32.vlgmr.msra.gmra.mxu1 %vm574_vm3, %v9360_v58  ;;  %v8773_v11 = vpop.permute.xlu1 %8772  ;;  %9361 = vmatmul.mubr.msk.f32.vlgmr.msra.gmra.mxu0 %vm574_vm3, %v9360_v58  ;;  %v8769_v9 = vpop.permute.xlu0 %8768 }
 0x795   : > { %9780 = vmatpush3.msra.mxu1 %v8615_v36  ;;  %8652 = vmatprep.subr.mxu0 %v8614_v13  ;;  %v8776_v48 = vsel %vm1201_vm6, %v8773_v11, %v10249_v32  ;;  %v9366_v32 = vld [vmem:[%s11502_s7 + $0x38] sm:$0xff] }
 0x796   : > { %8653 = vmatpush1.msra.mxu0 %v8613_v20  ;;  %9781 = vmatprep.mubr.msk.f32.mxu1 %vm9924_vm1, %v9923_v3 }
 0x797   : > { %9784 = vmatprep.subr.mxu1 %v9923_v3  ;;  %8686 = vmatprep.mubr.f32.mxu0 %v9923_v3 }
 0x798   : > { %9782 = vmatmul.mubr.msk.f32.vlgmr.msra.gmra.mxu1 %vm574_vm3, %v9363_v23  ;;  %v8932_v15 = vpop.permute.xlu1 %8931  ;;  %9364 = vmatmul.mubr.msk.f32.vlgmr.msra.gmra.mxu0 %vm574_vm3, %v9363_v23  ;;  %v8771_v4 = vpop.permute.xlu0 %8770 }
 0x799   : > { %9785 = vmatpush3.msra.mxu1 %v8776_v48  ;;  %v8774_v24 = vsel %vm1201_vm6, %v8769_v9, %v8771_v4  ;;  %v8775_v60 = vsel %vm1201_vm6, %v8771_v4, %v8773_v11  ;;  %9786 = vmatprep.mubr.msk.f32.mxu1 %vm9924_vm1, %v9923_v3 }
 0x79a   : > { %8813 = vmatprep.subr.mxu0 %v8775_v60  ;;  %8847 = vmatprep.mubr.f32.mxu0 %v9923_v3 }
 0x79b   : > { %8814 = vmatpush1.msra.mxu0 %v8774_v24  ;;  %9789 = vmatprep.subr.mxu1 %v9923_v3 }
 0x79c   : > { %9787 = vmatmul.mubr.msk.f32.vlgmr.msra.gmra.mxu1 %vm574_vm3, %v9366_v32  ;;  %v8930_v19 = vpop.permute.xlu1 %8929  ;;  %9367 = vmatmul.mubr.msk.f32.vlgmr.msra.gmra.mxu0 %vm574_vm3, %v9366_v32  ;;  %v8934_v25 = vpop.permute.xlu0 %8933 }
 0x79d   : > { %v8935_v1 = vsel %vm1365_vm7, %v8930_v19, %v8932_v15  ;;  %v8937_v61 = vsel %vm1365_vm7, %v8934_v25, %v10257_v35  ;;  %v8936_v5 = vsel %vm1365_vm7, %v8932_v15, %v8934_v25  ;;  %9791 = vmatprep.mubr.msk.f32.mxu1 %vm9924_vm1, %v9923_v3  ;;  %9008 = vmatprep.mubr.f32.mxu0 %v9923_v3 }
 0x79e   : > { %8974 = vmatprep.subr.mxu0 %v8936_v5  ;;  %9790 = vmatpush3.msra.mxu1 %v8937_v61 }
 0x79f   : > { %8975 = vmatpush1.msra.mxu0 %v8935_v1 }
 0x7a0   : > { %9792 = vmatmul.mubr.msk.f32.vlgmr.msra.gmra.mxu1 %vm574_vm3, %v9369_v46  ;;  %9370 = vmatmul.mubr.msk.f32.vlgmr.msra.gmra.mxu0 %vm574_vm3, %v9369_v46 }
 0x7a9   : > { %v9091_v32 = vpop.permute.xlu0 %9090 }
 0x83b   : > { %v7813_v51 = vpop.f32.mrf.mxu1 }
 0x83c   : > { %v7742_v56 = vpop.f32.mrf.mxu0 }
 0x83d   : > { %v9753_v35 = vpop.f32.mrf.mxu1 }
 0x83e   : > { %v7744_v28 = vpop.f32.mrf.mxu0 }
 0x843   : > { %v7969_v29 = vpop.f32.mrf.mxu1 }
 0x844   : > { %v7898_v7 = vpop.f32.mrf.mxu0  ;;  %v7970_v41 = vadd.f32 %v7969_v29, %v7813_v51 }
 0x845   : > { %v9758_v6 = vpop.f32.mrf.mxu1  ;;  %v7899_v42 = vadd.f32 %v7898_v7, %v7742_v56 }
 0x846   : > { %v7900_v8 = vpop.f32.mrf.mxu0 }
 0x847   : > { %v8127_v3 = vpop.f32.mrf.mxu1  ;;  %v7901_v45 = vadd.f32 %v7900_v8, %v7744_v28 }
 0x848   : > { %v8056_v18 = vpop.f32.mrf.mxu0  ;;  %v8133_v47 = vadd.f32 %v8127_v3, %v7970_v41 }
 0x849   : > { %v9763_v26 = vpop.f32.mrf.mxu1  ;;  %v8131_v27 = vadd.f32 %v8056_v18, %v7899_v42 }
 0x84a   : > { %v8058_v34 = vpop.f32.mrf.mxu0 }
 0x84b   : > { %v8288_v37 = vpop.f32.mrf.mxu1  ;;  %v8132_v50 = vadd.f32 %v8058_v34, %v7901_v45 }
 0x84c   : > { %v8217_v39 = vpop.f32.mrf.mxu0  ;;  %v8294_v31 = vadd.f32 %v8288_v37, %v8133_v47 }
 0x84d   : > { %v9768_v40 = vpop.f32.mrf.mxu1  ;;  %v8292_v12 = vadd.f32 %v8217_v39, %v8131_v27 }
 0x84e   : > { %v8219_v2 = vpop.f32.mrf.mxu0 }
 0x84f   : > { %v8293_v55 = vadd.f32 %v8219_v2, %v8132_v50 }
 0x850   : > { %v8437_v10 = vpop.f32.mrf.mxu1  ;;  %v8366_v30 = vpop.f32.mrf.mxu0 }
 0x851   : > { %v8443_v17 = vadd.f32 %v8437_v10, %v8294_v31  ;;  %v8441_v33 = vadd.f32 %v8366_v30, %v8292_v12 }
 0x852   : > { %v9773_v14 = vpop.f32.mrf.mxu1  ;;  %v8368_v21 = vpop.f32.mrf.mxu0 }
 0x853   : > { %v8442_v62 = vadd.f32 %v8368_v21, %v8293_v55 }
 0x854   : > { %v8598_v43 = vpop.f32.mrf.mxu1  ;;  %v8527_v44 = vpop.f32.mrf.mxu0 }
 0x855   : > { %v8604_v63 = vadd.f32 %v8598_v43, %v8443_v17  ;;  %v8602_v0 = vadd.f32 %v8527_v44, %v8441_v33 }
 0x856   : > { %v9778_v38 = vpop.f32.mrf.mxu1  ;;  %v8529_v49 = vpop.f32.mrf.mxu0 }
 0x857   : > { %v8603_v11 = vadd.f32 %v8529_v49, %v8442_v62 }
 0x858   : > { %v8759_v52 = vpop.f32.mrf.mxu1  ;;  %v8688_v53 = vpop.f32.mrf.mxu0 }
 0x859   : > { %v8765_v13 = vadd.f32 %v8759_v52, %v8604_v63  ;;  %v8763_v9 = vadd.f32 %v8688_v53, %v8602_v0 }
 0x85a   : > { %v9783_v57 = vpop.f32.mrf.mxu1  ;;  %v8690_v59 = vpop.f32.mrf.mxu0 }
 0x85b   : > { %v8764_v48 = vadd.f32 %v8690_v59, %v8603_v11 }
 0x85c   : > { %v8920_v58 = vpop.f32.mrf.mxu1  ;;  %v8849_v36 = vpop.f32.mrf.mxu0 }
 0x85d   : > { %v8926_v15 = vadd.f32 %v8920_v58, %v8765_v13  ;;  %v8924_v4 = vadd.f32 %v8849_v36, %v8763_v9 }
 0x85e   : > { %v9788_v20 = vpop.f32.mrf.mxu1  ;;  %v8851_v23 = vpop.f32.mrf.mxu0 }
 0x85f   : > { %v8925_v19 = vadd.f32 %v8851_v23, %v8764_v48 }
 0x860   : > { %v9081_v24 = vpop.f32.mrf.mxu1  ;;  %v9010_v60 = vpop.f32.mrf.mxu0 }
 0x861   : > { %v9087_v25 = vadd.f32 %v9081_v24, %v8926_v15  ;;  %v9085_v1 = vadd.f32 %v9010_v60, %v8924_v4 }
 0x862   : > { %v9012_v61 = vpop.f32.mrf.mxu0  ;;  %v9793_v5 = vpop.f32.mrf.mxu1 }
 0x863   : > { %v9095_v46 = vadd.f32 %v9091_v32, %v9087_v25  ;;  %v9093_v51 = vadd.f32 %v9091_v32, %v9085_v1  ;;  %v9086_v35 = vadd.f32 %v9012_v61, %v8925_v19 }
 0x865   : > { %vm9098_vm1 = vcmp.ge.f32.partialorder %v9095_v46, 0.0  ;;  %v9101_v56 = vmul.f32 0.2, %v9095_v46  ;;  %vm9096_vm2 = vcmp.ge.f32.partialorder %v9093_v51, 0.0  ;;  %v9099_v28 = vmul.f32 0.2, %v9093_v51 }
 0x866   : > { %v9094_v29 = vadd.f32 %v9091_v32, %v9086_v35 }
 0x867   : > { %v9104_v7 = vsel %vm9098_vm1, %v9095_v46, %v9101_v56  ;;  %v9102_v6 = vsel %vm9096_vm2, %v9093_v51, %v9099_v28 }
 0x868   : > { %v9107_v8 = vsel %vm380_vm9, %v9104_v7, 0.0  ;;  %v9105_v3 = vsel %vm378_vm5, %v9102_v6, 0.0  ;;  %vm9097_vm3 = vcmp.ge.f32.partialorder %v9094_v29, 0.0  ;;  %v9100_v18 = vmul.f32 0.2, %v9094_v29 }
 0x869   : > { %9108 = vst [vmem:[%s365_s30] sm:$0xff] %v9105_v3  ;;  %9110 = vst [vmem:[%s365_s30 + $0x10] sm:$0xff] %v9107_v8 }
 0x86a   : > { %v9103_v26 = vsel %vm9097_vm3, %v9094_v29, %v9100_v18 }
 0x86b   : > { %v9106_v34 = vsel %vm379_vm8, %v9103_v26, 0.0 }
 0x86c   : > { %9109 = vst [vmem:[%s365_s30 + $0x8] sm:$0xff] %v9106_v34 }
 0x86d   : > { %9874 = shalt.err (!%p9871_p3)
}
 0x86e   : > { %s9875_s22 = scalar_lea.hbm %s11456_s17, 384  ;;  %s9879_s30 = scalar_lea.hbm %s11505_s10, 768 }
 0x86f   : > { %p9876_p4 = scmp.ne.s32.totalorder %s11456_s17, %s9875_s22  ;;  %p9880_p9 = scmp.lt.s32.totalorder %s11456_s17, %s11505_s10 }
 0x870   : > { %p9881_p10 = scmp.lt.s32.totalorder %s9879_s30, %s9875_s22 }
 0x871   : > { %p9877_p7 = pnand %p9876_p4, %p10040_p5 }
 0x872   : > { %p9882_p11 = por %p9881_p10, %p9880_p9 }
 0x873   : > { %p9878_p8 = pneg %p9877_p7 }
 0x875   : > { %p9883_p12 = pnand %p9882_p11, %p9878_p8 }
 0x877   : > { %9886 = shalt.err (!%p9883_p12)
}
 0x878   : > { %9797 = dma.vmem_to_hbm [thread:$0]  (%p10040_p5), %s9127_s25, 384, %s11456_s17, %s9112_s27  }
 0x879 PF: > { %p9803_p13 = scmp.ge.s32.totalorder %s9921_s16, 2  ;;  %s9138_s26 = sand.u32 1, %s9909_s13  }
 0x87a   : > { %s9139_s28 = scalar_lea.sflag [#allocation3], %s9138_s26 }
 0x87b   : > { %p9800_p0 = pnand %p9803_p13, %p10044_p6 }
 0x87d   : > { %p9801_p1 = pneg %p9800_p0 }
 0x87f   : > { %9904 = dma.done.wait (%p9801_p1), %s9139_s28, 384  }
 0x880   : > { %9906 = vsyncadd (%p9801_p1), %s9139_s28, 4294966912  ;;  %s11524_s29 = sld [smem:[#allocation5_spill]]  ;;  %p20_p2 = scmp.ge.s32.totalorder %s10027_s19, 4  }
 0x881   : > { %s11525_s13 = smov %s9913_s14  ;;  %s11526_s14 = smov %s9917_s15 }
 0x882   : > { %s11528_s16 = smov %s10027_s19  ;;  %22 = sbr.rel (!%p20_p2) target bundleno = 3 (0x3), region = 149 }
 0x886   : > { %s11527_s15 = smov %s11524_s29 }
 0x887   :  { %9144 = vsyncpa [#allocation3], 1 }
 0x888   :  { %9146 = vsyncpa [#allocation3 + $0x1], 1 }

</bundles_post_ra>
